<compile_context>
chip_gen: v6e
topology: v6e:2x2x1
jax: 0.10.0
libtpu: 0.0.40
codegen_flags: <defaults>
</compile_context>

<pallas_src>
import functools
import math

import jax
import jax.numpy as jnp
from jax import lax
from jax.experimental import pallas as pl
from jax.experimental.pallas import tpu as pltpu


# ----------------------------------------------------------------------------
# Pallas kernels
# ----------------------------------------------------------------------------
def _mm_kernel(x_ref, w_ref, s_ref, b_ref, o_ref, *, relu):
    # x: (tm, Cin) f32, w: (Cin, tc) bf16, s/b: (1, tc) f32, o: (tm, tc)
    y = jnp.dot(x_ref[...].astype(jnp.bfloat16), w_ref[...],
                preferred_element_type=jnp.float32)
    y = y * s_ref[...] + b_ref[...]
    if relu:
        y = jnp.maximum(y, 0.0)
    o_ref[...] = y.astype(o_ref.dtype)


def _mm_res_kernel(x_ref, w_ref, s_ref, b_ref, r_ref, o_ref, *, relu):
    y = jnp.dot(x_ref[...].astype(jnp.bfloat16), w_ref[...],
                preferred_element_type=jnp.float32)
    y = y * s_ref[...] + b_ref[...] + r_ref[...].astype(jnp.float32)
    if relu:
        y = jnp.maximum(y, 0.0)
    o_ref[...] = y.astype(o_ref.dtype)


def _tap_kernel(x_ref, w_ref, s_ref, b_ref, o_ref, pk_ref, *,
                offsets, cin, cin_p, mo, relu, n_ct):
    # x: (1, Min, cin) f32; w: (taps*cin_p, tc) bf16; s/b: (1, tc) f32
    # o: (1, mo, tc); pk: (mo, taps*cin_p) bf16 packed-LHS scratch.
    def pack():
        if cin != cin_p:
            # Pad K-rows carry zero weights; zero the scratch so stale VMEM
            # contents (possibly NaN) cannot pollute the accumulation.
            pk_ref[...] = jnp.zeros_like(pk_ref)
        for t, d in enumerate(offsets):
            pk_ref[:, t * cin_p:t * cin_p + cin] = (
                x_ref[0, d:d + mo, :].astype(jnp.bfloat16))

    if n_ct == 1:
        pack()
    else:
        # Pack once per image; reuse the scratch for the remaining Cout tiles.
        pl.when(pl.program_id(1) == 0)(pack)

    y = jnp.dot(pk_ref[...], w_ref[...], preferred_element_type=jnp.float32)
    y = y * s_ref[...] + b_ref[...]
    if relu:
        y = jnp.maximum(y, 0.0)
    o_ref[0] = y.astype(o_ref.dtype)


# ----------------------------------------------------------------------------
# Tiling helpers + pallas_call wrappers
# ----------------------------------------------------------------------------
def _round_up(x, m):
    return ((x + m - 1) // m) * m


def _pad_cout(cout):
    # 128 alignment for small Cout; 256 alignment above 256 so v6e/v7x get
    # full-width 256 N tiles on layer3/4 convs.
    return _round_up(cout, 128) if cout <= 256 else _round_up(cout, 256)


def _cout_tile(cout_p):
    return 256 if (cout_p >= 256 and cout_p % 256 == 0) else 128


def _pick_m_tile(m):
    for t in (1024, 512, 256, 128, 64, 32, 16, 8):
        if m % t == 0:
            return t
    return m


def _vmem_budget_mm(tm, cin, tc, has_res):
    xb = tm * cin * 4
    wb = cin * tc * 2
    ob = tm * tc * 4
    rb = ob if has_res else 0
    sb = 4 * tc * 4
    est = 2 * (xb + wb + ob + rb + sb) + tm * tc * 4 + (4 << 20)
    return int(min(max(est, 8 << 20), 40 << 20))


def _vmem_budget_taps(min_rows, cin, ktot, tc, mo):
    xb = min_rows * cin * 4
    wb = ktot * tc * 2
    ob = mo * tc * 4
    sb = 4 * tc * 4
    pk = mo * ktot * 2
    est = 2 * (xb + wb + ob + sb) + pk + mo * tc * 4 + (4 << 20)
    return int(min(max(est, 8 << 20), 40 << 20))


def _pointwise_matmul(x2d, cw, *, relu, residual=None, out_dtype=jnp.float32):
    """y = epi(x2d @ w): fused 1x1 conv / FC with batch+spatial folded into M."""
    w, s, b = cw['w'], cw['s'], cw['b']
    M, Cin = x2d.shape
    cin_w, cout_p = w.shape
    assert cin_w == Cin
    tc = _cout_tile(cout_p)
    tm = _pick_m_tile(M)
    grid = (M // tm, cout_p // tc)

    kernel = _mm_kernel if residual is None else _mm_res_kernel
    kernel = functools.partial(kernel, relu=relu)

    in_specs = [
        pl.BlockSpec((tm, Cin), lambda m, c: (m, 0)),
        pl.BlockSpec((Cin, tc), lambda m, c: (0, c)),
        pl.BlockSpec((1, tc), lambda m, c: (0, c)),
        pl.BlockSpec((1, tc), lambda m, c: (0, c)),
    ]
    args = [x2d, w, s, b]
    if residual is not None:
        in_specs.append(pl.BlockSpec((tm, tc), lambda m, c: (m, c)))
        args.append(residual)

    return pl.pallas_call(
        kernel,
        out_shape=jax.ShapeDtypeStruct((M, cout_p), out_dtype),
        grid=grid,
        in_specs=in_specs,
        out_specs=pl.BlockSpec((tm, tc), lambda m, c: (m, c)),
        compiler_params=pltpu.CompilerParams(
            dimension_semantics=("parallel", "parallel"),
            vmem_limit_bytes=_vmem_budget_mm(tm, Cin, tc, residual is not None),
        ),
    )(*args)


def _tap_conv(xf, cw, *, offsets, mo, relu, out_dtype=jnp.float32):
    """y[g, m, :] = epi( packed_lhs(x[g]) @ w )  — fused KxK conv."""
    w, s, b = cw['w'], cw['s'], cw['b']
    G, Min, Cin = xf.shape
    ktot, cout_p = w.shape
    taps = len(offsets)
    cin_p = ktot // taps
    assert cin_p * taps == ktot and cin_p >= Cin
    tc = _cout_tile(cout_p)
    n_ct = cout_p // tc
    grid = (G, n_ct)

    kernel = functools.partial(_tap_kernel, offsets=tuple(offsets), cin=Cin,
                               cin_p=cin_p, mo=mo, relu=relu, n_ct=n_ct)

    return pl.pallas_call(
        kernel,
        out_shape=jax.ShapeDtypeStruct((G, mo, cout_p), out_dtype),
        grid=grid,
        in_specs=[
            pl.BlockSpec((1, Min, Cin), lambda g, c: (g, 0, 0)),
            pl.BlockSpec((ktot, tc), lambda g, c: (0, c)),
            pl.BlockSpec((1, tc), lambda g, c: (0, c)),
            pl.BlockSpec((1, tc), lambda g, c: (0, c)),
        ],
        out_specs=pl.BlockSpec((1, mo, tc), lambda g, c: (g, 0, c)),
        scratch_shapes=[pltpu.VMEM((mo, ktot), jnp.bfloat16)],
        compiler_params=pltpu.CompilerParams(
            dimension_semantics=("parallel", "arbitrary"),
            vmem_limit_bytes=_vmem_budget_taps(Min, Cin, ktot, tc, mo),
        ),
    )(xf, w, s, b)


# ----------------------------------------------------------------------------
# Conv wrappers (plain-JAX glue: padding / space-to-depth / crops only)
# ----------------------------------------------------------------------------
def conv1x1(x, cw, *, relu, cout, residual=None):
    N, H, W, Cin = x.shape
    M = N * H * W
    x2 = x.reshape(M, Cin)
    r2 = None
    if residual is not None:
        cout_p = cw['w'].shape[-1]
        r = residual
        if r.shape[-1] != cout_p:
            r = jnp.pad(r, ((0, 0), (0, 0), (0, 0), (0, cout_p - r.shape[-1])))
        r2 = r.reshape(M, cout_p)
    y = _pointwise_matmul(x2, cw, relu=relu, residual=r2)
    if y.shape[-1] != cout:
        y = y[:, :cout]
    return y.reshape(N, H, W, cout)


def conv3x3(x, cw, *, stride, relu, cout):
    """3x3 conv, padding=1, stride in {1,2}; stride-2 goes via space-to-depth."""
    N, H, W, Cin = x.shape
    if stride == 1:
        # extra bottom row so every tap's shifted window stays in-bounds
        xp = jnp.pad(x, ((0, 0), (1, 2), (1, 1), (0, 0)))
        Hf, Wf, Ho, Wo, kh, kw, cin_e = H + 3, W + 2, H, W, 3, 3, Cin
    else:
        assert stride == 2 and H % 2 == 0 and W % 2 == 0
        xp = jnp.pad(x, ((0, 0), (1, 1), (1, 1), (0, 0)))
        Hp, Wp = H + 2, W + 2
        xp = xp.reshape(N, Hp // 2, 2, Wp // 2, 2, Cin)
        xp = xp.transpose(0, 1, 3, 2, 4, 5).reshape(N, Hp // 2, Wp // 2, 4 * Cin)
        xp = jnp.pad(xp, ((0, 0), (0, 1), (0, 0), (0, 0)))
        Hf, Wf = Hp // 2 + 1, Wp // 2
        Ho, Wo = (H - 1) // 2 + 1, (W - 1) // 2 + 1
        kh, kw, cin_e = 2, 2, 4 * Cin
    offsets = tuple(i * Wf + j for i in range(kh) for j in range(kw))
    mo = Ho * Wf
    xf = xp.reshape(N, Hf * Wf, cin_e)
    y = _tap_conv(xf, cw, offsets=offsets, mo=mo, relu=relu)
    return y.reshape(N, Ho, Wf, -1)[:, :, :Wo, :cout]


# ----------------------------------------------------------------------------
# Pooling (plain JAX)
# ----------------------------------------------------------------------------
def maxpool3x3_s2_p1(x):
    return lax.reduce_window(x, -jnp.inf, lax.max, (1, 3, 3, 1), (1, 2, 2, 1),
                             ((0, 0), (1, 1), (1, 1), (0, 0)))


def avgpool3x3_p1(x, stride):
    s = lax.reduce_window(x, 0.0, lax.add, (1, 3, 3, 1), (1, stride, stride, 1),
                          ((0, 0), (1, 1), (1, 1), (0, 0)))
    return s / 9.0


def avgpool_k_s(x, s):
    # TODO(synk): exact only when spatial dims divide s (no ceil_mode handling).
    r = lax.reduce_window(x, 0.0, lax.add, (1, s, s, 1), (1, s, s, 1),
                          ((0, 0), (0, 0), (0, 0), (0, 0)))
    return r / float(s * s)


# ----------------------------------------------------------------------------
# Weight preparation (done ONCE at init: fold BN, s2d transform, pad, bf16)
# ----------------------------------------------------------------------------
def make_conv_w(key, cin, cout, k):
    std = math.sqrt(2.0 / (cout * k * k))      # kaiming_normal_, fan_out, relu
    return std * jax.random.normal(key, (cout, cin, k, k), jnp.float32)


def _fold_bn(c, eps=1e-5):
    gamma = jnp.ones((c,), jnp.float32)
    beta = jnp.zeros((c,), jnp.float32)
    mean = jnp.zeros((c,), jnp.float32)
    var = jnp.ones((c,), jnp.float32)
    s = gamma / jnp.sqrt(var + eps)
    return s, beta - mean * s


def _s2d_weight(w):
    """(Cout, Cin, 3, 3) stride-2 conv -> equivalent (Cout, 4*Cin, 2, 2) stride-1."""
    cout, cin, kh, kw = w.shape
    w4 = jnp.zeros((cout, 4 * cin, 2, 2), jnp.float32)
    for a in range(2):
        for b in range(2):
            for p in range(2):
                for q in range(2):
                    i, j = 2 * a + p, 2 * b + q
                    if i < kh and j < kw:
                        ph = 2 * p + q
                        w4 = w4.at[:, ph * cin:(ph + 1) * cin, a, b].set(w[:, :, i, j])
    return w4


def _prep_conv(w, s, b, *, stride):
    cout, cin, kh, kw = w.shape
    if stride != 1:
        assert stride == 2 and kh == 3 and kw == 3
        w = _s2d_weight(w)
        cin, kh, kw = 4 * cin, 2, 2
    taps = kh * kw
    cin_p = cin if taps == 1 else _round_up(cin, 128)   # aligned per-tap K slot
    cout_p = _pad_cout(cout)
    # (Cout,Cin,kh,kw) -> (taps, cin, cout) -> pad cin/cout -> (taps*cin_p, cout_p)
    wt = jnp.transpose(w, (2, 3, 1, 0)).reshape(taps, cin, cout)
    wt = jnp.pad(wt, ((0, 0), (0, cin_p - cin), (0, cout_p - cout)))
    wt = wt.reshape(taps * cin_p, cout_p).astype(jnp.bfloat16)
    sp = jnp.pad(s, (0, cout_p - cout)).reshape(1, cout_p).astype(jnp.float32)
    bp = jnp.pad(b, (0, cout_p - cout)).reshape(1, cout_p).astype(jnp.float32)
    return {'w': wt, 's': sp, 'b': bp}


def _prep_group_branch(ws, bns, stride):
    """Merge the `nums` parallel stage-branch 3x3 convs into one grouped conv."""
    nums, width = len(ws), ws[0].shape[0]
    cg = nums * width
    wg = jnp.zeros((cg, cg, 3, 3), jnp.float32)
    for g, w in enumerate(ws):
        wg = wg.at[g * width:(g + 1) * width, g * width:(g + 1) * width].set(w)
    sg = jnp.concatenate([s for s, _ in bns])
    bg = jnp.concatenate([b for _, b in bns])
    return _prep_conv(wg, sg, bg, stride=stride)


def _prep_fc(fc_w, fc_b):
    nc, fin = fc_w.shape
    nc_p = _pad_cout(nc)
    w = jnp.pad(fc_w.T, ((0, 0), (0, nc_p - nc))).astype(jnp.bfloat16)
    return {'w': w,
            's': jnp.pad(jnp.ones((nc,), jnp.float32), (0, nc_p - nc)).reshape(1, nc_p),
            'b': jnp.pad(fc_b, (0, nc_p - nc)).reshape(1, nc_p)}


# ----------------------------------------------------------------------------
# Architecture plan (static python), init, forward
# ----------------------------------------------------------------------------
def build_plan(layers, baseWidth=26, scale=4, expansion=4):
    plan, inplanes = [], 64
    for planes, blocks, lstride in zip((64, 128, 256, 512), layers, (1, 2, 2, 2)):
        lp = []
        for bi in range(blocks):
            stride = lstride if bi == 0 else 1
            stype = 'stage' if bi == 0 else 'normal'
            width = int(math.floor(planes * (baseWidth / 64.0)))
            nums = 1 if scale == 1 else scale - 1
            has_ds = (bi == 0) and (stride != 1 or inplanes != planes * expansion)
            lp.append(dict(inplanes=inplanes, stride=stride, stype=stype,
                           width=width, nums=nums, scale=scale, has_ds=has_ds,
                           out_ch=planes * expansion))
            inplanes = planes * expansion
        plan.append(lp)
    return plan


def init_res2net_params(key, plan, *, scale, num_classes=1000):
    keys = iter(jax.random.split(key, 128))
    params = {'stem': []}
    for cin, cout, stride in ((3, 32, 2), (32, 32, 1), (32, 64, 1)):
        w = make_conv_w(next(keys), cin, cout, 3)
        s, b = _fold_bn(cout)
        params['stem'].append(_prep_conv(w, s, b, stride=stride))
    for li, lplan in enumerate(plan, start=1):
        blocks = []
        for cfg in lplan:
            width, nums = cfg['width'], cfg['nums']
            inpl, outc = cfg['inplanes'], cfg['out_ch']
            bp = {}
            w1 = make_conv_w(next(keys), inpl, width * scale, 1)
            s1, b1 = _fold_bn(width * scale)
            bp['conv1'] = _prep_conv(w1, s1, b1, stride=1)
            bws = [make_conv_w(next(keys), width, width, 3) for _ in range(nums)]
            bbn = [_fold_bn(width) for _ in range(nums)]
            if cfg['stype'] == 'stage':
                bp['branch'] = _prep_group_branch(bws, bbn, cfg['stride'])
            else:
                bp['branch'] = [_prep_conv(w, s_, b_, stride=1)
                                for w, (s_, b_) in zip(bws, bbn)]
            w3 = make_conv_w(next(keys), width * scale, outc, 1)
            s3, b3 = _fold_bn(outc)
            bp['conv3'] = _prep_conv(w3, s3, b3, stride=1)
            if cfg['has_ds']:
                wd = make_conv_w(next(keys), inpl, outc, 1)
                sd, bd = _fold_bn(outc)
                bp['ds'] = _prep_conv(wd, sd, bd, stride=1)
            blocks.append(bp)
        params[f'layer{li}'] = blocks
    fan_in = 512 * 4
    bound = 1.0 / math.sqrt(fan_in)
    fc_w = jax.random.uniform(next(keys), (num_classes, fan_in), jnp.float32,
                              -bound, bound)
    fc_b = jax.random.uniform(next(keys), (num_classes,), jnp.float32,
                              -bound, bound)
    params['fc'] = _prep_fc(fc_w, fc_b)
    return params


def _block_forward(x, bp, cfg):
    width, nums = cfg['width'], cfg['nums']
    scale_, stride, stype, outc = cfg['scale'], cfg['stride'], cfg['stype'], cfg['out_ch']

    c1 = conv1x1(x, bp['conv1'], relu=True, cout=width * scale_)

    if stype == 'stage':
        br = conv3x3(c1[..., :nums * width], bp['branch'], stride=stride,
                     relu=True, cout=nums * width)
        if scale_ != 1:
            tail = avgpool3x3_p1(c1[..., nums * width:], stride)
            out = jnp.concatenate([br, tail], axis=-1)
        else:
            out = br
    else:
        # TODO(synk): 'normal' blocks have a sequential cross-branch dependency
        # (sp = sp + spx[i]); kept as separate pallas_calls with the pre-add in XLA.
        spx = [c1[..., i * width:(i + 1) * width] for i in range(scale_)]
        outs, sp = [], None
        for i in range(nums):
            sp = spx[i] if i == 0 else sp + spx[i]
            sp = conv3x3(sp, bp['branch'][i], stride=1, relu=True, cout=width)
            outs.append(sp)
        if scale_ != 1:
            outs.append(spx[nums])
        out = jnp.concatenate(outs, axis=-1)

    if cfg['has_ds']:
        r = avgpool_k_s(x, stride) if stride != 1 else x
        residual = conv1x1(r, bp['ds'], relu=False, cout=outc)
    else:
        residual = x

    # conv3 + bn3 + residual add + relu fully fused in one kernel
    return conv1x1(out, bp['conv3'], relu=True, cout=outc, residual=residual)


def res2net_forward(params, x_nchw, *, plan, num_classes):
    x = jnp.transpose(x_nchw, (0, 2, 3, 1)).astype(jnp.float32)   # NCHW -> NHWC
    x = conv3x3(x, params['stem'][0], stride=2, relu=True, cout=32)
    x = conv3x3(x, params['stem'][1], stride=1, relu=True, cout=32)
    x = conv3x3(x, params['stem'][2], stride=1, relu=True, cout=64)  # + bn1 + relu
    x = maxpool3x3_s2_p1(x)
    for li, lplan in enumerate(plan, start=1):
        for bi, cfg in enumerate(lplan):
            x = _block_forward(x, params[f'layer{li}'][bi], cfg)
    x = jnp.mean(x, axis=(1, 2))                                   # avgpool + flatten
    y = _pointwise_matmul(x, params['fc'], relu=False)
    return y[:, :num_classes]


# ----------------------------------------------------------------------------
# Numerical sanity checks of the fused kernels against XLA references
# ----------------------------------------------------------------------------
def _check_conv3x3(key, H, W, cin, cout, stride):
    kx, kw_ = jax.random.split(key)
    x = jax.random.normal(kx, (2, H, W, cin), jnp.float32)
    w = 0.1 * jax.random.normal(kw_, (cout, cin, 3, 3), jnp.float32)
    cw = _prep_conv(w, jnp.ones((cout,), jnp.float32),
                    jnp.zeros((cout,), jnp.float32), stride=stride)
    got = conv3x3(x, cw, stride=stride, relu=False, cout=cout)
    ref = lax.conv_general_dilated(
        x, jnp.transpose(w, (2, 3, 1, 0)), (stride, stride), ((1, 1), (1, 1)),
        dimension_numbers=("NHWC", "HWIO", "NHWC"))
    err = float(jnp.max(jnp.abs(got - ref)) / (jnp.max(jnp.abs(ref)) + 1e-6))
    assert err < 5e-2, f"fused conv mismatch (stride={stride}): rel_err={err}"


def _check_conv1x1(key, H, W, cin, cout):
    kx, kw_ = jax.random.split(key)
    x = jax.random.normal(kx, (2, H, W, cin), jnp.float32)
    w = 0.1 * jax.random.normal(kw_, (cout, cin, 1, 1), jnp.float32)
    cw = _prep_conv(w, jnp.ones((cout,), jnp.float32),
                    jnp.zeros((cout,), jnp.float32), stride=1)
    got = conv1x1(x, cw, relu=False, cout=cout)
    ref = jnp.einsum('nhwc,oc->nhwo', x, w[:, :, 0, 0])
    err = float(jnp.max(jnp.abs(got - ref)) / (jnp.max(jnp.abs(ref)) + 1e-6))
    assert err < 5e-2, f"fused 1x1 conv mismatch: rel_err={err}"


if __name__ == "__main__":
    key = jax.random.PRNGKey(0)
    pkey, xkey, ckey = jax.random.split(key, 3)

    layers, baseWidth, scale, num_classes = (2, 1, 1, 1), 26, 4, 1000
    plan = build_plan(layers, baseWidth=baseWidth, scale=scale)
    params = init_res2net_params(pkey, plan, scale=scale, num_classes=num_classes)

    # sanity-check the packed-tap path (unaligned + aligned Cin) and 1x1 path
    c1, c2, c3 = jax.random.split(ckey, 3)
    _check_conv3x3(c1, 16, 16, 26, 26, stride=1)
    _check_conv3x3(c2, 16, 16, 32, 64, stride=2)
    _check_conv1x1(c3, 8, 8, 64, 96)

    # Input chosen so all strided avg-pools hit evenly-divisible spatial dims.
    x = jax.random.normal(xkey, (2, 3, 64, 64), jnp.float32)  # NCHW

    fwd = jax.jit(functools.partial(res2net_forward, plan=plan,
                                    num_classes=num_classes))
    logits = jax.block_until_ready(fwd(params, x))
    assert logits.shape == (2, num_classes) and logits.dtype == jnp.float32
    print("KERNEL_OK")
</pallas_src>

<mosaic_0001>
module attributes {stable_mosaic.version = 11 : i64} {
  func.func @_tap_kernel(%arg0: i32, %arg1: i32, %arg2: memref<1x342x26xf32, #tpu.memory_space<vmem>>, %arg3: memref<1152x128xbf16, #tpu.memory_space<vmem>>, %arg4: memref<1x128xf32, #tpu.memory_space<vmem>>, %arg5: memref<1x128xf32, #tpu.memory_space<vmem>>, %arg6: memref<1x288x128xf32, #tpu.memory_space<vmem>>, %arg7: memref<288x1152xbf16, #tpu.memory_space<vmem>>) attributes {dimension_semantics = [#tpu.dimension_semantics<parallel>, #tpu.dimension_semantics<arbitrary>], iteration_bounds = array<i64: 2, 1>, scalar_prefetch = 0 : i64, scratch_operands = 1 : i64, tpu.core_type = #tpu.core_type<tc>, window_params = [{transform_indices = @transform_0, window_bounds = array<i64: 1, 342, 26>}, {transform_indices = @transform_1, window_bounds = array<i64: 1152, 128>}, {transform_indices = @transform_2, window_bounds = array<i64: 1, 128>}, {transform_indices = @transform_3, window_bounds = array<i64: 1, 128>}, {transform_indices = @transform_4, window_bounds = array<i64: 1, 288, 128>}]} {
    %cst = arith.constant 0.000000e+00 : bf16
    %0 = vector.broadcast %cst : bf16 to vector<288x1152xbf16>
    %c0 = arith.constant 0 : index
    %c0_0 = arith.constant 0 : index
    %1 = vector.load %arg7[%c0, %c0_0] : memref<288x1152xbf16, #tpu.memory_space<vmem>>, vector<288x1152xbf16>
    tpu.vector_store %arg7[%c0, %c0_0], %0 {strides = array<i32>} : memref<288x1152xbf16, #tpu.memory_space<vmem>>, vector<288x1152xbf16>,
    %c0_1 = arith.constant 0 : index
    %c0_2 = arith.constant 0 : index
    %c0_3 = arith.constant 0 : index
    %2 = vector.load %arg2[%c0_1, %c0_2, %c0_3] : memref<1x342x26xf32, #tpu.memory_space<vmem>>, vector<1x288x26xf32>
    %3 = vector.shape_cast %2 : vector<1x288x26xf32> to vector<288x26xf32>
    %4 = arith.truncf %3 : vector<288x26xf32> to vector<288x26xbf16>
    %c0_4 = arith.constant 0 : index
    %c0_5 = arith.constant 0 : index
    %5 = vector.load %arg7[%c0_4, %c0_5] : memref<288x1152xbf16, #tpu.memory_space<vmem>>, vector<288x26xbf16>
    tpu.vector_store %arg7[%c0_4, %c0_5], %4 {strides = array<i32>} : memref<288x1152xbf16, #tpu.memory_space<vmem>>, vector<288x26xbf16>,
    %c0_6 = arith.constant 0 : index
    %c1 = arith.constant 1 : index
    %c0_7 = arith.constant 0 : index
    %6 = vector.load %arg2[%c0_6, %c1, %c0_7] : memref<1x342x26xf32, #tpu.memory_space<vmem>>, vector<1x288x26xf32>
    %7 = vector.shape_cast %6 : vector<1x288x26xf32> to vector<288x26xf32>
    %8 = arith.truncf %7 : vector<288x26xf32> to vector<288x26xbf16>
    %c0_8 = arith.constant 0 : index
    %c128 = arith.constant 128 : index
    %9 = vector.load %arg7[%c0_8, %c128] : memref<288x1152xbf16, #tpu.memory_space<vmem>>, vector<288x26xbf16>
    tpu.vector_store %arg7[%c0_8, %c128], %8 {strides = array<i32>} : memref<288x1152xbf16, #tpu.memory_space<vmem>>, vector<288x26xbf16>,
    %c0_9 = arith.constant 0 : index
    %c2 = arith.constant 2 : index
    %c0_10 = arith.constant 0 : index
    %10 = vector.load %arg2[%c0_9, %c2, %c0_10] : memref<1x342x26xf32, #tpu.memory_space<vmem>>, vector<1x288x26xf32>
    %11 = vector.shape_cast %10 : vector<1x288x26xf32> to vector<288x26xf32>
    %12 = arith.truncf %11 : vector<288x26xf32> to vector<288x26xbf16>
    %c0_11 = arith.constant 0 : index
    %c256 = arith.constant 256 : index
    %13 = vector.load %arg7[%c0_11, %c256] : memref<288x1152xbf16, #tpu.memory_space<vmem>>, vector<288x26xbf16>
    tpu.vector_store %arg7[%c0_11, %c256], %12 {strides = array<i32>} : memref<288x1152xbf16, #tpu.memory_space<vmem>>, vector<288x26xbf16>,
    %c0_12 = arith.constant 0 : index
    %c18 = arith.constant 18 : index
    %c0_13 = arith.constant 0 : index
    %14 = vector.load %arg2[%c0_12, %c18, %c0_13] : memref<1x342x26xf32, #tpu.memory_space<vmem>>, vector<1x288x26xf32>
    %15 = vector.shape_cast %14 : vector<1x288x26xf32> to vector<288x26xf32>
    %16 = arith.truncf %15 : vector<288x26xf32> to vector<288x26xbf16>
    %c0_14 = arith.constant 0 : index
    %c384 = arith.constant 384 : index
    %17 = vector.load %arg7[%c0_14, %c384] : memref<288x1152xbf16, #tpu.memory_space<vmem>>, vector<288x26xbf16>
    tpu.vector_store %arg7[%c0_14, %c384], %16 {strides = array<i32>} : memref<288x1152xbf16, #tpu.memory_space<vmem>>, vector<288x26xbf16>,
    %c0_15 = arith.constant 0 : index
    %c19 = arith.constant 19 : index
    %c0_16 = arith.constant 0 : index
    %18 = vector.load %arg2[%c0_15, %c19, %c0_16] : memref<1x342x26xf32, #tpu.memory_space<vmem>>, vector<1x288x26xf32>
    %19 = vector.shape_cast %18 : vector<1x288x26xf32> to vector<288x26xf32>
    %20 = arith.truncf %19 : vector<288x26xf32> to vector<288x26xbf16>
    %c0_17 = arith.constant 0 : index
    %c512 = arith.constant 512 : index
    %21 = vector.load %arg7[%c0_17, %c512] : memref<288x1152xbf16, #tpu.memory_space<vmem>>, vector<288x26xbf16>
    tpu.vector_store %arg7[%c0_17, %c512], %20 {strides = array<i32>} : memref<288x1152xbf16, #tpu.memory_space<vmem>>, vector<288x26xbf16>,
    %c0_18 = arith.constant 0 : index
    %c20 = arith.constant 20 : index
    %c0_19 = arith.constant 0 : index
    %22 = vector.load %arg2[%c0_18, %c20, %c0_19] : memref<1x342x26xf32, #tpu.memory_space<vmem>>, vector<1x288x26xf32>
    %23 = vector.shape_cast %22 : vector<1x288x26xf32> to vector<288x26xf32>
    %24 = arith.truncf %23 : vector<288x26xf32> to vector<288x26xbf16>
    %c0_20 = arith.constant 0 : index
    %c640 = arith.constant 640 : index
    %25 = vector.load %arg7[%c0_20, %c640] : memref<288x1152xbf16, #tpu.memory_space<vmem>>, vector<288x26xbf16>
    tpu.vector_store %arg7[%c0_20, %c640], %24 {strides = array<i32>} : memref<288x1152xbf16, #tpu.memory_space<vmem>>, vector<288x26xbf16>,
    %c0_21 = arith.constant 0 : index
    %c36 = arith.constant 36 : index
    %c0_22 = arith.constant 0 : index
    %26 = vector.load %arg2[%c0_21, %c36, %c0_22] : memref<1x342x26xf32, #tpu.memory_space<vmem>>, vector<1x288x26xf32>
    %27 = vector.shape_cast %26 : vector<1x288x26xf32> to vector<288x26xf32>
    %28 = arith.truncf %27 : vector<288x26xf32> to vector<288x26xbf16>
    %c0_23 = arith.constant 0 : index
    %c768 = arith.constant 768 : index
    %29 = vector.load %arg7[%c0_23, %c768] : memref<288x1152xbf16, #tpu.memory_space<vmem>>, vector<288x26xbf16>
    tpu.vector_store %arg7[%c0_23, %c768], %28 {strides = array<i32>} : memref<288x1152xbf16, #tpu.memory_space<vmem>>, vector<288x26xbf16>,
    %c0_24 = arith.constant 0 : index
    %c37 = arith.constant 37 : index
    %c0_25 = arith.constant 0 : index
    %30 = vector.load %arg2[%c0_24, %c37, %c0_25] : memref<1x342x26xf32, #tpu.memory_space<vmem>>, vector<1x288x26xf32>
    %31 = vector.shape_cast %30 : vector<1x288x26xf32> to vector<288x26xf32>
    %32 = arith.truncf %31 : vector<288x26xf32> to vector<288x26xbf16>
    %c0_26 = arith.constant 0 : index
    %c896 = arith.constant 896 : index
    %33 = vector.load %arg7[%c0_26, %c896] : memref<288x1152xbf16, #tpu.memory_space<vmem>>, vector<288x26xbf16>
    tpu.vector_store %arg7[%c0_26, %c896], %32 {strides = array<i32>} : memref<288x1152xbf16, #tpu.memory_space<vmem>>, vector<288x26xbf16>,
    %c0_27 = arith.constant 0 : index
    %c38 = arith.constant 38 : index
    %c0_28 = arith.constant 0 : index
    %34 = vector.load %arg2[%c0_27, %c38, %c0_28] : memref<1x342x26xf32, #tpu.memory_space<vmem>>, vector<1x288x26xf32>
    %35 = vector.shape_cast %34 : vector<1x288x26xf32> to vector<288x26xf32>
    %36 = arith.truncf %35 : vector<288x26xf32> to vector<288x26xbf16>
    %c0_29 = arith.constant 0 : index
    %c1024 = arith.constant 1024 : index
    %37 = vector.load %arg7[%c0_29, %c1024] : memref<288x1152xbf16, #tpu.memory_space<vmem>>, vector<288x26xbf16>
    tpu.vector_store %arg7[%c0_29, %c1024], %36 {strides = array<i32>} : memref<288x1152xbf16, #tpu.memory_space<vmem>>, vector<288x26xbf16>,
    %c0_30 = arith.constant 0 : index
    %c0_31 = arith.constant 0 : index
    %38 = vector.load %arg7[%c0_30, %c0_31] : memref<288x1152xbf16, #tpu.memory_space<vmem>>, vector<288x1152xbf16>
    %c0_32 = arith.constant 0 : index
    %c0_33 = arith.constant 0 : index
    %39 = vector.load %arg3[%c0_32, %c0_33] : memref<1152x128xbf16, #tpu.memory_space<vmem>>, vector<1152x128xbf16>
    %cst_34 = arith.constant dense<0.000000e+00> : vector<288x128xf32>
    %40 = tpu.matmul %38, %39, %cst_34 {dimension_numbers = #tpu.dot_dimension_numbers<[1], [0], [0], [1], [0, 0, 1, 1], [], []>} : vector<288x1152xbf16>, vector<1152x128xbf16>, vector<288x128xf32> -> vector<288x128xf32>
    %c0_35 = arith.constant 0 : index
    %c0_36 = arith.constant 0 : index
    %41 = vector.load %arg4[%c0_35, %c0_36] : memref<1x128xf32, #tpu.memory_space<vmem>>, vector<1x128xf32>
    %42 = vector.broadcast %41 : vector<1x128xf32> to vector<288x128xf32>
    %43 = arith.mulf %40, %42 : vector<288x128xf32>
    %c0_37 = arith.constant 0 : index
    %c0_38 = arith.constant 0 : index
    %44 = vector.load %arg5[%c0_37, %c0_38] : memref<1x128xf32, #tpu.memory_space<vmem>>, vector<1x128xf32>
    %45 = vector.broadcast %44 : vector<1x128xf32> to vector<288x128xf32>
    %46 = arith.addf %43, %45 : vector<288x128xf32>
    %c0_39 = arith.constant 0 : index
    %c0_40 = arith.constant 0 : index
    %c0_41 = arith.constant 0 : index
    %47 = vector.load %arg6[%c0_39, %c0_40, %c0_41] : memref<1x288x128xf32, #tpu.memory_space<vmem>>, vector<1x288x128xf32>
    %48 = vector.shape_cast %47 : vector<1x288x128xf32> to vector<288x128xf32>
    %49 = vector.shape_cast %46 : vector<288x128xf32> to vector<1x288x128xf32>
    tpu.vector_store %arg6[%c0_39, %c0_40, %c0_41], %49 {strides = array<i32>} : memref<1x288x128xf32, #tpu.memory_space<vmem>>, vector<1x288x128xf32>,
    return
  }
  func.func @transform_0(%arg0: i32, %arg1: i32) -> (i32, i32, i32) {
    %c0_i32 = arith.constant 0 : i32
    %c0_i32_0 = arith.constant 0 : i32
    %c0_i32_1 = arith.constant 0 : i32
    return %arg0, %c0_i32, %c0_i32_0 : i32, i32, i32
  }
  func.func @transform_1(%arg0: i32, %arg1: i32) -> (i32, i32) {
    %c0_i32 = arith.constant 0 : i32
    %c0_i32_0 = arith.constant 0 : i32
    return %c0_i32, %arg1 : i32, i32
  }
  func.func @transform_2(%arg0: i32, %arg1: i32) -> (i32, i32) {
    %c0_i32 = arith.constant 0 : i32
    %c0_i32_0 = arith.constant 0 : i32
    return %c0_i32, %arg1 : i32, i32
  }
  func.func @transform_3(%arg0: i32, %arg1: i32) -> (i32, i32) {
    %c0_i32 = arith.constant 0 : i32
    %c0_i32_0 = arith.constant 0 : i32
    return %c0_i32, %arg1 : i32, i32
  }
  func.func @transform_4(%arg0: i32, %arg1: i32) -> (i32, i32, i32) {
    %c0_i32 = arith.constant 0 : i32
    %c0_i32_0 = arith.constant 0 : i32
    return %arg0, %c0_i32, %arg1 : i32, i32, i32
  }
}

</mosaic_0001>

<bundles_post_ra>
// kernel: tpu_custom_call.1
= control target key start
LH: loop header
LB: loop body
LE: loop exit
PB: predicated region body
PF: predicated region fallthrough
CT: control target
= control target key end

     0   :  { %9 = vsyncpa [#allocation4], 0  ;;  %s8114_s0 = inlined_call_operand.vmem [shape: f32[2,342,26], index: 0, kind: input, shape index: {}]   ;;  %s8115_s1 = inlined_call_operand.vmem [shape: bf16[1152,128], index: 1, kind: input, shape index: {}]   ;;  %s8116_s2 = inlined_call_operand.vmem [shape: f32[1,128], index: 2, kind: input, shape index: {}]   ;;  %s8117_s3 = inlined_call_operand.vmem [shape: f32[1,128], index: 3, kind: input, shape index: {}]   ;;  %s8118_s4 = inlined_call_operand.hbm [shape: f32[2,288,128], index: 4, kind: output, shape index: {}]  }
   0x1   :  { %11 = vsyncpa [#allocation4 + $0x1], 0  ;;  %s6537_s15 = smov 0   ;;  %s6539_s16 = smov 0  }
   0x2   :  { %s6541_s17 = smov 0   ;;  %s6543_s18 = smov 0  }
   0x3   :  { %s6545_s19 = smov 0   ;;  %s6547_s20 = smov 0  }
   0x4 LB: > { %s5098_s21 = sadd.s32 4294967295, %s6506_s20   ;;  %s5099_s22 = sadd.s32 4294967294, %s6506_s20   ;;  %s6506_s20 = sphi %s6547_s20, %s17_s20   ;;  %s6502_s19 = sphi %s6545_s19, %s8147_s19   ;;  %s6498_s18 = sphi %s6543_s18, %s8146_s18   ;;  %s6494_s17 = sphi %s6541_s17, %s8145_s17   ;;  %s6490_s16 = sphi %s6539_s16, %s8144_s16   ;;  %s6486_s15 = sphi %s6537_s15, %s8143_s15  }
   0x5   : > { %s29_s23 = sadd.s32 1, %s6502_s19  ;;  %s142_s24 = sadd.s32 1, %s6494_s17 }
   0x6   : > { %p31_p0 = scmp.ge.s32.totalorder %s29_s23, 2  ;;  %p152_p1 = scmp.ne.s32.totalorder %s6494_s17, %s6490_s16 }
   0x7   : > { %p153_p2 = scmp.eq.s32.totalorder %s5098_s21, 1  ;;  %p158_p3 = scmp.ne.s32.totalorder %s6490_s16, %s6486_s15 }
   0x8   : > { %s8149_s23 = smov (%p31_p0, %s29_s23), 0  ;;  %p159_p5 = scmp.eq.s32.totalorder %s5099_s22, 1 }
   0x9   : > { %p6577_p4 = por %p153_p2, %p152_p1  ;;  %s137_s26 = ssub.s32 %s6502_s19, %s8149_s23 }
   0xa   : > { %p5105_p6 = scmp.ge.s32.totalorder %s6506_s20, 1  ;;  %p140_p7 = scmp.eq.s32.totalorder %s137_s26, 0 }
   0xb   : > { %p6584_p8 = por %p159_p5, %p158_p3  ;;  %p204_p9 = scmp.lt.s32.totalorder %s6506_s20, 3 }
   0xc   : > { %s6590_s28 = scalar_select %p140_p7, %s6494_s17, %s142_s24  }
   0xd   : > { %p205_p10 = pnand %p5105_p6, %p204_p9 }
   0xf   : > { %208 = sbr.rel (%p205_p10) target bundleno = 661 (0x295), region = 36 }
  0x14   : > { %v6595_v0 = vld [vmem:[%s8115_s1 + $0x38] sm:$0xff]   ;;  %v6508_v1 = vmov 0   ;;  %v6151_v3 = vld [vmem:[%s8115_s1 + $0x30] sm:$0xff]   ;;  %v6153_v5 = vld [vmem:[%s8115_s1 + $0x28] sm:$0xff]   ;;  %p240_p11 = scmp.lt.s32.totalorder %s6498_s18, 1  ;;  %vm616_vm0 = vcmask 207872  }
  0x15   : > { %3965 = vmatprep.subr.bf16.mxu0 %v6508_v1  ;;  %256 = vst [vmem:[#allocation2] sm:$0xff] %v6508_v1  ;;  %257 = vst [vmem:[#allocation2 + $0x8] sm:$0xff] %v6508_v1  ;;  %4142 = vmatprep.subr.bf16.mxu1 %v6508_v1  ;;  %v6150_v2 = vld [vmem:[%s8115_s1 + $0xb8] sm:$0xff]   ;;  %v6152_v4 = vld [vmem:[%s8115_s1 + $0xb0] sm:$0xff]   ;;  %s6090_s5 = smul.u32 4608, %s6498_s18  ;;  %s6509_s12 = smov [#allocation3]  }
  0x16   : > { %258 = vst [vmem:[#allocation2 + $0x10] sm:$0xff] %v6508_v1  ;;  %259 = vst [vmem:[#allocation2 + $0x18] sm:$0xff] %v6508_v1  ;;  %3966 = vmatpush1.bf16.msra.mxu0 %v6595_v0  ;;  %4143 = vmatpush1.bf16.msra.mxu1 %v6150_v2  ;;  %v6154_v6 = vld [vmem:[%s8115_s1 + $0xa8] sm:$0xff]   ;;  %v6155_v7 = vld [vmem:[%s8115_s1 + $0x20] sm:$0xff]   ;;  %s241_s11 = scalar_select %p240_p11, %s6498_s18, 1 }
  0x17   : > { %260 = vst [vmem:[#allocation2 + $0x20] sm:$0xf] %v6508_v1  ;;  %261 = vst [vmem:[#allocation2 + $0x24] sm:$0xff] %v6508_v1  ;;  %3967 = vmatprep.subr.bf16.mxu0 %v6508_v1  ;;  %4144 = vmatprep.subr.bf16.mxu1 %v6508_v1  ;;  %v6156_v8 = vld [vmem:[%s8115_s1 + $0xa0] sm:$0xff]   ;;  %v6157_v9 = vld [vmem:[%s8115_s1 + $0x18] sm:$0xff]   ;;  %s8060_s10 = scalar_lea.hbm %s8118_s4, %s6090_s5  ;;  %s6434_s13 = sshll.u32 %s6509_s12, 4  ;;  %s6435_s13 = int_to_ptr.vmem [resolvable:$false] %s6434_s13 }
  0x18   : > { %262 = vst [vmem:[#allocation2 + $0x2c] sm:$0xff] %v6508_v1  ;;  %263 = vst [vmem:[#allocation2 + $0x34] sm:$0xff] %v6508_v1  ;;  %v6158_v10 = vld [vmem:[%s8115_s1 + $0x98] sm:$0xff]   ;;  %v6159_v11 = vld [vmem:[%s8115_s1 + $0x10] sm:$0xff]   ;;  %s6089_s22 = smul.u32 344, %s241_s11  ;;  %s6436_s14 = scalar_lea.vmem %s6435_s13, 9216 }
  0x19   : > { %264 = vst [vmem:[#allocation2 + $0x3c] sm:$0xff] %v6508_v1  ;;  %265 = vst [vmem:[#allocation2 + $0x44] sm:$0xf] %v6508_v1  ;;  %v6160_v12 = vld [vmem:[%s8115_s1 + $0x90] sm:$0xff]   ;;  %v6161_v13 = vld [vmem:[%s8115_s1 + $0x8] sm:$0xff]  }
  0x1a   : > { %266 = vst [vmem:[#allocation2 + $0x48] sm:$0xff] %v6508_v1  ;;  %267 = vst [vmem:[#allocation2 + $0x50] sm:$0xff] %v6508_v1  ;;  %3968 = vmatpush1.bf16.msra.mxu0 %v6151_v3  ;;  %4145 = vmatpush1.bf16.msra.mxu1 %v6152_v4  ;;  %v6162_v14 = vld [vmem:[%s8115_s1 + $0x88] sm:$0xff]   ;;  %v6163_v15 = vld [vmem:[%s8115_s1] sm:$0xff]   ;;  %s6844_s7 = scalar_lea.vmem %s8114_s0, %s6089_s22 }
  0x1b   : > { %268 = vst [vmem:[#allocation2 + $0x58] sm:$0xff] %v6508_v1  ;;  %269 = vst [vmem:[#allocation2 + $0x60] sm:$0xff] %v6508_v1  ;;  %3969 = vmatprep.subr.bf16.mxu0 %v6508_v1  ;;  %4146 = vmatprep.subr.bf16.mxu1 %v6508_v1  ;;  %v6164_v16 = vld [vmem:[%s8115_s1 + $0x80] sm:$0xff]   ;;  %v6165_v17 = vld [vmem:[%s8115_s1 + $0x78] sm:$0xff]  }
  0x1c   : > { %270 = vst [vmem:[#allocation2 + $0x68] sm:$0xf] %v6508_v1  ;;  %271 = vst [vmem:[#allocation2 + $0x6c] sm:$0xff] %v6508_v1  ;;  %v6166_v18 = vld [vmem:[%s8115_s1 + $0xf8] sm:$0xff]   ;;  %v6167_v19 = vld [vmem:[%s8115_s1 + $0x70] sm:$0xff]  }
  0x1d   : > { %272 = vst [vmem:[#allocation2 + $0x74] sm:$0xff] %v6508_v1  ;;  %273 = vst [vmem:[#allocation2 + $0x7c] sm:$0xff] %v6508_v1  ;;  %v436_v20 = vld [vmem:[%s6844_s7] sm:$0xff]  ;;  %v437_v21 = vld [vmem:[%s6844_s7 + $0x8] sm:$0xff] }
  0x1e   : > { %274 = vst [vmem:[#allocation2 + $0x84] sm:$0xff] %v6508_v1  ;;  %275 = vst [vmem:[#allocation2 + $0x8c] sm:$0xf] %v6508_v1  ;;  %3970 = vmatpush1.bf16.msra.mxu0 %v6153_v5  ;;  %4147 = vmatpush1.bf16.msra.mxu1 %v6154_v6  ;;  %v653_v22 = vld [vmem:[%s6844_s7 + $0x1] sm:$0xff]  ;;  %v5670_v23 = vpack.c.bf16 %v436_v20, %v436_v20  ;;  %v5671_v24 = vpack.c.bf16 %v437_v21, %v437_v21  ;;  %v654_v25 = vld [vmem:[%s6844_s7 + $0x9] sm:$0xff] }
  0x1f   : > { %276 = vst [vmem:[#allocation2 + $0x90] sm:$0xff] %v6508_v1  ;;  %277 = vst [vmem:[#allocation2 + $0x98] sm:$0xff] %v6508_v1  ;;  %3971 = vmatprep.subr.bf16.mxu0 %v6508_v1  ;;  %4148 = vmatprep.subr.bf16.mxu1 %v6508_v1  ;;  %v5706_v26 = vpack.c.bf16 %v653_v22, %v653_v22  ;;  %v869_v27 = vld [vmem:[%s6844_s7 + $0x2] sm:$0xff]  ;;  %v870_v28 = vld [vmem:[%s6844_s7 + $0xa] sm:$0xff]  ;;  %v5707_v29 = vpack.c.bf16 %v654_v25, %v654_v25 }
  0x20   : > { %278 = vst [vmem:[#allocation2 + $0xa0] sm:$0xff] %v6508_v1  ;;  %279 = vst [vmem:[#allocation2 + $0xa8] sm:$0xff] %v6508_v1  ;;  %v5742_v30 = vpack.c.bf16 %v869_v27, %v869_v27  ;;  %v5743_v31 = vpack.c.bf16 %v870_v28, %v870_v28  ;;  %v1085_v32 = vld [vmem:[%s6844_s7 + $0x12] sm:$0xff]  ;;  %v1086_v33 = vld [vmem:[%s6844_s7 + $0x1a] sm:$0xff] }
  0x21   : > { %280 = vst [vmem:[#allocation2 + $0xb0] sm:$0xf] %v6508_v1  ;;  %281 = vst [vmem:[#allocation2 + $0xb4] sm:$0xff] %v6508_v1  ;;  %v6168_v34 = vld [vmem:[%s8115_s1 + $0xf0] sm:$0xff]   ;;  %v5778_v35 = vpack.c.bf16 %v1085_v32, %v1085_v32  ;;  %v5779_v36 = vpack.c.bf16 %v1086_v33, %v1086_v33  ;;  %v439_v38 = vld [vmem:[%s6844_s7 + $0x18] sm:$0xff] }
  0x22   : > { %282 = vst [vmem:[#allocation2 + $0xbc] sm:$0xff] %v6508_v1  ;;  %283 = vst [vmem:[#allocation2 + $0xc4] sm:$0xff] %v6508_v1  ;;  %3972 = vmatpush1.bf16.msra.mxu0 %v6155_v7  ;;  %4149 = vmatpush1.bf16.msra.mxu1 %v6156_v8  ;;  %v438_v37 = vld [vmem:[%s6844_s7 + $0x10] sm:$0xff]  ;;  %v656_v41 = vld [vmem:[%s6844_s7 + $0x19] sm:$0xff]  ;;  %v5673_v42 = vpack.c.bf16 %v439_v38, %v439_v38 }
  0x23   : > { %284 = vst [vmem:[#allocation2 + $0xcc] sm:$0xff] %v6508_v1  ;;  %285 = vst [vmem:[#allocation2 + $0xd4] sm:$0xf] %v6508_v1  ;;  %3973 = vmatprep.subr.bf16.mxu0 %v6508_v1  ;;  %4150 = vmatprep.subr.bf16.mxu1 %v6508_v1  ;;  %v5672_v39 = vpack.c.bf16 %v438_v37, %v438_v37  ;;  %v655_v40 = vld [vmem:[%s6844_s7 + $0x11] sm:$0xff]  ;;  %v5709_v44 = vpack.c.bf16 %v656_v41, %v656_v41  ;;  %v1087_v45 = vld [vmem:[%s6844_s7 + $0x22] sm:$0xff] }
  0x24   : > { %286 = vst [vmem:[#allocation2 + $0xd8] sm:$0xff] %v6508_v1  ;;  %287 = vst [vmem:[#allocation2 + $0xe0] sm:$0xff] %v6508_v1  ;;  %v5708_v43 = vpack.c.bf16 %v655_v40, %v655_v40  ;;  %v1088_v46 = vld [vmem:[%s6844_s7 + $0x2a] sm:$0xff]  ;;  %v5780_v48 = vpack.c.bf16 %v1087_v45, %v1087_v45  ;;  %v440_v51 = vld [vmem:[%s6844_s7 + $0x20] sm:$0xff] }
  0x25   : > { %288 = vst [vmem:[#allocation2 + $0xe8] sm:$0xff] %v6508_v1  ;;  %289 = vst [vmem:[#allocation2 + $0xf0] sm:$0xff] %v6508_v1  ;;  %v6169_v47 = vld [vmem:[%s8115_s1 + $0x68] sm:$0xff]   ;;  %v5781_v49 = vpack.c.bf16 %v1088_v46, %v1088_v46  ;;  %v5674_v53 = vpack.c.bf16 %v440_v51, %v440_v51  ;;  %v1089_v59 = vld [vmem:[%s6844_s7 + $0x32] sm:$0xff] }
  0x26   : > { %290 = vst [vmem:[#allocation2 + $0xf8] sm:$0xf] %v6508_v1  ;;  %291 = vst [vmem:[#allocation2 + $0xfc] sm:$0xff] %v6508_v1  ;;  %3974 = vmatpush1.bf16.msra.mxu0 %v6157_v9  ;;  %4151 = vmatpush1.bf16.msra.mxu1 %v6158_v10  ;;  %v6170_v50 = vld [vmem:[%s8115_s1 + $0xe8] sm:$0xff]   ;;  %v1090_v60 = vld [vmem:[%s6844_s7 + $0x3a] sm:$0xff]  ;;  %v5782_v62 = vpack.c.bf16 %v1089_v59, %v1089_v59 }
  0x27   : > { %292 = vst [vmem:[#allocation2 + $0x104] sm:$0xff] %v6508_v1  ;;  %293 = vst [vmem:[#allocation2 + $0x10c] sm:$0xff] %v6508_v1  ;;  %3975 = vmatprep.subr.bf16.mxu0 %v6508_v1  ;;  %4152 = vmatprep.subr.bf16.mxu1 %v6508_v1  ;;  %v441_v52 = vld [vmem:[%s6844_s7 + $0x28] sm:$0xff]  ;;  %v6171_v61 = vld [vmem:[%s8115_s1 + $0x60] sm:$0xff]   ;;  %v5783_v63 = vpack.c.bf16 %v1090_v60, %v1090_v60 }
  0x28   : > { %294 = vst [vmem:[#allocation2 + $0x114] sm:$0xff] %v6508_v1  ;;  %295 = vst [vmem:[#allocation2 + $0x11c] sm:$0xf] %v6508_v1  ;;  %v657_v54 = vld [vmem:[%s6844_s7 + $0x21] sm:$0xff]  ;;  %v658_v55 = vld [vmem:[%s6844_s7 + $0x29] sm:$0xff]  ;;  %v5675_v56 = vpack.c.bf16 %v441_v52, %v441_v52 }
  0x29   : > { %296 = vst [vmem:[#allocation2 + $0x120] sm:$0xff] %v6508_v1  ;;  %297 = vst [vmem:[#allocation2 + $0x128] sm:$0xff] %v6508_v1  ;;  %v5710_v57 = vpack.c.bf16 %v657_v54, %v657_v54  ;;  %v5711_v58 = vpack.c.bf16 %v658_v55, %v658_v55  ;;  %v6172_v0 = vld [vmem:[%s8115_s1 + $0xe0] sm:$0xff]   ;;  %v6173_v4 = vld [vmem:[%s8115_s1 + $0x58] sm:$0xff]  }
  0x2a   : > { %298 = vst [vmem:[#allocation2 + $0x130] sm:$0xff] %v6508_v1  ;;  %299 = vst [vmem:[#allocation2 + $0x138] sm:$0xff] %v6508_v1  ;;  %3976 = vmatpush1.bf16.msra.mxu0 %v6159_v11  ;;  %4153 = vmatpush1.bf16.msra.mxu1 %v6160_v12  ;;  %v6174_v5 = vld [vmem:[%s8115_s1 + $0xd8] sm:$0xff]   ;;  %v442_v6 = vld [vmem:[%s6844_s7 + $0x30] sm:$0xff] }
  0x2b   : > { %300 = vst [vmem:[#allocation2 + $0x140] sm:$0xf] %v6508_v1  ;;  %301 = vst [vmem:[#allocation2 + $0x144] sm:$0xff] %v6508_v1  ;;  %3977 = vmatprep.subr.bf16.mxu0 %v6508_v1  ;;  %4154 = vmatprep.subr.bf16.mxu1 %v6508_v1  ;;  %v443_v7 = vld [vmem:[%s6844_s7 + $0x38] sm:$0xff]  ;;  %v5676_v8 = vpack.c.bf16 %v442_v6, %v442_v6  ;;  %v6175_v11 = vld [vmem:[%s8115_s1 + $0x50] sm:$0xff]  }
  0x2c   : > { %302 = vst [vmem:[#allocation2 + $0x14c] sm:$0xff] %v6508_v1  ;;  %303 = vst [vmem:[#allocation2 + $0x154] sm:$0xff] %v6508_v1  ;;  %v659_v9 = vld [vmem:[%s6844_s7 + $0x31] sm:$0xff]  ;;  %v660_v10 = vld [vmem:[%s6844_s7 + $0x39] sm:$0xff]  ;;  %v5677_v12 = vpack.c.bf16 %v443_v7, %v443_v7 }
  0x2d   : > { %304 = vst [vmem:[#allocation2 + $0x15c] sm:$0xff] %v6508_v1  ;;  %305 = vst [vmem:[#allocation2 + $0x164] sm:$0xf] %v6508_v1  ;;  %v6178_v21 = vld [vmem:[%s8115_s1 + $0xc8] sm:$0xff]   ;;  %v444_v22 = vld [vmem:[%s6844_s7 + $0x40] sm:$0xff] }
  0x2e   : > { %306 = vst [vmem:[#allocation2 + $0x168] sm:$0xff] %v6508_v1  ;;  %307 = vst [vmem:[#allocation2 + $0x170] sm:$0xff] %v6508_v1  ;;  %3978 = vmatpush1.bf16.msra.mxu0 %v6161_v13  ;;  %4155 = vmatpush1.bf16.msra.mxu1 %v6162_v14  ;;  %v5712_v13 = vpack.c.bf16 %v659_v9, %v659_v9  ;;  %v5713_v14 = vpack.c.bf16 %v660_v10, %v660_v10  ;;  %v662_v27 = vld [vmem:[%s6844_s7 + $0x49] sm:$0xff]  ;;  %v6187_v38 = vld [vmem:[%s8115_s1 + $0x138] sm:$0xff]  }
  0x2f   : > { %308 = vst [vmem:[#allocation2 + $0x178] sm:$0xff] %v6508_v1  ;;  %309 = vst [vmem:[#allocation2 + $0x180] sm:$0xff] %v6508_v1  ;;  %3979 = vmatprep.subr.bf16.mxu0 %v6508_v1  ;;  %4156 = vmatprep.subr.bf16.mxu1 %v6508_v1  ;;  %v5678_v25 = vpack.c.bf16 %v444_v22, %v444_v22  ;;  %v447_v40 = vld [vmem:[%s6844_s7 + $0x58] sm:$0xff]  ;;  %v1095_v46 = vld [vmem:[%s6844_s7 + $0x62] sm:$0xff] }
  0x30   : > { %310 = vst [vmem:[#allocation2 + $0x188] sm:$0xf] %v6508_v1  ;;  %311 = vst [vmem:[#allocation2 + $0x18c] sm:$0xff] %v6508_v1  ;;  %v663_v41 = vld [vmem:[%s6844_s7 + $0x51] sm:$0xff]  ;;  %v448_v54 = vld [vmem:[%s6844_s7 + $0x60] sm:$0xff] }
  0x31   : > { %312 = vst [vmem:[#allocation2 + $0x194] sm:$0xff] %v6508_v1  ;;  %313 = vst [vmem:[#allocation2 + $0x19c] sm:$0xff] %v6508_v1  ;;  %v5716_v45 = vpack.c.bf16 %v663_v41, %v663_v41  ;;  %v7013_v59 = vld [vmem:[#allocation2 + $0x10] sm:$0xff]  ;;  %v449_v60 = vld [vmem:[%s6844_s7 + $0x68] sm:$0xff] }
  0x32   : > { %314 = vst [vmem:[#allocation2 + $0x1a4] sm:$0xff] %v6508_v1  ;;  %315 = vst [vmem:[#allocation2 + $0x1ac] sm:$0xf] %v6508_v1  ;;  %3980 = vmatpush1.bf16.msra.mxu0 %v6163_v15  ;;  %4157 = vmatpush1.bf16.msra.mxu1 %v6164_v16  ;;  %v6176_v15 = vld [vmem:[%s8115_s1 + $0xd0] sm:$0xff]   ;;  %v1091_v16 = vld [vmem:[%s6844_s7 + $0x42] sm:$0xff] }
  0x33   : > { %316 = vst [vmem:[#allocation2 + $0x1b0] sm:$0xff] %v6508_v1  ;;  %317 = vst [vmem:[#allocation2 + $0x1b8] sm:$0xff] %v6508_v1  ;;  %3981 = vmatprep.subr.bf16.mxu0 %v6508_v1  ;;  %4158 = vmatprep.subr.bf16.mxu1 %v6508_v1  ;;  %v6215_v41 = vld [vmem:[%s8115_s1 + $0x118] sm:$0xff]  }
  0x34   : > { %318 = vst [vmem:[#allocation2 + $0x1c0] sm:$0xff] %v6508_v1  ;;  %319 = vst [vmem:[#allocation2 + $0x1c8] sm:$0xff] %v6508_v1 }
  0x35   : > { %320 = vst [vmem:[#allocation2 + $0x1d0] sm:$0xf] %v6508_v1  ;;  %321 = vst [vmem:[#allocation2 + $0x1d4] sm:$0xff] %v6508_v1 }
  0x36   : > { %322 = vst [vmem:[#allocation2 + $0x1dc] sm:$0xff] %v6508_v1  ;;  %323 = vst [vmem:[#allocation2 + $0x1e4] sm:$0xff] %v6508_v1  ;;  %3982 = vmatpush2.bf16.msra.mxu0 %v6165_v17  ;;  %4159 = vmatpush2.bf16.msra.mxu1 %v6166_v18  ;;  %v1092_v17 = vld [vmem:[%s6844_s7 + $0x4a] sm:$0xff] }
  0x37   : > { %324 = vst [vmem:[#allocation2 + $0x1ec] sm:$0xff] %v6508_v1  ;;  %325 = vst [vmem:[#allocation2 + $0x1f4] sm:$0xf] %v6508_v1  ;;  %3983 = vmatprep.subr.bf16.mxu0 %v6508_v1  ;;  %4160 = vmatprep.subr.bf16.mxu1 %v6508_v1  ;;  %v6177_v18 = vld [vmem:[%s8115_s1 + $0x48] sm:$0xff]   ;;  %v5785_v20 = vpack.c.bf16 %v1092_v17, %v1092_v17  ;;  %v451_v17 = vld [vmem:[%s6844_s7 + $0x78] sm:$0xff] }
  0x38   : > { %326 = vst [vmem:[#allocation2 + $0x1f8] sm:$0xff] %v6508_v1  ;;  %327 = vst [vmem:[#allocation2 + $0x200] sm:$0xff] %v6508_v1 }
  0x39   : > { %328 = vst [vmem:[#allocation2 + $0x208] sm:$0xff] %v6508_v1  ;;  %329 = vst [vmem:[#allocation2 + $0x210] sm:$0xff] %v6508_v1 }
  0x3a   : > { %330 = vst [vmem:[#allocation2 + $0x218] sm:$0xf] %v6508_v1  ;;  %331 = vst [vmem:[#allocation2 + $0x21c] sm:$0xff] %v6508_v1  ;;  %3984 = vmatpush2.bf16.msra.mxu0 %v6167_v19  ;;  %4161 = vmatpush2.bf16.msra.mxu1 %v6168_v34  ;;  %v5784_v19 = vpack.c.bf16 %v1091_v16, %v1091_v16  ;;  %v6179_v34 = vld [vmem:[%s8115_s1 + $0x40] sm:$0xff]   ;;  %v450_v16 = vld [vmem:[%s6844_s7 + $0x70] sm:$0xff] }
  0x3b   : > { %332 = vst [vmem:[#allocation2 + $0x224] sm:$0xff] %v6508_v1  ;;  %333 = vst [vmem:[#allocation2 + $0x22c] sm:$0xff] %v6508_v1  ;;  %3985 = vmatprep.subr.bf16.mxu0 %v6508_v1  ;;  %4162 = vmatprep.subr.bf16.mxu1 %v6508_v1 }
  0x3c   : > { %334 = vst [vmem:[#allocation2 + $0x234] sm:$0xff] %v6508_v1  ;;  %335 = vst [vmem:[#allocation2 + $0x23c] sm:$0xf] %v6508_v1 }
  0x3d   : > { %336 = vst [vmem:[#allocation2 + $0x240] sm:$0xff] %v6508_v1  ;;  %337 = vst [vmem:[#allocation2 + $0x248] sm:$0xff] %v6508_v1 }
  0x3e   : > { %338 = vst [vmem:[#allocation2 + $0x250] sm:$0xff] %v6508_v1  ;;  %339 = vst [vmem:[#allocation2 + $0x258] sm:$0xff] %v6508_v1  ;;  %3986 = vmatpush2.bf16.msra.mxu0 %v6169_v47  ;;  %4163 = vmatpush2.bf16.msra.mxu1 %v6170_v50  ;;  %v1096_v47 = vld [vmem:[%s6844_s7 + $0x6a] sm:$0xff]  ;;  %v5788_v50 = vpack.c.bf16 %v1095_v46, %v1095_v46  ;;  %v6221_v46 = vld [vmem:[%s8115_s1 + $0x198] sm:$0xff]  }
  0x3f   : > { %340 = vst [vmem:[#allocation2 + $0x260] sm:$0xf] %v6508_v1  ;;  %341 = vst [vmem:[#allocation2 + $0x264] sm:$0xff] %v6508_v1  ;;  %3987 = vmatprep.subr.bf16.mxu0 %v6508_v1  ;;  %4164 = vmatprep.subr.bf16.mxu1 %v6508_v1  ;;  %v5789_v51 = vpack.c.bf16 %v1096_v47, %v1096_v47 }
  0x40   : > { %342 = vst [vmem:[#allocation2 + $0x26c] sm:$0xff] %v6508_v1  ;;  %343 = vst [vmem:[#allocation2 + $0x274] sm:$0xff] %v6508_v1 }
  0x41   : > { %344 = vst [vmem:[#allocation2 + $0x27c] sm:$0xff] %v6508_v1  ;;  %345 = vst [vmem:[#allocation2 + $0x284] sm:$0xf] %v6508_v1 }
  0x42   : > { %346 = vst [vmem:[#allocation2 + $0x288] sm:$0xff] %v6508_v1  ;;  %347 = vst [vmem:[#allocation2 + $0x290] sm:$0xff] %v6508_v1  ;;  %3988 = vmatpush2.bf16.msra.mxu0 %v6171_v61  ;;  %4165 = vmatpush2.bf16.msra.mxu1 %v6172_v0  ;;  %v665_v61 = vld [vmem:[%s6844_s7 + $0x61] sm:$0xff]  ;;  %v5683_v0 = vpack.c.bf16 %v449_v60, %v449_v60 }
  0x43   : > { %348 = vst [vmem:[#allocation2 + $0x298] sm:$0xff] %v6508_v1  ;;  %349 = vst [vmem:[#allocation2 + $0x2a0] sm:$0xff] %v6508_v1  ;;  %3989 = vmatprep.subr.bf16.mxu0 %v6508_v1  ;;  %4166 = vmatprep.subr.bf16.mxu1 %v6508_v1 }
  0x44   : > { %350 = vst [vmem:[#allocation2 + $0x2a8] sm:$0xf] %v6508_v1  ;;  %351 = vst [vmem:[#allocation2 + $0x2ac] sm:$0xff] %v6508_v1 }
  0x45   : > { %352 = vst [vmem:[#allocation2 + $0x2b4] sm:$0xff] %v6508_v1  ;;  %353 = vst [vmem:[#allocation2 + $0x2bc] sm:$0xff] %v6508_v1 }
  0x46   : > { %354 = vst [vmem:[#allocation2 + $0x2c4] sm:$0xff] %v6508_v1  ;;  %355 = vst [vmem:[#allocation2 + $0x2cc] sm:$0xf] %v6508_v1  ;;  %3990 = vmatpush2.bf16.msra.mxu0 %v6173_v4  ;;  %4167 = vmatpush2.bf16.msra.mxu1 %v6174_v5  ;;  %v1097_v4 = vld [vmem:[%s6844_s7 + $0x72] sm:$0xff]  ;;  %v1098_v5 = vld [vmem:[%s6844_s7 + $0x7a] sm:$0xff] }
  0x47   : > { %356 = vst [vmem:[#allocation2 + $0x2d0] sm:$0xff] %v6508_v1  ;;  %357 = vst [vmem:[#allocation2 + $0x2d8] sm:$0xff] %v6508_v1  ;;  %3991 = vmatprep.subr.bf16.mxu0 %v6508_v1  ;;  %4168 = vmatprep.subr.bf16.mxu1 %v6508_v1  ;;  %v5791_v9 = vpack.c.bf16 %v1098_v5, %v1098_v5 }
  0x48   : > { %358 = vst [vmem:[#allocation2 + $0x2e0] sm:$0xff] %v6508_v1  ;;  %359 = vst [vmem:[#allocation2 + $0x2e8] sm:$0xff] %v6508_v1 }
  0x49   : > { %360 = vst [vmem:[#allocation2 + $0x2f0] sm:$0xf] %v6508_v1  ;;  %361 = vst [vmem:[#allocation2 + $0x2f4] sm:$0xff] %v6508_v1 }
  0x4a   : > { %362 = vst [vmem:[#allocation2 + $0x2fc] sm:$0xff] %v6508_v1  ;;  %363 = vst [vmem:[#allocation2 + $0x304] sm:$0xff] %v6508_v1  ;;  %3992 = vmatpush2.bf16.msra.mxu0 %v6175_v11  ;;  %4169 = vmatpush2.bf16.msra.mxu1 %v6176_v15  ;;  %v6201_v11 = vld [vmem:[%s8115_s1 + $0x128] sm:$0xff]   ;;  %v6208_v15 = vld [vmem:[%s8115_s1 + $0x120] sm:$0xff]  }
  0x4b   : > { %364 = vst [vmem:[#allocation2 + $0x30c] sm:$0xff] %v6508_v1  ;;  %365 = vst [vmem:[#allocation2 + $0x314] sm:$0xf] %v6508_v1  ;;  %3993 = vmatprep.subr.bf16.mxu0 %v6508_v1  ;;  %4170 = vmatprep.subr.bf16.mxu1 %v6508_v1 }
  0x4c   : > { %366 = vst [vmem:[#allocation2 + $0x318] sm:$0xff] %v6508_v1  ;;  %367 = vst [vmem:[#allocation2 + $0x320] sm:$0xff] %v6508_v1 }
  0x4d   : > { %368 = vst [vmem:[#allocation2 + $0x328] sm:$0xff] %v6508_v1  ;;  %369 = vst [vmem:[#allocation2 + $0x330] sm:$0xff] %v6508_v1 }
  0x4e   : > { %370 = vst [vmem:[#allocation2 + $0x338] sm:$0xf] %v6508_v1  ;;  %371 = vst [vmem:[#allocation2 + $0x33c] sm:$0xff] %v6508_v1  ;;  %3994 = vmatpush2.bf16.msra.mxu0 %v6177_v18  ;;  %4171 = vmatpush2.bf16.msra.mxu1 %v6178_v21  ;;  %v667_v18 = vld [vmem:[%s6844_s7 + $0x71] sm:$0xff]  ;;  %v668_v21 = vld [vmem:[%s6844_s7 + $0x79] sm:$0xff] }
  0x4f   : > { %372 = vst [vmem:[#allocation2 + $0x344] sm:$0xff] %v6508_v1  ;;  %373 = vst [vmem:[#allocation2 + $0x34c] sm:$0xff] %v6508_v1  ;;  %3995 = vmatprep.subr.bf16.mxu0 %v6508_v1  ;;  %4172 = vmatprep.subr.bf16.mxu1 %v6508_v1  ;;  %v5720_v22 = vpack.c.bf16 %v667_v18, %v667_v18  ;;  %v1106_v18 = vld [vmem:[%s6844_s7 + $0xba] sm:$0xff] }
  0x50   : > { %374 = vst [vmem:[#allocation2 + $0x354] sm:$0xff] %v6508_v1  ;;  %375 = vst [vmem:[#allocation2 + $0x35c] sm:$0xf] %v6508_v1 }
  0x51   : > { %376 = vst [vmem:[#allocation2 + $0x360] sm:$0xff] %v6508_v1  ;;  %377 = vst [vmem:[#allocation2 + $0x368] sm:$0xff] %v6508_v1 }
  0x52   : > { %378 = vst [vmem:[#allocation2 + $0x370] sm:$0xff] %v6508_v1  ;;  %379 = vst [vmem:[#allocation2 + $0x378] sm:$0xff] %v6508_v1  ;;  %3996 = vmatpush2.bf16.msra.mxu0 %v6179_v34 }
  0x53   : > { %380 = vst [vmem:[#allocation2 + $0x380] sm:$0xf] %v6508_v1  ;;  %381 = vst [vmem:[#allocation2 + $0x384] sm:$0xff] %v6508_v1  ;;  %4319 = vmatprep.subr.bf16.mxu0 %v6508_v1 }
  0x54   : > { %382 = vst [vmem:[#allocation2 + $0x38c] sm:$0xff] %v6508_v1  ;;  %383 = vst [vmem:[#allocation2 + $0x394] sm:$0xff] %v6508_v1 }
  0x55   : > { %384 = vst [vmem:[#allocation2 + $0x39c] sm:$0xff] %v6508_v1  ;;  %385 = vst [vmem:[#allocation2 + $0x3a4] sm:$0xf] %v6508_v1 }
  0x56   : > { %386 = vst [vmem:[#allocation2 + $0x3a8] sm:$0xff] %v6508_v1  ;;  %387 = vst [vmem:[#allocation2 + $0x3b0] sm:$0xff] %v6508_v1 }
  0x57   : > { %388 = vst [vmem:[#allocation2 + $0x3b8] sm:$0xff] %v6508_v1  ;;  %389 = vst [vmem:[#allocation2 + $0x3c0] sm:$0xff] %v6508_v1 }
  0x58   : > { %390 = vst [vmem:[#allocation2 + $0x3c8] sm:$0xf] %v6508_v1  ;;  %391 = vst [vmem:[#allocation2 + $0x3cc] sm:$0xff] %v6508_v1 }
  0x59   : > { %392 = vst [vmem:[#allocation2 + $0x3d4] sm:$0xff] %v6508_v1  ;;  %393 = vst [vmem:[#allocation2 + $0x3dc] sm:$0xff] %v6508_v1 }
  0x5a   : > { %394 = vst [vmem:[#allocation2 + $0x3e4] sm:$0xff] %v6508_v1  ;;  %395 = vst [vmem:[#allocation2 + $0x3ec] sm:$0xf] %v6508_v1 }
  0x5b   : > { %396 = vst [vmem:[#allocation2 + $0x3f0] sm:$0xff] %v6508_v1  ;;  %397 = vst [vmem:[#allocation2 + $0x3f8] sm:$0xff] %v6508_v1 }
  0x5c   : > { %398 = vst [vmem:[#allocation2 + $0x400] sm:$0xff] %v6508_v1  ;;  %399 = vst [vmem:[#allocation2 + $0x408] sm:$0xff] %v6508_v1 }
  0x5d   : > { %400 = vst [vmem:[#allocation2 + $0x410] sm:$0xf] %v6508_v1  ;;  %401 = vst [vmem:[#allocation2 + $0x414] sm:$0xff] %v6508_v1 }
  0x5e   : > { %402 = vst [vmem:[#allocation2 + $0x41c] sm:$0xff] %v6508_v1  ;;  %403 = vst [vmem:[#allocation2 + $0x424] sm:$0xff] %v6508_v1 }
  0x5f   : > { %404 = vst [vmem:[#allocation2 + $0x42c] sm:$0xff] %v6508_v1  ;;  %405 = vst [vmem:[#allocation2 + $0x434] sm:$0xf] %v6508_v1 }
  0x60   : > { %406 = vst [vmem:[#allocation2 + $0x438] sm:$0xff] %v6508_v1  ;;  %407 = vst [vmem:[#allocation2 + $0x440] sm:$0xff] %v6508_v1 }
  0x61   : > { %408 = vst [vmem:[#allocation2 + $0x448] sm:$0xff] %v6508_v1  ;;  %409 = vst [vmem:[#allocation2 + $0x450] sm:$0xff] %v6508_v1 }
  0x62   : > { %410 = vst [vmem:[#allocation2 + $0x458] sm:$0xf] %v6508_v1  ;;  %411 = vst [vmem:[#allocation2 + $0x45c] sm:$0xff] %v6508_v1 }
  0x63   : > { %412 = vst [vmem:[#allocation2 + $0x464] sm:$0xff] %v6508_v1  ;;  %413 = vst [vmem:[#allocation2 + $0x46c] sm:$0xff] %v6508_v1 }
  0x64   : > { %414 = vst [vmem:[#allocation2 + $0x474] sm:$0xff] %v6508_v1  ;;  %415 = vst [vmem:[#allocation2 + $0x47c] sm:$0xf] %v6508_v1 }
  0x65   : > { %416 = vst [vmem:[#allocation2 + $0x480] sm:$0xff] %v6508_v1  ;;  %417 = vst [vmem:[#allocation2 + $0x488] sm:$0xff] %v6508_v1 }
  0x66   : > { %418 = vst [vmem:[#allocation2 + $0x490] sm:$0xff] %v6508_v1  ;;  %419 = vst [vmem:[#allocation2 + $0x498] sm:$0xff] %v6508_v1 }
  0x67   : > { %420 = vst [vmem:[#allocation2 + $0x4a0] sm:$0xf] %v6508_v1  ;;  %421 = vst [vmem:[#allocation2 + $0x4a4] sm:$0xff] %v6508_v1 }
  0x68   : > { %422 = vst [vmem:[#allocation2 + $0x4ac] sm:$0xff] %v6508_v1  ;;  %423 = vst [vmem:[#allocation2 + $0x4b4] sm:$0xff] %v6508_v1 }
  0x69   : > { %424 = vst [vmem:[#allocation2 + $0x4bc] sm:$0xff] %v6508_v1  ;;  %425 = vst [vmem:[#allocation2 + $0x4c4] sm:$0xf] %v6508_v1 }
  0x6a   : > { %426 = vst [vmem:[#allocation2 + $0x4c8] sm:$0xff] %v6508_v1  ;;  %427 = vst [vmem:[#allocation2 + $0x4d0] sm:$0xff] %v6508_v1 }
  0x6b   : > { %428 = vst [vmem:[#allocation2 + $0x4d8] sm:$0xff] %v6508_v1  ;;  %429 = vst [vmem:[#allocation2 + $0x4e0] sm:$0xff] %v6508_v1 }
  0x6c   : > { %430 = vst [vmem:[#allocation2 + $0x4e8] sm:$0xf] %v6508_v1  ;;  %431 = vst [vmem:[#allocation2 + $0x4ec] sm:$0xff] %v6508_v1 }
  0x6d   : > { %432 = vst [vmem:[#allocation2 + $0x4f4] sm:$0xff] %v6508_v1  ;;  %433 = vst [vmem:[#allocation2 + $0x4fc] sm:$0xff] %v6508_v1 }
  0x6e   : > { %434 = vst [vmem:[#allocation2 + $0x504] sm:$0xff] %v6508_v1  ;;  %435 = vst [vmem:[#allocation2 + $0x50c] sm:$0xf] %v6508_v1 }
  0x6f   : > { %617 = vst.msk [vmem:[#allocation2] sm:$0xf] %vm616_vm0, %v5670_v23  ;;  %618 = vst.msk [vmem:[#allocation2 + $0x24] sm:$0xf] %vm616_vm0, %v5671_v24  ;;  %v445_v23 = vld [vmem:[%s6844_s7 + $0x48] sm:$0xff] }
  0x70   : > { %833 = vst.msk [vmem:[#allocation2 + $0x4] sm:$0xf] %vm616_vm0, %v5706_v26  ;;  %834 = vst.msk [vmem:[#allocation2 + $0x28] sm:$0xf] %vm616_vm0, %v5707_v29  ;;  %v661_v24 = vld [vmem:[%s6844_s7 + $0x41] sm:$0xff]  ;;  %v5679_v26 = vpack.c.bf16 %v445_v23, %v445_v23  ;;  %v1093_v29 = vld [vmem:[%s6844_s7 + $0x52] sm:$0xff] }
  0x71   : > { %1049 = vst.msk [vmem:[#allocation2 + $0x8] sm:$0xf] %vm616_vm0, %v5742_v30  ;;  %1050 = vst.msk [vmem:[#allocation2 + $0x2c] sm:$0xf] %vm616_vm0, %v5743_v31  ;;  %v5714_v28 = vpack.c.bf16 %v661_v24, %v661_v24  ;;  %v1094_v30 = vld [vmem:[%s6844_s7 + $0x5a] sm:$0xff]  ;;  %v5715_v31 = vpack.c.bf16 %v662_v27, %v662_v27  ;;  %v5786_v32 = vpack.c.bf16 %v1093_v29, %v1093_v29  ;;  %v1099_v23 = vld [vmem:[%s6844_s7 + $0x82] sm:$0xff] }
  0x72   : > { %1265 = vst.msk [vmem:[#allocation2 + $0xc] sm:$0xf] %vm616_vm0, %v5778_v35  ;;  %1266 = vst.msk [vmem:[#allocation2 + $0x30] sm:$0xf] %vm616_vm0, %v5779_v36  ;;  %v5787_v33 = vpack.c.bf16 %v1094_v30, %v1094_v30  ;;  %v1100_v24 = vld [vmem:[%s6844_s7 + $0x8a] sm:$0xff]  ;;  %v5792_v27 = vpack.c.bf16 %v1099_v23, %v1099_v23  ;;  %v452_v29 = vld [vmem:[%s6844_s7 + $0x80] sm:$0xff] }
  0x73   : > { %1051 = vst.msk [vmem:[#allocation2 + $0x50] sm:$0xf] %vm616_vm0, %v5778_v35  ;;  %1052 = vst.msk [vmem:[#allocation2 + $0x74] sm:$0xf] %vm616_vm0, %v5779_v36  ;;  %v6180_v35 = vld [vmem:[%s8115_s1 + $0xc0] sm:$0xff]   ;;  %v453_v30 = vld [vmem:[%s6844_s7 + $0x88] sm:$0xff] }
  0x74   : > { %619 = vst.msk [vmem:[#allocation2 + $0x48] sm:$0xf] %vm616_vm0, %v5672_v39  ;;  %620 = vst.msk [vmem:[#allocation2 + $0x6c] sm:$0xf] %vm616_vm0, %v5673_v42  ;;  %v446_v39 = vld [vmem:[%s6844_s7 + $0x50] sm:$0xff]  ;;  %4173 = vmatpush2.bf16.msra.mxu1 %v6180_v35  ;;  %v5687_v34 = vpack.c.bf16 %v453_v30, %v453_v30 }
  0x75   : > { %835 = vst.msk [vmem:[#allocation2 + $0x4c] sm:$0xf] %vm616_vm0, %v5708_v43  ;;  %836 = vst.msk [vmem:[#allocation2 + $0x70] sm:$0xf] %vm616_vm0, %v5709_v44  ;;  %v5680_v42 = vpack.c.bf16 %v446_v39, %v446_v39  ;;  %v5681_v43 = vpack.c.bf16 %v447_v40, %v447_v40  ;;  %v664_v44 = vld [vmem:[%s6844_s7 + $0x59] sm:$0xff]  ;;  %4496 = vmatprep.subr.bf16.mxu1 %v6508_v1  ;;  %v6194_v1 = vld [vmem:[%s8115_s1 + $0x130] sm:$0xff]  }
  0x76   : > { %1267 = vst.msk [vmem:[#allocation2 + $0x54] sm:$0xf] %vm616_vm0, %v5780_v48  ;;  %1268 = vst.msk [vmem:[#allocation2 + $0x78] sm:$0xf] %vm616_vm0, %v5781_v49  ;;  %v6181_v36 = vld [vmem:[#allocation2] ss:$36 sps:$4 sm:$0xff]  }
  0x77   : > { %1053 = vst.msk [vmem:[#allocation2 + $0x98] sm:$0xf] %vm616_vm0, %v5780_v48  ;;  %1054 = vst.msk [vmem:[#allocation2 + $0xbc] sm:$0xf] %vm616_vm0, %v5781_v49  ;;  %v6183_v2 = vld [vmem:[#allocation2 + $0x4] ss:$36 sps:$4 sm:$0xff]   ;;  %v5717_v49 = vpack.c.bf16 %v664_v44, %v664_v44 }
  0x78   : > { %621 = vst.msk [vmem:[#allocation2 + $0x90] sm:$0xf] %vm616_vm0, %v5674_v53  ;;  %622 = vst.msk [vmem:[#allocation2 + $0xb4] sm:$0xf] %vm616_vm0, %v5675_v56  ;;  %3997 = vmatprep.mubr.bf16.mxu0 %v6183_v2  ;;  %v6184_v37 = vld [vmem:[#allocation2 + $0x8] ss:$36 sps:$4 sm:$0xff]   ;;  %v5718_v2 = vpack.c.bf16 %v665_v61, %v665_v61 }
  0x79   : > { %837 = vst.msk [vmem:[#allocation2 + $0x94] sm:$0xf] %vm616_vm0, %v5710_v57  ;;  %838 = vst.msk [vmem:[#allocation2 + $0xb8] sm:$0xf] %vm616_vm0, %v5711_v58  ;;  %v6186_v3 = vld [vmem:[#allocation2 + $0xc] ss:$36 sps:$4 sm:$0xff]   ;;  %3998 = vmatmul.mubr.bf16.vlgmr.msra.gmra.mxu0 %v6181_v36  ;;  %v5682_v57 = vpack.c.bf16 %v448_v54, %v448_v54 }
  0x7a   : > { %1269 = vst.msk [vmem:[#allocation2 + $0x9c] sm:$0xf] %vm616_vm0, %v5782_v62  ;;  %1270 = vst.msk [vmem:[#allocation2 + $0xc0] sm:$0xf] %vm616_vm0, %v5783_v63  ;;  %4174 = vmatprep.mubr.bf16.mxu1 %v6186_v3  ;;  %v6193_v53 = vld [vmem:[%s8115_s1 + $0x1b8] sm:$0xff]   ;;  %4320 = vmatpush1.bf16.msra.mxu0 %v6187_v38  ;;  %v6200_v58 = vld [vmem:[%s8115_s1 + $0x1b0] sm:$0xff]  }
  0x7b   : > { %1055 = vst.msk [vmem:[#allocation2 + $0xe0] sm:$0xf] %vm616_vm0, %v5782_v62  ;;  %1056 = vst.msk [vmem:[#allocation2 + $0x104] sm:$0xf] %vm616_vm0, %v5783_v63  ;;  %4175 = vmatmul.mubr.bf16.vlgmr.msra.gmra.mxu1 %v6184_v37  ;;  %4321 = vmatprep.subr.bf16.mxu0 %v7013_v59  ;;  %v666_v62 = vld [vmem:[%s6844_s7 + $0x69] sm:$0xff]  ;;  %v1101_v37 = vld [vmem:[%s6844_s7 + $0x92] sm:$0xff] }
  0x7c   : > { %623 = vst.msk [vmem:[#allocation2 + $0xd8] sm:$0xf] %vm616_vm0, %v5676_v8  ;;  %624 = vst.msk [vmem:[#allocation2 + $0xfc] sm:$0xf] %vm616_vm0, %v5677_v12  ;;  %v6188_v48 = vld [vmem:[#allocation2 + $0x4c] ss:$36 sps:$4 sm:$0xff]   ;;  %4497 = vmatpush1.bf16.msra.mxu1 %v6193_v53  ;;  %v5719_v3 = vpack.c.bf16 %v666_v62, %v666_v62  ;;  %v5790_v8 = vpack.c.bf16 %v1097_v4, %v1097_v4 }
  0x7d   : > { %839 = vst.msk [vmem:[#allocation2 + $0xdc] sm:$0xf] %vm616_vm0, %v5712_v13  ;;  %840 = vst.msk [vmem:[#allocation2 + $0x100] sm:$0xf] %vm616_vm0, %v5713_v14  ;;  %v6190_v52 = vld [vmem:[#allocation2 + $0x54] ss:$36 sps:$4 sm:$0xff]   ;;  %4005 = vmatprep.mubr.bf16.mxu0 %v6188_v48  ;;  %4498 = vmatprep.subr.bf16.mxu1 %v7013_v59 }
  0x7e   : > { %1271 = vst.msk [vmem:[#allocation2 + $0xe4] sm:$0xf] %vm616_vm0, %v5784_v19  ;;  %1272 = vst.msk [vmem:[#allocation2 + $0x108] sm:$0xf] %vm616_vm0, %v5785_v20  ;;  %v2391_v55 = vld [vmem:[#allocation2 + $0x48] sm:$0xff]  ;;  %4182 = vmatprep.mubr.bf16.mxu1 %v6190_v52  ;;  %4322 = vmatpush1.bf16.msra.mxu0 %v6194_v1  ;;  %v1102_v38 = vld [vmem:[%s6844_s7 + $0x9a] sm:$0xff] }
  0x7f   : > { %1057 = vst.msk [vmem:[#allocation2 + $0x128] sm:$0xf] %vm616_vm0, %v5784_v19  ;;  %1058 = vst.msk [vmem:[#allocation2 + $0x14c] sm:$0xf] %vm616_vm0, %v5785_v20  ;;  %v2396_v56 = vld [vmem:[#allocation2 + $0x6c] sm:$0xff]  ;;  %4323 = vmatprep.subr.bf16.mxu0 %v7013_v59  ;;  %v5684_v19 = vpack.c.bf16 %v450_v16, %v450_v16  ;;  %v5685_v20 = vpack.c.bf16 %v451_v17, %v451_v17  ;;  %v5795_v44 = vpack.c.bf16 %v1102_v38, %v1102_v38  ;;  %v672_v54 = vld [vmem:[%s6844_s7 + $0x99] sm:$0xff] }
  0x80   : > { %625 = vst.msk [vmem:[#allocation2 + $0x120] sm:$0xf] %vm616_vm0, %v5678_v25  ;;  %626 = vst.msk [vmem:[#allocation2 + $0x144] sm:$0xf] %vm616_vm0, %v5679_v26  ;;  %v5440_v63 = vcombine.low %v2391_v55, %v2396_v56  ;;  %v6192_v6 = vld [vmem:[#allocation2 + $0x50] ss:$36 sps:$4 sm:$0xff]   ;;  %4499 = vmatpush1.bf16.msra.mxu1 %v6200_v58  ;;  %v5721_v26 = vpack.c.bf16 %v668_v21, %v668_v21 }
  0x81   : > { %841 = vst.msk [vmem:[#allocation2 + $0x124] sm:$0xf] %vm616_vm0, %v5714_v28  ;;  %842 = vst.msk [vmem:[#allocation2 + $0x148] sm:$0xf] %vm616_vm0, %v5715_v31  ;;  %v6195_v7 = vld [vmem:[#allocation2 + $0x94] ss:$36 sps:$4 sm:$0xff]   ;;  %4500 = vmatprep.subr.bf16.mxu1 %v7013_v59  ;;  %v5793_v28 = vpack.c.bf16 %v1100_v24, %v1100_v24  ;;  %v5799_v24 = vpack.c.bf16 %v1106_v18, %v1106_v18 }
  0x82   : > { %1273 = vst.msk [vmem:[#allocation2 + $0x12c] sm:$0xf] %vm616_vm0, %v5786_v32  ;;  %1274 = vst.msk [vmem:[#allocation2 + $0x150] sm:$0xf] %vm616_vm0, %v5787_v33  ;;  %v6197_v10 = vld [vmem:[#allocation2 + $0x9c] ss:$36 sps:$4 sm:$0xff]   ;;  %4006 = vmatmul.mubr.bf16.gmra.mxu0 %v5440_v63 }
  0x83   : > { %1059 = vst.msk [vmem:[#allocation2 + $0x170] sm:$0xf] %vm616_vm0, %v5786_v32  ;;  %1060 = vst.msk [vmem:[#allocation2 + $0x194] sm:$0xf] %vm616_vm0, %v5787_v33  ;;  %v7030_v12 = vld [vmem:[#allocation2 + $0x90] sm:$0xff]  ;;  %v6207_v14 = vld [vmem:[%s8115_s1 + $0x1a8] sm:$0xff]   ;;  %4183 = vmatmul.mubr.bf16.gmra.mxu1 %v6192_v6  ;;  %4013 = vmatprep.mubr.bf16.mxu0 %v6195_v7  ;;  %v5686_v33 = vpack.c.bf16 %v452_v29, %v452_v29 }
  0x84   : > { %627 = vst.msk [vmem:[#allocation2 + $0x168] sm:$0xf] %vm616_vm0, %v5680_v42  ;;  %628 = vst.msk [vmem:[#allocation2 + $0x18c] sm:$0xf] %vm616_vm0, %v5681_v43  ;;  %v7032_v13 = vld [vmem:[#allocation2 + $0xb4] sm:$0xff]  ;;  %4190 = vmatprep.mubr.bf16.mxu1 %v6197_v10  ;;  %4324 = vmatpush1.bf16.msra.mxu0 %v6201_v11  ;;  %v6214_v25 = vld [vmem:[%s8115_s1 + $0x1a0] sm:$0xff]   ;;  %v5794_v43 = vpack.c.bf16 %v1101_v37, %v1101_v37 }
  0x85   : > { %843 = vst.msk [vmem:[#allocation2 + $0x16c] sm:$0xf] %vm616_vm0, %v5716_v45  ;;  %844 = vst.msk [vmem:[#allocation2 + $0x190] sm:$0xf] %vm616_vm0, %v5717_v49  ;;  %4325 = vmatprep.subr.bf16.mxu0 %v7013_v59  ;;  %4501 = vmatpush1.bf16.msra.mxu1 %v6207_v14  ;;  %v669_v31 = vld [vmem:[%s6844_s7 + $0x81] sm:$0xff]  ;;  %v5449_v32 = vcombine.low %v7030_v12, %v7032_v13  ;;  %v670_v35 = vld [vmem:[%s6844_s7 + $0x89] sm:$0xff] }
  0x86   : > { %1275 = vst.msk [vmem:[#allocation2 + $0x174] sm:$0xf] %vm616_vm0, %v5788_v50  ;;  %1276 = vst.msk [vmem:[#allocation2 + $0x198] sm:$0xf] %vm616_vm0, %v5789_v51  ;;  %4502 = vmatprep.subr.bf16.mxu1 %v7013_v59  ;;  %v5722_v36 = vpack.c.bf16 %v669_v31, %v669_v31  ;;  %v6199_v39 = vld [vmem:[#allocation2 + $0x98] ss:$36 sps:$4 sm:$0xff]   ;;  %v5723_v42 = vpack.c.bf16 %v670_v35, %v670_v35 }
  0x87   : > { %1061 = vst.msk [vmem:[#allocation2 + $0x1b8] sm:$0xf] %vm616_vm0, %v5788_v50  ;;  %1062 = vst.msk [vmem:[#allocation2 + $0x1dc] sm:$0xf] %vm616_vm0, %v5789_v51  ;;  %v6202_v40 = vld [vmem:[#allocation2 + $0xdc] ss:$36 sps:$4 sm:$0xff]  }
  0x88   : > { %629 = vst.msk [vmem:[#allocation2 + $0x1b0] sm:$0xf] %vm616_vm0, %v5682_v57  ;;  %630 = vst.msk [vmem:[#allocation2 + $0x1d4] sm:$0xf] %vm616_vm0, %v5683_v0  ;;  %v6204_v45 = vld [vmem:[#allocation2 + $0xe4] ss:$36 sps:$4 sm:$0xff]   ;;  %4326 = vmatpush1.bf16.msra.mxu0 %v6208_v15  ;;  %v5725_v57 = vpack.c.bf16 %v672_v54, %v672_v54 }
  0x89   : > { %845 = vst.msk [vmem:[#allocation2 + $0x1b4] sm:$0xf] %vm616_vm0, %v5718_v2  ;;  %846 = vst.msk [vmem:[#allocation2 + $0x1d8] sm:$0xf] %vm616_vm0, %v5719_v3  ;;  %4327 = vmatprep.subr.bf16.mxu0 %v7013_v59  ;;  %4503 = vmatpush1.bf16.msra.mxu1 %v6214_v25  ;;  %v2411_v47 = vld [vmem:[#allocation2 + $0xd8] sm:$0xff]  ;;  %v454_v49 = vld [vmem:[%s6844_s7 + $0x90] sm:$0xff] }
  0x8a   : > { %1277 = vst.msk [vmem:[#allocation2 + $0x1bc] sm:$0xf] %vm616_vm0, %v5790_v8  ;;  %1278 = vst.msk [vmem:[#allocation2 + $0x1e0] sm:$0xf] %vm616_vm0, %v5791_v9  ;;  %4014 = vmatmul.mubr.bf16.gmra.mxu0 %v5449_v32  ;;  %4504 = vmatprep.subr.bf16.mxu1 %v7013_v59  ;;  %v2416_v48 = vld [vmem:[#allocation2 + $0xfc] sm:$0xff]  ;;  %v6222_v51 = vld [vmem:[%s8115_s1 + $0x110] sm:$0xff]   ;;  %v5688_v52 = vpack.c.bf16 %v454_v49, %v454_v49 }
  0x8b   : > { %1063 = vst.msk [vmem:[#allocation2 + $0x200] sm:$0xf] %vm616_vm0, %v5790_v8  ;;  %1064 = vst.msk [vmem:[#allocation2 + $0x224] sm:$0xf] %vm616_vm0, %v5791_v9  ;;  %4191 = vmatmul.mubr.bf16.gmra.mxu1 %v6199_v39  ;;  %4021 = vmatprep.mubr.bf16.mxu0 %v6202_v40  ;;  %v455_v50 = vld [vmem:[%s6844_s7 + $0x98] sm:$0xff]  ;;  %v6228_v55 = vld [vmem:[%s8115_s1 + $0x190] sm:$0xff]   ;;  %v5458_v58 = vcombine.low %v2411_v47, %v2416_v48 }
  0x8c   : > { %631 = vst.msk [vmem:[#allocation2 + $0x1f8] sm:$0xf] %vm616_vm0, %v5684_v19  ;;  %632 = vst.msk [vmem:[#allocation2 + $0x21c] sm:$0xf] %vm616_vm0, %v5685_v20  ;;  %4198 = vmatprep.mubr.bf16.mxu1 %v6204_v45  ;;  %4328 = vmatpush1.bf16.msra.mxu0 %v6215_v41  ;;  %v5689_v53 = vpack.c.bf16 %v455_v50, %v455_v50  ;;  %v671_v1 = vld [vmem:[%s6844_s7 + $0x91] sm:$0xff]  ;;  %v1103_v62 = vld [vmem:[%s6844_s7 + $0xa2] sm:$0xff] }
  0x8d   : > { %847 = vst.msk [vmem:[#allocation2 + $0x1fc] sm:$0xf] %vm616_vm0, %v5720_v22  ;;  %848 = vst.msk [vmem:[#allocation2 + $0x220] sm:$0xf] %vm616_vm0, %v5721_v26  ;;  %4329 = vmatprep.subr.bf16.mxu0 %v7013_v59  ;;  %4505 = vmatpush1.bf16.msra.mxu1 %v6221_v46  ;;  %v5724_v56 = vpack.c.bf16 %v671_v1, %v671_v1  ;;  %v6206_v60 = vld [vmem:[#allocation2 + $0xe0] ss:$36 sps:$4 sm:$0xff]   ;;  %v5796_v3 = vpack.c.bf16 %v1103_v62, %v1103_v62 }
  0x8e   : > { %1279 = vst.msk [vmem:[#allocation2 + $0x204] sm:$0xf] %vm616_vm0, %v5792_v27  ;;  %1280 = vst.msk [vmem:[#allocation2 + $0x228] sm:$0xf] %vm616_vm0, %v5793_v28  ;;  %4506 = vmatprep.subr.bf16.mxu1 %v7013_v59  ;;  %v6209_v61 = vld [vmem:[#allocation2 + $0x124] ss:$36 sps:$4 sm:$0xff]  }
  0x8f   : > { %1065 = vst.msk [vmem:[#allocation2 + $0x248] sm:$0xf] %vm616_vm0, %v5792_v27  ;;  %1066 = vst.msk [vmem:[#allocation2 + $0x26c] sm:$0xf] %vm616_vm0, %v5793_v28  ;;  %v1104_v63 = vld [vmem:[%s6844_s7 + $0xaa] sm:$0xff]  ;;  %v2421_v5 = vld [vmem:[#allocation2 + $0x120] sm:$0xff] }
  0x90   : > { %633 = vst.msk [vmem:[#allocation2 + $0x240] sm:$0xf] %vm616_vm0, %v5686_v33  ;;  %634 = vst.msk [vmem:[#allocation2 + $0x264] sm:$0xf] %vm616_vm0, %v5687_v34  ;;  %v6211_v0 = vld [vmem:[#allocation2 + $0x12c] ss:$36 sps:$4 sm:$0xff]   ;;  %4330 = vmatpush1.bf16.msra.mxu0 %v6222_v51  ;;  %v5797_v4 = vpack.c.bf16 %v1104_v63, %v1104_v63 }
  0x91   : > { %849 = vst.msk [vmem:[#allocation2 + $0x244] sm:$0xf] %vm616_vm0, %v5722_v36  ;;  %850 = vst.msk [vmem:[#allocation2 + $0x268] sm:$0xf] %vm616_vm0, %v5723_v42  ;;  %v6233_v2 = vld [vmem:[%s8115_s1 + $0x108] sm:$0xff]   ;;  %4331 = vmatprep.subr.bf16.mxu0 %v7013_v59  ;;  %4507 = vmatpush1.bf16.msra.mxu1 %v6228_v55  ;;  %v6241_v8 = vld [vmem:[%s8115_s1 + $0x100] sm:$0xff]  }
  0x92   : > { %1281 = vst.msk [vmem:[#allocation2 + $0x24c] sm:$0xf] %vm616_vm0, %v5794_v43  ;;  %1282 = vst.msk [vmem:[#allocation2 + $0x270] sm:$0xf] %vm616_vm0, %v5795_v44  ;;  %v2426_v6 = vld [vmem:[#allocation2 + $0x144] sm:$0xff]  ;;  %4022 = vmatmul.mubr.bf16.gmra.mxu0 %v5458_v58  ;;  %4508 = vmatprep.subr.bf16.mxu1 %v7013_v59  ;;  %v1105_v17 = vld [vmem:[%s6844_s7 + $0xb2] sm:$0xff] }
  0x93   : > { %1067 = vst.msk [vmem:[#allocation2 + $0x290] sm:$0xf] %vm616_vm0, %v5794_v43  ;;  %1068 = vst.msk [vmem:[#allocation2 + $0x2b4] sm:$0xf] %vm616_vm0, %v5795_v44  ;;  %v6239_v7 = vld [vmem:[%s8115_s1 + $0x188] sm:$0xff]   ;;  %4199 = vmatmul.mubr.bf16.gmra.mxu1 %v6206_v60  ;;  %4029 = vmatprep.mubr.bf16.mxu0 %v6209_v61  ;;  %v6247_v9 = vld [vmem:[%s8115_s1 + $0x180] sm:$0xff]   ;;  %v5467_v19 = vcombine.low %v2421_v5, %v2426_v6  ;;  %v5798_v23 = vpack.c.bf16 %v1105_v17, %v1105_v17 }
  0x94   : > { %635 = vst.msk [vmem:[#allocation2 + $0x288] sm:$0xf] %vm616_vm0, %v5688_v52  ;;  %636 = vst.msk [vmem:[#allocation2 + $0x2ac] sm:$0xf] %vm616_vm0, %v5689_v53  ;;  %4206 = vmatprep.mubr.bf16.mxu1 %v6211_v0  ;;  %4332 = vmatpush1.bf16.msra.mxu0 %v6233_v2  ;;  %v456_v10 = vld [vmem:[%s6844_s7 + $0xa0] sm:$0xff]  ;;  %v457_v11 = vld [vmem:[%s6844_s7 + $0xa8] sm:$0xff] }
  0x95   : > { %851 = vst.msk [vmem:[#allocation2 + $0x28c] sm:$0xf] %vm616_vm0, %v5724_v56  ;;  %852 = vst.msk [vmem:[#allocation2 + $0x2b0] sm:$0xf] %vm616_vm0, %v5725_v57  ;;  %v673_v12 = vld [vmem:[%s6844_s7 + $0xa1] sm:$0xff]  ;;  %4333 = vmatprep.subr.bf16.mxu0 %v7013_v59  ;;  %4509 = vmatpush1.bf16.msra.mxu1 %v6239_v7  ;;  %v5690_v13 = vpack.c.bf16 %v456_v10, %v456_v10  ;;  %v5691_v14 = vpack.c.bf16 %v457_v11, %v457_v11  ;;  %v674_v15 = vld [vmem:[%s6844_s7 + $0xa9] sm:$0xff] }
  0x96   : > { %1283 = vst.msk [vmem:[#allocation2 + $0x294] sm:$0xf] %vm616_vm0, %v5796_v3  ;;  %1284 = vst.msk [vmem:[#allocation2 + $0x2b8] sm:$0xf] %vm616_vm0, %v5797_v4  ;;  %v5726_v16 = vpack.c.bf16 %v673_v12, %v673_v12  ;;  %v6213_v20 = vld [vmem:[#allocation2 + $0x128] ss:$36 sps:$4 sm:$0xff]   ;;  %4510 = vmatprep.subr.bf16.mxu1 %v7013_v59  ;;  %v5727_v22 = vpack.c.bf16 %v674_v15, %v674_v15 }
  0x97   : > { %1069 = vst.msk [vmem:[#allocation2 + $0x2d8] sm:$0xf] %vm616_vm0, %v5796_v3  ;;  %1070 = vst.msk [vmem:[#allocation2 + $0x2fc] sm:$0xf] %vm616_vm0, %v5797_v4  ;;  %v6216_v21 = vld [vmem:[#allocation2 + $0x16c] ss:$36 sps:$4 sm:$0xff]  }
  0x98   : > { %v6218_v25 = vld [vmem:[#allocation2 + $0x174] ss:$36 sps:$4 sm:$0xff]   ;;  %637 = vst.msk [vmem:[#allocation2 + $0x2d0] sm:$0xf] %vm616_vm0, %v5690_v13  ;;  %638 = vst.msk [vmem:[#allocation2 + $0x2f4] sm:$0xf] %vm616_vm0, %v5691_v14  ;;  %4334 = vmatpush1.bf16.msra.mxu0 %v6241_v8 }
  0x99   : > { %853 = vst.msk [vmem:[#allocation2 + $0x2d4] sm:$0xf] %vm616_vm0, %v5726_v16  ;;  %v6248_v26 = vld [vmem:[%s8115_s1 + $0x178] sm:$0xff]   ;;  %854 = vst.msk [vmem:[#allocation2 + $0x2f8] sm:$0xf] %vm616_vm0, %v5727_v22  ;;  %v2431_v27 = vld [vmem:[#allocation2 + $0x168] sm:$0xff]  ;;  %4335 = vmatprep.subr.bf16.mxu0 %v7013_v59  ;;  %4511 = vmatpush1.bf16.msra.mxu1 %v6247_v9 }
  0x9a   : > { %1285 = vst.msk [vmem:[#allocation2 + $0x2dc] sm:$0xf] %vm616_vm0, %v5798_v23  ;;  %1286 = vst.msk [vmem:[#allocation2 + $0x300] sm:$0xf] %vm616_vm0, %v5799_v24  ;;  %v2436_v28 = vld [vmem:[#allocation2 + $0x18c] sm:$0xff]  ;;  %v6254_v29 = vld [vmem:[%s8115_s1 + $0x1f8] sm:$0xff]   ;;  %4030 = vmatmul.mubr.bf16.gmra.mxu0 %v5467_v19  ;;  %4512 = vmatprep.subr.bf16.mxu1 %v7013_v59 }
  0x9b   : > { %1071 = vst.msk [vmem:[#allocation2 + $0x320] sm:$0xf] %vm616_vm0, %v5798_v23  ;;  %1072 = vst.msk [vmem:[#allocation2 + $0x344] sm:$0xf] %vm616_vm0, %v5799_v24  ;;  %v6255_v30 = vld [vmem:[%s8115_s1 + $0x170] sm:$0xff]   ;;  %v459_v32 = vld [vmem:[%s6844_s7 + $0xb8] sm:$0xff]  ;;  %4207 = vmatmul.mubr.bf16.gmra.mxu1 %v6213_v20  ;;  %4037 = vmatprep.mubr.bf16.mxu0 %v6216_v21  ;;  %v5476_v44 = vcombine.low %v2431_v27, %v2436_v28 }
  0x9c   : > { %v458_v31 = vld [vmem:[%s6844_s7 + $0xb0] sm:$0xff]  ;;  %v5693_v34 = vpack.c.bf16 %v459_v32, %v459_v32  ;;  %v676_v36 = vld [vmem:[%s6844_s7 + $0xb9] sm:$0xff]  ;;  %v1107_v37 = vld [vmem:[%s6844_s7 + $0xc2] sm:$0xff]  ;;  %4214 = vmatprep.mubr.bf16.mxu1 %v6218_v25  ;;  %4336 = vmatpush2.bf16.msra.mxu0 %v6248_v26 }
  0x9d   : > { %v5692_v33 = vpack.c.bf16 %v458_v31, %v458_v31  ;;  %v675_v35 = vld [vmem:[%s6844_s7 + $0xb1] sm:$0xff]  ;;  %v5729_v39 = vpack.c.bf16 %v676_v36, %v676_v36  ;;  %v5800_v41 = vpack.c.bf16 %v1107_v37, %v1107_v37  ;;  %4337 = vmatprep.subr.bf16.mxu0 %v7013_v59  ;;  %4513 = vmatpush2.bf16.msra.mxu1 %v6254_v29  ;;  %v460_v45 = vld [vmem:[%s6844_s7 + $0xc0] sm:$0xff]  ;;  %v6262_v50 = vld [vmem:[%s8115_s1 + $0x168] sm:$0xff]  }
  0x9e   : > { %v5728_v38 = vpack.c.bf16 %v675_v35, %v675_v35  ;;  %v1108_v40 = vld [vmem:[%s6844_s7 + $0xca] sm:$0xff]  ;;  %640 = vst.msk [vmem:[#allocation2 + $0x33c] sm:$0xf] %vm616_vm0, %v5693_v34  ;;  %4514 = vmatprep.subr.bf16.mxu1 %v7013_v59  ;;  %v6223_v47 = vld [vmem:[#allocation2 + $0x1b4] ss:$36 sps:$4 sm:$0xff]   ;;  %v5694_v48 = vpack.c.bf16 %v460_v45, %v460_v45  ;;  %v677_v1 = vld [vmem:[%s6844_s7 + $0xc1] sm:$0xff] }
  0x9f   : > { %639 = vst.msk [vmem:[#allocation2 + $0x318] sm:$0xf] %vm616_vm0, %v5692_v33  ;;  %v5801_v42 = vpack.c.bf16 %v1108_v40, %v1108_v40  ;;  %v6261_v43 = vld [vmem:[%s8115_s1 + $0x1f0] sm:$0xff]   ;;  %856 = vst.msk [vmem:[#allocation2 + $0x340] sm:$0xf] %vm616_vm0, %v5729_v39  ;;  %v461_v53 = vld [vmem:[%s6844_s7 + $0xc8] sm:$0xff]  ;;  %v5730_v56 = vpack.c.bf16 %v677_v1, %v677_v1 }
  0xa0   : > { %855 = vst.msk [vmem:[#allocation2 + $0x31c] sm:$0xf] %vm616_vm0, %v5728_v38  ;;  %1287 = vst.msk [vmem:[#allocation2 + $0x324] sm:$0xf] %vm616_vm0, %v5800_v41  ;;  %v6220_v46 = vld [vmem:[#allocation2 + $0x170] ss:$36 sps:$4 sm:$0xff]   ;;  %4338 = vmatpush2.bf16.msra.mxu0 %v6255_v30  ;;  %v5695_v55 = vpack.c.bf16 %v461_v53, %v461_v53 }
  0xa1   : > { %1073 = vst.msk [vmem:[#allocation2 + $0x368] sm:$0xf] %vm616_vm0, %v5800_v41  ;;  %1288 = vst.msk [vmem:[#allocation2 + $0x348] sm:$0xf] %vm616_vm0, %v5801_v42  ;;  %v6225_v49 = vld [vmem:[#allocation2 + $0x1bc] ss:$36 sps:$4 sm:$0xff]   ;;  %4339 = vmatprep.subr.bf16.mxu0 %v7013_v59  ;;  %4515 = vmatpush2.bf16.msra.mxu1 %v6261_v43 }
  0xa2   : > { %1074 = vst.msk [vmem:[#allocation2 + $0x38c] sm:$0xf] %vm616_vm0, %v5801_v42  ;;  %v2441_v51 = vld [vmem:[#allocation2 + $0x1b0] sm:$0xff]  ;;  %641 = vst.msk [vmem:[#allocation2 + $0x360] sm:$0xf] %vm616_vm0, %v5694_v48  ;;  %4038 = vmatmul.mubr.bf16.gmra.mxu0 %v5476_v44  ;;  %v1110_v60 = vld [vmem:[%s6844_s7 + $0xda] sm:$0xff]  ;;  %4516 = vmatprep.subr.bf16.mxu1 %v7013_v59 }
  0xa3   : > { %v2446_v52 = vld [vmem:[#allocation2 + $0x1d4] sm:$0xff]  ;;  %v678_v54 = vld [vmem:[%s6844_s7 + $0xc9] sm:$0xff]  ;;  %4215 = vmatmul.mubr.bf16.gmra.mxu1 %v6220_v46  ;;  %4045 = vmatprep.mubr.bf16.mxu0 %v6223_v47  ;;  %v5803_v62 = vpack.c.bf16 %v1110_v60, %v1110_v60  ;;  %642 = vst.msk [vmem:[#allocation2 + $0x384] sm:$0xf] %vm616_vm0, %v5695_v55  ;;  %857 = vst.msk [vmem:[#allocation2 + $0x364] sm:$0xf] %vm616_vm0, %v5730_v56 }
  0xa4   : > { %v5731_v57 = vpack.c.bf16 %v678_v54, %v678_v54  ;;  %v1109_v58 = vld [vmem:[%s6844_s7 + $0xd2] sm:$0xff]  ;;  %v6268_v63 = vld [vmem:[%s8115_s1 + $0x1e8] sm:$0xff]   ;;  %4222 = vmatprep.mubr.bf16.mxu1 %v6225_v49  ;;  %4340 = vmatpush2.bf16.msra.mxu0 %v6262_v50  ;;  %v6269_v0 = vld [vmem:[%s8115_s1 + $0x160] sm:$0xff]   ;;  %v5485_v5 = vcombine.low %v2441_v51, %v2446_v52 }
  0xa5   : > { %v5802_v61 = vpack.c.bf16 %v1109_v58, %v1109_v58  ;;  %v462_v2 = vld [vmem:[%s6844_s7 + $0xd0] sm:$0xff]  ;;  %v6227_v3 = vld [vmem:[#allocation2 + $0x1b8] ss:$36 sps:$4 sm:$0xff]   ;;  %1290 = vst.msk [vmem:[#allocation2 + $0x390] sm:$0xf] %vm616_vm0, %v5803_v62  ;;  %4341 = vmatprep.subr.bf16.mxu0 %v7013_v59  ;;  %4517 = vmatpush2.bf16.msra.mxu1 %v6268_v63  ;;  %v1111_v13 = vld [vmem:[%s6844_s7 + $0xe2] sm:$0xff] }
  0xa6   : > { %858 = vst.msk [vmem:[#allocation2 + $0x388] sm:$0xf] %vm616_vm0, %v5731_v57  ;;  %v5696_v4 = vpack.c.bf16 %v462_v2, %v462_v2  ;;  %1076 = vst.msk [vmem:[#allocation2 + $0x3d4] sm:$0xf] %vm616_vm0, %v5803_v62  ;;  %v6229_v6 = vld [vmem:[#allocation2 + $0x1fc] ss:$36 sps:$4 sm:$0xff]   ;;  %4518 = vmatprep.subr.bf16.mxu1 %v7013_v59  ;;  %v5804_v16 = vpack.c.bf16 %v1111_v13, %v1111_v13 }
  0xa7   : > { %1289 = vst.msk [vmem:[#allocation2 + $0x36c] sm:$0xf] %vm616_vm0, %v5802_v61  ;;  %1075 = vst.msk [vmem:[#allocation2 + $0x3b0] sm:$0xf] %vm616_vm0, %v5802_v61  ;;  %v6231_v7 = vld [vmem:[#allocation2 + $0x204] ss:$36 sps:$4 sm:$0xff]  }
  0xa8   : > { %v463_v8 = vld [vmem:[%s6844_s7 + $0xd8] sm:$0xff]  ;;  %643 = vst.msk [vmem:[#allocation2 + $0x3a8] sm:$0xf] %vm616_vm0, %v5696_v4  ;;  %4342 = vmatpush2.bf16.msra.mxu0 %v6269_v0  ;;  %v1112_v14 = vld [vmem:[%s6844_s7 + $0xea] sm:$0xff]  ;;  %v6275_v18 = vld [vmem:[%s8115_s1 + $0x1e0] sm:$0xff]  }
  0xa9   : > { %v679_v9 = vld [vmem:[%s6844_s7 + $0xd1] sm:$0xff]  ;;  %v5697_v10 = vpack.c.bf16 %v463_v8, %v463_v8  ;;  %v680_v11 = vld [vmem:[%s6844_s7 + $0xd9] sm:$0xff]  ;;  %v5805_v17 = vpack.c.bf16 %v1112_v14, %v1112_v14  ;;  %4343 = vmatprep.subr.bf16.mxu0 %v7013_v59  ;;  %1291 = vst.msk [vmem:[#allocation2 + $0x3b4] sm:$0xf] %vm616_vm0, %v5804_v16  ;;  %1077 = vst.msk [vmem:[#allocation2 + $0x3f8] sm:$0xf] %vm616_vm0, %v5804_v16  ;;  %4519 = vmatpush2.bf16.msra.mxu1 %v6275_v18 }
  0xaa   : > { %v5732_v12 = vpack.c.bf16 %v679_v9, %v679_v9  ;;  %v5733_v15 = vpack.c.bf16 %v680_v11, %v680_v11  ;;  %4046 = vmatmul.mubr.bf16.gmra.mxu0 %v5485_v5  ;;  %v6276_v19 = vld [vmem:[%s8115_s1 + $0x158] sm:$0xff]   ;;  %v6234_v22 = vld [vmem:[#allocation2 + $0x200] ss:$36 sps:$4 sm:$0xff]   ;;  %v465_v25 = vld [vmem:[%s6844_s7 + $0xe8] sm:$0xff]  ;;  %4520 = vmatprep.subr.bf16.mxu1 %v7013_v59 }
  0xab   : > { %644 = vst.msk [vmem:[#allocation2 + $0x3cc] sm:$0xf] %vm616_vm0, %v5697_v10  ;;  %4223 = vmatmul.mubr.bf16.gmra.mxu1 %v6227_v3  ;;  %v2451_v20 = vld [vmem:[#allocation2 + $0x1f8] sm:$0xff]  ;;  %4053 = vmatprep.mubr.bf16.mxu0 %v6229_v6  ;;  %1292 = vst.msk [vmem:[#allocation2 + $0x3d8] sm:$0xf] %vm616_vm0, %v5805_v17  ;;  %v464_v24 = vld [vmem:[%s6844_s7 + $0xe0] sm:$0xff]  ;;  %v5699_v29 = vpack.c.bf16 %v465_v25, %v465_v25 }
  0xac   : > { %859 = vst.msk [vmem:[#allocation2 + $0x3ac] sm:$0xf] %vm616_vm0, %v5732_v12  ;;  %v2456_v21 = vld [vmem:[#allocation2 + $0x21c] sm:$0xff]  ;;  %860 = vst.msk [vmem:[#allocation2 + $0x3d0] sm:$0xf] %vm616_vm0, %v5733_v15  ;;  %4230 = vmatprep.mubr.bf16.mxu1 %v6231_v7  ;;  %4344 = vmatpush2.bf16.msra.mxu0 %v6276_v19  ;;  %v5698_v28 = vpack.c.bf16 %v464_v24, %v464_v24  ;;  %v682_v31 = vld [vmem:[%s6844_s7 + $0xe9] sm:$0xff] }
  0xad   : > { %1078 = vst.msk [vmem:[#allocation2 + $0x41c] sm:$0xf] %vm616_vm0, %v5805_v17  ;;  %v6235_v23 = vld [vmem:[#allocation2 + $0x244] ss:$36 sps:$4 sm:$0xff]   ;;  %v5494_v26 = vcombine.low %v2451_v20, %v2456_v21  ;;  %v6237_v27 = vld [vmem:[#allocation2 + $0x24c] ss:$36 sps:$4 sm:$0xff]   ;;  %4345 = vmatprep.subr.bf16.mxu0 %v7013_v59  ;;  %v5735_v34 = vpack.c.bf16 %v682_v31, %v682_v31 }
  0xae   : > { %v681_v30 = vld [vmem:[%s6844_s7 + $0xe1] sm:$0xff]  ;;  %v1113_v32 = vld [vmem:[%s6844_s7 + $0xf2] sm:$0xff]  ;;  %645 = vst.msk [vmem:[#allocation2 + $0x3f0] sm:$0xf] %vm616_vm0, %v5698_v28  ;;  %646 = vst.msk [vmem:[#allocation2 + $0x414] sm:$0xf] %vm616_vm0, %v5699_v29 }
  0xaf   : > { %v5734_v33 = vpack.c.bf16 %v681_v30, %v681_v30  ;;  %v1114_v35 = vld [vmem:[%s6844_s7 + $0xfa] sm:$0xff]  ;;  %v5806_v36 = vpack.c.bf16 %v1113_v32, %v1113_v32  ;;  %862 = vst.msk [vmem:[#allocation2 + $0x418] sm:$0xf] %vm616_vm0, %v5735_v34  ;;  %v6283_v39 = vld [vmem:[%s8115_s1 + $0x150] sm:$0xff]   ;;  %v2466_v43 = vld [vmem:[#allocation2 + $0x264] sm:$0xff] }
  0xb0   : > { %v5807_v37 = vpack.c.bf16 %v1114_v35, %v1114_v35  ;;  %v6282_v38 = vld [vmem:[%s8115_s1 + $0x1d8] sm:$0xff]   ;;  %v466_v40 = vld [vmem:[%s6844_s7 + $0xf0] sm:$0xff]  ;;  %v2461_v42 = vld [vmem:[#allocation2 + $0x240] sm:$0xff]  ;;  %4346 = vmatpush2.bf16.msra.mxu0 %v6283_v39 }
  0xb1   : > { %861 = vst.msk [vmem:[#allocation2 + $0x3f4] sm:$0xf] %vm616_vm0, %v5734_v33  ;;  %1293 = vst.msk [vmem:[#allocation2 + $0x3fc] sm:$0xf] %vm616_vm0, %v5806_v36  ;;  %4521 = vmatpush2.bf16.msra.mxu1 %v6282_v38  ;;  %v5700_v41 = vpack.c.bf16 %v466_v40, %v466_v40  ;;  %v467_v44 = vld [vmem:[%s6844_s7 + $0xf8] sm:$0xff]  ;;  %v1115_v52 = vld [vmem:[%s6844_s7 + $0x102] sm:$0xff]  ;;  %4347 = vmatprep.subr.bf16.mxu0 %v7013_v59  ;;  %v5503_v1 = vcombine.low %v2461_v42, %v2466_v43 }
  0xb2   : > { %1079 = vst.msk [vmem:[#allocation2 + $0x440] sm:$0xf] %vm616_vm0, %v5806_v36  ;;  %4054 = vmatmul.mubr.bf16.gmra.mxu0 %v5494_v26  ;;  %1294 = vst.msk [vmem:[#allocation2 + $0x420] sm:$0xf] %vm616_vm0, %v5807_v37  ;;  %v683_v45 = vld [vmem:[%s6844_s7 + $0xf1] sm:$0xff]  ;;  %v684_v46 = vld [vmem:[%s6844_s7 + $0xf9] sm:$0xff]  ;;  %v5701_v49 = vpack.c.bf16 %v467_v44, %v467_v44  ;;  %4522 = vmatprep.subr.bf16.mxu1 %v7013_v59  ;;  %v5808_v54 = vpack.c.bf16 %v1115_v52, %v1115_v52 }
  0xb3   : > { %1080 = vst.msk [vmem:[#allocation2 + $0x464] sm:$0xf] %vm616_vm0, %v5807_v37  ;;  %4231 = vmatmul.mubr.bf16.gmra.mxu1 %v6234_v22  ;;  %4061 = vmatprep.mubr.bf16.mxu0 %v6235_v23  ;;  %647 = vst.msk [vmem:[#allocation2 + $0x438] sm:$0xf] %vm616_vm0, %v5700_v41  ;;  %v6240_v47 = vld [vmem:[#allocation2 + $0x248] ss:$36 sps:$4 sm:$0xff]   ;;  %v5736_v50 = vpack.c.bf16 %v683_v45, %v683_v45  ;;  %v5737_v51 = vpack.c.bf16 %v684_v46, %v684_v46 }
  0xb4   : > { %4238 = vmatprep.mubr.bf16.mxu1 %v6237_v27  ;;  %v6242_v48 = vld [vmem:[#allocation2 + $0x28c] ss:$36 sps:$4 sm:$0xff]   ;;  %v468_v57 = vld [vmem:[%s6844_s7 + $0x100] sm:$0xff]  ;;  %648 = vst.msk [vmem:[#allocation2 + $0x45c] sm:$0xf] %vm616_vm0, %v5701_v49  ;;  %v471_v12 = vld [vmem:[%s6844_s7 + $0x118] sm:$0xff] }
  0xb5   : > { %v1116_v53 = vld [vmem:[%s6844_s7 + $0x10a] sm:$0xff]  ;;  %863 = vst.msk [vmem:[#allocation2 + $0x43c] sm:$0xf] %vm616_vm0, %v5736_v50  ;;  %864 = vst.msk [vmem:[#allocation2 + $0x460] sm:$0xf] %vm616_vm0, %v5737_v51  ;;  %v5702_v60 = vpack.c.bf16 %v468_v57, %v468_v57  ;;  %v685_v61 = vld [vmem:[%s6844_s7 + $0x101] sm:$0xff]  ;;  %v5705_v15 = vpack.c.bf16 %v471_v12, %v471_v12 }
  0xb6   : > { %v5809_v55 = vpack.c.bf16 %v1116_v53, %v1116_v53  ;;  %v6289_v56 = vld [vmem:[%s8115_s1 + $0x1d0] sm:$0xff]   ;;  %v469_v58 = vld [vmem:[%s6844_s7 + $0x108] sm:$0xff]  ;;  %1295 = vst.msk [vmem:[#allocation2 + $0x444] sm:$0xf] %vm616_vm0, %v5808_v54  ;;  %v5738_v2 = vpack.c.bf16 %v685_v61, %v685_v61  ;;  %1081 = vst.msk [vmem:[#allocation2 + $0x488] sm:$0xf] %vm616_vm0, %v5808_v54 }
  0xb7   : > { %v686_v62 = vld [vmem:[%s6844_s7 + $0x109] sm:$0xff]  ;;  %v6244_v63 = vld [vmem:[#allocation2 + $0x294] ss:$36 sps:$4 sm:$0xff]   ;;  %4523 = vmatpush2.bf16.msra.mxu1 %v6289_v56  ;;  %v5703_v0 = vpack.c.bf16 %v469_v58, %v469_v58  ;;  %649 = vst.msk [vmem:[#allocation2 + $0x480] sm:$0xf] %vm616_vm0, %v5702_v60  ;;  %v6302_v30 = vld [vmem:[%s8115_s1 + $0x140] sm:$0xff]  }
  0xb8   : > { %1296 = vst.msk [vmem:[#allocation2 + $0x468] sm:$0xf] %vm616_vm0, %v5809_v55  ;;  %v5739_v3 = vpack.c.bf16 %v686_v62, %v686_v62  ;;  %1082 = vst.msk [vmem:[#allocation2 + $0x4ac] sm:$0xf] %vm616_vm0, %v5809_v55  ;;  %v2471_v4 = vld [vmem:[#allocation2 + $0x288] sm:$0xff]  ;;  %4524 = vmatprep.subr.bf16.mxu1 %v7013_v59  ;;  %v1117_v6 = vld [vmem:[%s6844_s7 + $0x112] sm:$0xff] }
  0xb9   : > { %v2476_v5 = vld [vmem:[#allocation2 + $0x2ac] sm:$0xff]  ;;  %650 = vst.msk [vmem:[#allocation2 + $0x4a4] sm:$0xf] %vm616_vm0, %v5703_v0  ;;  %865 = vst.msk [vmem:[#allocation2 + $0x484] sm:$0xf] %vm616_vm0, %v5738_v2  ;;  %v1118_v7 = vld [vmem:[%s6844_s7 + $0x11a] sm:$0xff]  ;;  %v5810_v8 = vpack.c.bf16 %v1117_v6, %v1117_v6 }
  0xba   : > { %4062 = vmatmul.mubr.bf16.gmra.mxu0 %v5503_v1  ;;  %866 = vst.msk [vmem:[#allocation2 + $0x4a8] sm:$0xf] %vm616_vm0, %v5739_v3  ;;  %v5811_v9 = vpack.c.bf16 %v1118_v7, %v1118_v7  ;;  %v6294_v10 = vld [vmem:[%s8115_s1 + $0x148] sm:$0xff]   ;;  %v470_v11 = vld [vmem:[%s6844_s7 + $0x110] sm:$0xff]  ;;  %v688_v16 = vld [vmem:[%s6844_s7 + $0x119] sm:$0xff]  ;;  %v5512_v20 = vcombine.low %v2471_v4, %v2476_v5 }
  0xbb   : > { %4239 = vmatmul.mubr.bf16.gmra.mxu1 %v6240_v47  ;;  %4069 = vmatprep.mubr.bf16.mxu0 %v6242_v48  ;;  %v687_v13 = vld [vmem:[%s6844_s7 + $0x111] sm:$0xff]  ;;  %1297 = vst.msk [vmem:[#allocation2 + $0x48c] sm:$0xf] %vm616_vm0, %v5810_v8  ;;  %v5704_v14 = vpack.c.bf16 %v470_v11, %v470_v11  ;;  %1083 = vst.msk [vmem:[#allocation2 + $0x4d0] sm:$0xf] %vm616_vm0, %v5810_v8  ;;  %v1119_v18 = vld [vmem:[%s6844_s7 + $0x122] sm:$0xff]  ;;  %v5741_v22 = vpack.c.bf16 %v688_v16, %v688_v16 }
  0xbc   : > { %4246 = vmatprep.mubr.bf16.mxu1 %v6244_v63  ;;  %1298 = vst.msk [vmem:[#allocation2 + $0x4b0] sm:$0xf] %vm616_vm0, %v5811_v9  ;;  %4348 = vmatpush2.bf16.msra.mxu0 %v6294_v10  ;;  %v5740_v17 = vpack.c.bf16 %v687_v13, %v687_v13  ;;  %1084 = vst.msk [vmem:[#allocation2 + $0x4f4] sm:$0xf] %vm616_vm0, %v5811_v9  ;;  %v1120_v19 = vld [vmem:[%s6844_s7 + $0x12a] sm:$0xff]  ;;  %v5812_v23 = vpack.c.bf16 %v1119_v18, %v1119_v18  ;;  %v2486_v28 = vld [vmem:[#allocation2 + $0x2f4] sm:$0xff] }
  0xbd   : > { %v6246_v21 = vld [vmem:[#allocation2 + $0x290] ss:$36 sps:$4 sm:$0xff]   ;;  %v5813_v24 = vpack.c.bf16 %v1120_v19, %v1120_v19  ;;  %4349 = vmatprep.subr.bf16.mxu0 %v7013_v59  ;;  %651 = vst.msk [vmem:[#allocation2 + $0x4c8] sm:$0xf] %vm616_vm0, %v5704_v14  ;;  %652 = vst.msk [vmem:[#allocation2 + $0x4ec] sm:$0xf] %vm616_vm0, %v5705_v15 }
  0xbe   : > { %v6249_v25 = vld [vmem:[#allocation2 + $0x2d4] ss:$36 sps:$4 sm:$0xff]   ;;  %867 = vst.msk [vmem:[#allocation2 + $0x4cc] sm:$0xf] %vm616_vm0, %v5740_v17  ;;  %v6251_v26 = vld [vmem:[#allocation2 + $0x2dc] ss:$36 sps:$4 sm:$0xff]  }
  0xbf   : > { %868 = vst.msk [vmem:[#allocation2 + $0x4f0] sm:$0xf] %vm616_vm0, %v5741_v22  ;;  %1299 = vst.msk [vmem:[#allocation2 + $0x4d4] sm:$0xf] %vm616_vm0, %v5812_v23  ;;  %v2481_v27 = vld [vmem:[#allocation2 + $0x2d0] sm:$0xff]  ;;  %v6300_v29 = vld [vmem:[%s8115_s1 + $0x1c8] sm:$0xff]  }
  0xc0   : > { %1300 = vst.msk [vmem:[#allocation2 + $0x4f8] sm:$0xf] %vm616_vm0, %v5813_v24  ;;  %4525 = vmatpush2.bf16.msra.mxu1 %v6300_v29  ;;  %4350 = vmatpush2.bf16.msra.mxu0 %v6302_v30  ;;  %v6303_v31 = vld [vmem:[%s8115_s1 + $0x1c0] sm:$0xff]   ;;  %v1301_v32 = vld [vmem:[%s6844_s7 + $0x13] sm:$0xff]  ;;  %v5521_v33 = vcombine.low %v2481_v27, %v2486_v28  ;;  %v1304_v54 = vld [vmem:[%s6844_s7 + $0x2b] sm:$0xff] }
  0xc1   : > { %4526 = vmatprep.subr.bf16.mxu1 %v7013_v59  ;;  %v1302_v34 = vld [vmem:[%s6844_s7 + $0x1b] sm:$0xff]  ;;  %v5814_v35 = vpack.c.bf16 %v1301_v32, %v1301_v32  ;;  %v6258_v41 = vld [vmem:[#allocation2 + $0x324] ss:$36 sps:$4 sm:$0xff]   ;;  %v1734_v45 = vld [vmem:[%s6844_s7 + $0x2c] sm:$0xff]  ;;  %v5817_v61 = vpack.c.bf16 %v1304_v54, %v1304_v54 }
  0xc2   : > { %4070 = vmatmul.mubr.bf16.gmra.mxu0 %v5512_v20  ;;  %v1517_v36 = vld [vmem:[%s6844_s7 + $0x14] sm:$0xff]  ;;  %v6256_v38 = vld [vmem:[#allocation2 + $0x31c] ss:$36 sps:$4 sm:$0xff]   ;;  %v5815_v39 = vpack.c.bf16 %v1302_v34, %v1302_v34  ;;  %v1733_v44 = vld [vmem:[%s6844_s7 + $0x24] sm:$0xff]  ;;  %v5887_v48 = vpack.c.bf16 %v1734_v45, %v1734_v45 }
  0xc3   : > { %4247 = vmatmul.mubr.bf16.gmra.mxu1 %v6246_v21  ;;  %4077 = vmatprep.mubr.bf16.mxu0 %v6249_v25  ;;  %v6253_v37 = vld [vmem:[#allocation2 + $0x2d8] ss:$36 sps:$4 sm:$0xff]   ;;  %v5850_v40 = vpack.c.bf16 %v1517_v36, %v1517_v36  ;;  %1481 = vst.msk [vmem:[#allocation2 + $0x10] sm:$0xf] %vm616_vm0, %v5814_v35  ;;  %v5886_v47 = vpack.c.bf16 %v1733_v44, %v1733_v44  ;;  %v1949_v49 = vld [vmem:[%s6844_s7 + $0x25] sm:$0xff]  ;;  %v1950_v50 = vld [vmem:[%s6844_s7 + $0x2d] sm:$0xff] }
  0xc4   : > { %4254 = vmatprep.mubr.bf16.mxu1 %v6251_v26  ;;  %4527 = vmatpush2.bf16.msra.mxu1 %v6303_v31  ;;  %v7304_v59 = vld [vmem:[#allocation2 + $0x318] sm:$0xff]  ;;  %1482 = vst.msk [vmem:[#allocation2 + $0x34] sm:$0xf] %vm616_vm0, %v5815_v39  ;;  %v5922_v51 = vpack.c.bf16 %v1949_v49, %v1949_v49  ;;  %v5923_v52 = vpack.c.bf16 %v1950_v50, %v1950_v50  ;;  %v1303_v1 = vld [vmem:[%s6844_s7 + $0x23] sm:$0xff]  ;;  %1914 = vst.msk [vmem:[#allocation2 + $0x3c] sm:$0xf] %vm616_vm0, %v5887_v48 }
  0xc5   : > { %v7306_v42 = vld [vmem:[#allocation2 + $0x33c] sm:$0xff]  ;;  %1697 = vst.msk [vmem:[#allocation2 + $0x14] sm:$0xf] %vm616_vm0, %v5850_v40  ;;  %1913 = vst.msk [vmem:[#allocation2 + $0x18] sm:$0xf] %vm616_vm0, %v5886_v47  ;;  %v5816_v55 = vpack.c.bf16 %v1303_v1, %v1303_v1  ;;  %v1735_v56 = vld [vmem:[%s6844_s7 + $0x34] sm:$0xff] }
  0xc6   : > { %v1518_v43 = vld [vmem:[%s6844_s7 + $0x1c] sm:$0xff]  ;;  %1699 = vst.msk [vmem:[#allocation2 + $0x5c] sm:$0xf] %vm616_vm0, %v5886_v47  ;;  %1700 = vst.msk [vmem:[#allocation2 + $0x80] sm:$0xf] %vm616_vm0, %v5887_v48  ;;  %v5888_v62 = vpack.c.bf16 %v1735_v56, %v1735_v56  ;;  %v1305_v3 = vld [vmem:[%s6844_s7 + $0x33] sm:$0xff]  ;;  %v5530_v4 = vcombine.low %v7304_v59, %v7306_v42 }
  0xc7   : > { %v5851_v46 = vpack.c.bf16 %v1518_v43, %v1518_v43  ;;  %v7318_v53 = vld [vmem:[%s8115_s1 + $0x238] sm:$0xff]   ;;  %v6260_v58 = vld [vmem:[#allocation2 + $0x320] ss:$36 sps:$4 sm:$0xff]   ;;  %2129 = vst.msk [vmem:[#allocation2 + $0x1c] sm:$0xf] %vm616_vm0, %v5922_v51  ;;  %v5818_v8 = vpack.c.bf16 %v1305_v3, %v1305_v3  ;;  %v1738_v10 = vld [vmem:[%s6844_s7 + $0x4c] sm:$0xff] }
  0xc8   : > { %v1736_v57 = vld [vmem:[%s6844_s7 + $0x3c] sm:$0xff]  ;;  %v6263_v60 = vld [vmem:[#allocation2 + $0x364] ss:$36 sps:$4 sm:$0xff]   ;;  %2130 = vst.msk [vmem:[#allocation2 + $0x40] sm:$0xf] %vm616_vm0, %v5923_v52  ;;  %6020 = vmatprep.subr.bf16.mxu0 %v7318_v53  ;;  %6072 = vmatprep.subr.bf16.mxu1 %v7318_v53  ;;  %v5891_v13 = vpack.c.bf16 %v1738_v10, %v1738_v10  ;;  %v1954_v15 = vld [vmem:[%s6844_s7 + $0x4d] sm:$0xff] }
  0xc9   : > { %1698 = vst.msk [vmem:[#allocation2 + $0x38] sm:$0xf] %vm616_vm0, %v5851_v46  ;;  %v5889_v63 = vpack.c.bf16 %v1736_v57, %v1736_v57  ;;  %v1951_v0 = vld [vmem:[%s6844_s7 + $0x35] sm:$0xff]  ;;  %v1952_v2 = vld [vmem:[%s6844_s7 + $0x3d] sm:$0xff]  ;;  %1483 = vst.msk [vmem:[#allocation2 + $0x58] sm:$0xf] %vm616_vm0, %v5816_v55  ;;  %v5927_v18 = vpack.c.bf16 %v1954_v15, %v1954_v15 }
  0xca   : > { %4078 = vmatmul.mubr.bf16.gmra.mxu0 %v5521_v33  ;;  %v5924_v5 = vpack.c.bf16 %v1951_v0, %v1951_v0  ;;  %v5925_v6 = vpack.c.bf16 %v1952_v2, %v1952_v2  ;;  %v1306_v7 = vld [vmem:[%s6844_s7 + $0x3b] sm:$0xff]  ;;  %v1737_v9 = vld [vmem:[%s6844_s7 + $0x44] sm:$0xff]  ;;  %1484 = vst.msk [vmem:[#allocation2 + $0x7c] sm:$0xf] %vm616_vm0, %v5817_v61  ;;  %1915 = vst.msk [vmem:[#allocation2 + $0x60] sm:$0xf] %vm616_vm0, %v5888_v62 }
  0xcb   : > { %4255 = vmatmul.mubr.bf16.gmra.mxu1 %v6253_v37  ;;  %4085 = vmatprep.mubr.bf16.mxu0 %v6256_v38  ;;  %1916 = vst.msk [vmem:[#allocation2 + $0x84] sm:$0xf] %vm616_vm0, %v5889_v63  ;;  %v5819_v11 = vpack.c.bf16 %v1306_v7, %v1306_v7  ;;  %1701 = vst.msk [vmem:[#allocation2 + $0xa4] sm:$0xf] %vm616_vm0, %v5888_v62  ;;  %v5890_v12 = vpack.c.bf16 %v1737_v9, %v1737_v9  ;;  %v1953_v14 = vld [vmem:[%s6844_s7 + $0x45] sm:$0xff]  ;;  %v1739_v21 = vld [vmem:[%s6844_s7 + $0x54] sm:$0xff] }
  0xcc   : > { %4262 = vmatprep.mubr.bf16.mxu1 %v6258_v41  ;;  %1702 = vst.msk [vmem:[#allocation2 + $0xc8] sm:$0xf] %vm616_vm0, %v5889_v63  ;;  %v6265_v16 = vld [vmem:[#allocation2 + $0x36c] ss:$36 sps:$4 sm:$0xff]   ;;  %2131 = vst.msk [vmem:[#allocation2 + $0x64] sm:$0xf] %vm616_vm0, %v5924_v5  ;;  %v5926_v17 = vpack.c.bf16 %v1953_v14, %v1953_v14  ;;  %v5892_v25 = vpack.c.bf16 %v1739_v21, %v1739_v21 }
  0xcd   : > { %2132 = vst.msk [vmem:[#allocation2 + $0x88] sm:$0xf] %vm616_vm0, %v5925_v6  ;;  %1485 = vst.msk [vmem:[#allocation2 + $0xa0] sm:$0xf] %vm616_vm0, %v5818_v8  ;;  %v1307_v19 = vld [vmem:[%s6844_s7 + $0x43] sm:$0xff]  ;;  %v1308_v20 = vld [vmem:[%s6844_s7 + $0x4b] sm:$0xff] }
  0xce   : > { %1486 = vst.msk [vmem:[#allocation2 + $0xc4] sm:$0xf] %vm616_vm0, %v5819_v11  ;;  %1917 = vst.msk [vmem:[#allocation2 + $0xa8] sm:$0xf] %vm616_vm0, %v5890_v12  ;;  %v5820_v22 = vpack.c.bf16 %v1307_v19, %v1307_v19  ;;  %v5821_v23 = vpack.c.bf16 %v1308_v20, %v1308_v20  ;;  %v1740_v24 = vld [vmem:[%s6844_s7 + $0x5c] sm:$0xff]  ;;  %v2506_v29 = vld [vmem:[#allocation2 + $0x384] sm:$0xff] }
  0xcf   : > { %1918 = vst.msk [vmem:[#allocation2 + $0xcc] sm:$0xf] %vm616_vm0, %v5891_v13  ;;  %1703 = vst.msk [vmem:[#allocation2 + $0xec] sm:$0xf] %vm616_vm0, %v5890_v12  ;;  %v1955_v26 = vld [vmem:[%s6844_s7 + $0x55] sm:$0xff]  ;;  %v1956_v27 = vld [vmem:[%s6844_s7 + $0x5d] sm:$0xff]  ;;  %v5893_v30 = vpack.c.bf16 %v1740_v24, %v1740_v24 }
  0xd0   : > { %1704 = vst.msk [vmem:[#allocation2 + $0x110] sm:$0xf] %vm616_vm0, %v5891_v13  ;;  %2133 = vst.msk [vmem:[#allocation2 + $0xac] sm:$0xf] %vm616_vm0, %v5926_v17  ;;  %v2501_v28 = vld [vmem:[#allocation2 + $0x360] sm:$0xff]  ;;  %v5928_v31 = vpack.c.bf16 %v1955_v26, %v1955_v26  ;;  %v5929_v32 = vpack.c.bf16 %v1956_v27, %v1956_v27  ;;  %v1309_v33 = vld [vmem:[%s6844_s7 + $0x53] sm:$0xff] }
  0xd1   : > { %2134 = vst.msk [vmem:[#allocation2 + $0xd0] sm:$0xf] %vm616_vm0, %v5927_v18  ;;  %1487 = vst.msk [vmem:[#allocation2 + $0xe8] sm:$0xf] %vm616_vm0, %v5820_v22  ;;  %v5539_v34 = vcombine.low %v2501_v28, %v2506_v29  ;;  %v6267_v35 = vld [vmem:[#allocation2 + $0x368] ss:$36 sps:$4 sm:$0xff]   ;;  %v5822_v37 = vpack.c.bf16 %v1309_v33, %v1309_v33 }
  0xd2   : > { %4086 = vmatmul.mubr.bf16.gmra.mxu0 %v5530_v4  ;;  %1488 = vst.msk [vmem:[#allocation2 + $0x10c] sm:$0xf] %vm616_vm0, %v5821_v23  ;;  %1919 = vst.msk [vmem:[#allocation2 + $0xf0] sm:$0xf] %vm616_vm0, %v5892_v25  ;;  %v1310_v36 = vld [vmem:[%s6844_s7 + $0x5b] sm:$0xff]  ;;  %v1741_v41 = vld [vmem:[%s6844_s7 + $0x64] sm:$0xff] }
  0xd3   : > { %4263 = vmatmul.mubr.bf16.gmra.mxu1 %v6260_v58  ;;  %4093 = vmatprep.mubr.bf16.mxu0 %v6263_v60  ;;  %1705 = vst.msk [vmem:[#allocation2 + $0x134] sm:$0xf] %vm616_vm0, %v5892_v25  ;;  %1920 = vst.msk [vmem:[#allocation2 + $0x114] sm:$0xf] %vm616_vm0, %v5893_v30  ;;  %v6270_v38 = vld [vmem:[#allocation2 + $0x3ac] ss:$36 sps:$4 sm:$0xff]   ;;  %v5823_v39 = vpack.c.bf16 %v1310_v36, %v1310_v36  ;;  %v5894_v43 = vpack.c.bf16 %v1741_v41, %v1741_v41 }
  0xd4   : > { %4270 = vmatprep.mubr.bf16.mxu1 %v6265_v16  ;;  %2135 = vst.msk [vmem:[#allocation2 + $0xf4] sm:$0xf] %vm616_vm0, %v5928_v31  ;;  %2136 = vst.msk [vmem:[#allocation2 + $0x118] sm:$0xf] %vm616_vm0, %v5929_v32  ;;  %v6272_v40 = vld [vmem:[#allocation2 + $0x3b4] ss:$36 sps:$4 sm:$0xff]  }
  0xd5   : > { %1706 = vst.msk [vmem:[#allocation2 + $0x158] sm:$0xf] %vm616_vm0, %v5893_v30  ;;  %1489 = vst.msk [vmem:[#allocation2 + $0x130] sm:$0xf] %vm616_vm0, %v5822_v37  ;;  %v2511_v59 = vld [vmem:[#allocation2 + $0x3a8] sm:$0xff]  ;;  %v7388_v57 = vld [vmem:[#allocation2 + $0x3f0] sm:$0xff] }
  0xd6   : > { %1490 = vst.msk [vmem:[#allocation2 + $0x154] sm:$0xf] %vm616_vm0, %v5823_v39  ;;  %v2516_v42 = vld [vmem:[#allocation2 + $0x3cc] sm:$0xff]  ;;  %1921 = vst.msk [vmem:[#allocation2 + $0x138] sm:$0xf] %vm616_vm0, %v5894_v43  ;;  %v1311_v1 = vld [vmem:[%s6844_s7 + $0x63] sm:$0xff] }
  0xd7   : > { %v1742_v44 = vld [vmem:[%s6844_s7 + $0x6c] sm:$0xff]  ;;  %1707 = vst.msk [vmem:[#allocation2 + $0x17c] sm:$0xf] %vm616_vm0, %v5894_v43  ;;  %v5548_v46 = vcombine.low %v2511_v59, %v2516_v42  ;;  %v6277_v51 = vld [vmem:[#allocation2 + $0x3f4] ss:$36 sps:$4 sm:$0xff]   ;;  %v5824_v56 = vpack.c.bf16 %v1311_v1, %v1311_v1  ;;  %v1744_v62 = vld [vmem:[%s6844_s7 + $0x7c] sm:$0xff] }
  0xd8   : > { %v1957_v45 = vld [vmem:[%s6844_s7 + $0x65] sm:$0xff]  ;;  %v5895_v47 = vpack.c.bf16 %v1742_v44, %v1742_v44  ;;  %v1958_v48 = vld [vmem:[%s6844_s7 + $0x6d] sm:$0xff]  ;;  %v6279_v54 = vld [vmem:[#allocation2 + $0x3fc] ss:$36 sps:$4 sm:$0xff]   ;;  %v5897_v2 = vpack.c.bf16 %v1744_v62, %v1744_v62 }
  0xd9   : > { %v5930_v49 = vpack.c.bf16 %v1957_v45, %v1957_v45  ;;  %v6274_v50 = vld [vmem:[#allocation2 + $0x3b0] ss:$36 sps:$4 sm:$0xff]   ;;  %v5931_v52 = vpack.c.bf16 %v1958_v48, %v1958_v48  ;;  %1491 = vst.msk [vmem:[#allocation2 + $0x178] sm:$0xf] %vm616_vm0, %v5824_v56  ;;  %v1960_v3 = vld [vmem:[%s6844_s7 + $0x7d] sm:$0xff]  ;;  %v1961_v12 = vld [vmem:[%s6844_s7 + $0x85] sm:$0xff] }
  0xda   : > { %4094 = vmatmul.mubr.bf16.gmra.mxu0 %v5539_v34  ;;  %1922 = vst.msk [vmem:[#allocation2 + $0x15c] sm:$0xf] %vm616_vm0, %v5895_v47  ;;  %v1312_v55 = vld [vmem:[%s6844_s7 + $0x6b] sm:$0xff]  ;;  %1708 = vst.msk [vmem:[#allocation2 + $0x1a0] sm:$0xf] %vm616_vm0, %v5895_v47  ;;  %v7390_v58 = vld [vmem:[#allocation2 + $0x414] sm:$0xff]  ;;  %v5933_v7 = vpack.c.bf16 %v1960_v3, %v1960_v3  ;;  %v5934_v16 = vpack.c.bf16 %v1961_v12, %v1961_v12 }
  0xdb   : > { %4271 = vmatmul.mubr.bf16.gmra.mxu1 %v6267_v35  ;;  %4101 = vmatprep.mubr.bf16.mxu0 %v6270_v38  ;;  %2137 = vst.msk [vmem:[#allocation2 + $0x13c] sm:$0xf] %vm616_vm0, %v5930_v49  ;;  %2138 = vst.msk [vmem:[#allocation2 + $0x160] sm:$0xf] %vm616_vm0, %v5931_v52  ;;  %v5825_v60 = vpack.c.bf16 %v1312_v55, %v1312_v55  ;;  %v1743_v61 = vld [vmem:[%s6844_s7 + $0x74] sm:$0xff]  ;;  %v1745_v10 = vld [vmem:[%s6844_s7 + $0x84] sm:$0xff]  ;;  %v5557_v22 = vcombine.low %v7388_v57, %v7390_v58 }
  0xdc   : > { %4278 = vmatprep.mubr.bf16.mxu1 %v6272_v40  ;;  %v1959_v63 = vld [vmem:[%s6844_s7 + $0x75] sm:$0xff]  ;;  %v5896_v0 = vpack.c.bf16 %v1743_v61, %v1743_v61  ;;  %v1746_v11 = vld [vmem:[%s6844_s7 + $0x8c] sm:$0xff]  ;;  %1924 = vst.msk [vmem:[#allocation2 + $0x1a4] sm:$0xf] %vm616_vm0, %v5897_v2  ;;  %1710 = vst.msk [vmem:[#allocation2 + $0x1e8] sm:$0xf] %vm616_vm0, %v5897_v2  ;;  %v5898_v13 = vpack.c.bf16 %v1745_v10, %v1745_v10 }
  0xdd   : > { %v5932_v4 = vpack.c.bf16 %v1959_v63, %v1959_v63  ;;  %v1313_v5 = vld [vmem:[%s6844_s7 + $0x73] sm:$0xff]  ;;  %v1314_v6 = vld [vmem:[%s6844_s7 + $0x7b] sm:$0xff]  ;;  %1492 = vst.msk [vmem:[#allocation2 + $0x19c] sm:$0xf] %vm616_vm0, %v5825_v60  ;;  %v5899_v14 = vpack.c.bf16 %v1746_v11, %v1746_v11  ;;  %2140 = vst.msk [vmem:[#allocation2 + $0x1a8] sm:$0xf] %vm616_vm0, %v5933_v7 }
  0xde   : > { %v5826_v8 = vpack.c.bf16 %v1313_v5, %v1313_v5  ;;  %v5827_v9 = vpack.c.bf16 %v1314_v6, %v1314_v6  ;;  %1923 = vst.msk [vmem:[#allocation2 + $0x180] sm:$0xf] %vm616_vm0, %v5896_v0  ;;  %1709 = vst.msk [vmem:[#allocation2 + $0x1c4] sm:$0xf] %vm616_vm0, %v5896_v0  ;;  %v1962_v15 = vld [vmem:[%s6844_s7 + $0x8d] sm:$0xff]  ;;  %v1315_v20 = vld [vmem:[%s6844_s7 + $0x83] sm:$0xff] }
  0xdf   : > { %2139 = vst.msk [vmem:[#allocation2 + $0x184] sm:$0xf] %vm616_vm0, %v5932_v4  ;;  %v6281_v17 = vld [vmem:[#allocation2 + $0x3f8] ss:$36 sps:$4 sm:$0xff]   ;;  %v5935_v19 = vpack.c.bf16 %v1962_v15, %v1962_v15  ;;  %v1316_v21 = vld [vmem:[%s6844_s7 + $0x8b] sm:$0xff]  ;;  %v5828_v23 = vpack.c.bf16 %v1315_v20, %v1315_v20  ;;  %v2541_v55 = vld [vmem:[#allocation2 + $0x480] sm:$0xff] }
  0xe0   : > { %v6284_v18 = vld [vmem:[#allocation2 + $0x43c] ss:$36 sps:$4 sm:$0xff]   ;;  %1493 = vst.msk [vmem:[#allocation2 + $0x1c0] sm:$0xf] %vm616_vm0, %v5826_v8  ;;  %1494 = vst.msk [vmem:[#allocation2 + $0x1e4] sm:$0xf] %vm616_vm0, %v5827_v9  ;;  %v5829_v24 = vpack.c.bf16 %v1316_v21, %v1316_v21 }
  0xe1   : > { %1925 = vst.msk [vmem:[#allocation2 + $0x1c8] sm:$0xf] %vm616_vm0, %v5898_v13  ;;  %1926 = vst.msk [vmem:[#allocation2 + $0x1ec] sm:$0xf] %vm616_vm0, %v5899_v14  ;;  %v1747_v25 = vld [vmem:[%s6844_s7 + $0x94] sm:$0xff]  ;;  %v1748_v26 = vld [vmem:[%s6844_s7 + $0x9c] sm:$0xff] }
  0xe2   : > { %4102 = vmatmul.mubr.bf16.gmra.mxu0 %v5548_v46  ;;  %2141 = vst.msk [vmem:[#allocation2 + $0x1cc] sm:$0xf] %vm616_vm0, %v5934_v16  ;;  %1711 = vst.msk [vmem:[#allocation2 + $0x20c] sm:$0xf] %vm616_vm0, %v5898_v13  ;;  %v1963_v27 = vld [vmem:[%s6844_s7 + $0x95] sm:$0xff]  ;;  %v5900_v28 = vpack.c.bf16 %v1747_v25, %v1747_v25  ;;  %v5901_v29 = vpack.c.bf16 %v1748_v26, %v1748_v26  ;;  %v1964_v30 = vld [vmem:[%s6844_s7 + $0x9d] sm:$0xff] }
  0xe3   : > { %4279 = vmatmul.mubr.bf16.gmra.mxu1 %v6274_v50  ;;  %4109 = vmatprep.mubr.bf16.mxu0 %v6277_v51  ;;  %1712 = vst.msk [vmem:[#allocation2 + $0x230] sm:$0xf] %vm616_vm0, %v5899_v14  ;;  %2142 = vst.msk [vmem:[#allocation2 + $0x1f0] sm:$0xf] %vm616_vm0, %v5935_v19  ;;  %v5936_v31 = vpack.c.bf16 %v1963_v27, %v1963_v27  ;;  %v1317_v32 = vld [vmem:[%s6844_s7 + $0x93] sm:$0xff]  ;;  %v5937_v34 = vpack.c.bf16 %v1964_v30, %v1964_v30  ;;  %v1318_v36 = vld [vmem:[%s6844_s7 + $0x9b] sm:$0xff] }
  0xe4   : > { %4286 = vmatprep.mubr.bf16.mxu1 %v6279_v54  ;;  %v6286_v33 = vld [vmem:[#allocation2 + $0x444] ss:$36 sps:$4 sm:$0xff]   ;;  %1495 = vst.msk [vmem:[#allocation2 + $0x208] sm:$0xf] %vm616_vm0, %v5828_v23  ;;  %1496 = vst.msk [vmem:[#allocation2 + $0x22c] sm:$0xf] %vm616_vm0, %v5829_v24  ;;  %v5830_v35 = vpack.c.bf16 %v1317_v32, %v1317_v32  ;;  %v5831_v40 = vpack.c.bf16 %v1318_v36, %v1318_v36 }
  0xe5   : > { %1927 = vst.msk [vmem:[#allocation2 + $0x210] sm:$0xf] %vm616_vm0, %v5900_v28  ;;  %1928 = vst.msk [vmem:[#allocation2 + $0x234] sm:$0xf] %vm616_vm0, %v5901_v29  ;;  %v1749_v37 = vld [vmem:[%s6844_s7 + $0xa4] sm:$0xff]  ;;  %v2531_v38 = vld [vmem:[#allocation2 + $0x438] sm:$0xff] }
  0xe6   : > { %2143 = vst.msk [vmem:[#allocation2 + $0x214] sm:$0xf] %vm616_vm0, %v5936_v31  ;;  %1713 = vst.msk [vmem:[#allocation2 + $0x254] sm:$0xf] %vm616_vm0, %v5900_v28  ;;  %v2536_v39 = vld [vmem:[#allocation2 + $0x45c] sm:$0xff]  ;;  %v1750_v41 = vld [vmem:[%s6844_s7 + $0xac] sm:$0xff]  ;;  %v5902_v59 = vpack.c.bf16 %v1749_v37, %v1749_v37 }
  0xe7   : > { %1714 = vst.msk [vmem:[#allocation2 + $0x278] sm:$0xf] %vm616_vm0, %v5901_v29  ;;  %2144 = vst.msk [vmem:[#allocation2 + $0x238] sm:$0xf] %vm616_vm0, %v5937_v34  ;;  %v5903_v42 = vpack.c.bf16 %v1750_v41, %v1750_v41  ;;  %v1965_v43 = vld [vmem:[%s6844_s7 + $0xa5] sm:$0xff]  ;;  %v1966_v44 = vld [vmem:[%s6844_s7 + $0xad] sm:$0xff]  ;;  %v5566_v47 = vcombine.low %v2531_v38, %v2536_v39 }
  0xe8   : > { %1497 = vst.msk [vmem:[#allocation2 + $0x250] sm:$0xf] %vm616_vm0, %v5830_v35  ;;  %1498 = vst.msk [vmem:[#allocation2 + $0x274] sm:$0xf] %vm616_vm0, %v5831_v40  ;;  %v5938_v45 = vpack.c.bf16 %v1965_v43, %v1965_v43  ;;  %v5939_v46 = vpack.c.bf16 %v1966_v44, %v1966_v44  ;;  %v6288_v48 = vld [vmem:[#allocation2 + $0x440] ss:$36 sps:$4 sm:$0xff]  }
  0xe9   : > { %1929 = vst.msk [vmem:[#allocation2 + $0x258] sm:$0xf] %vm616_vm0, %v5902_v59  ;;  %1715 = vst.msk [vmem:[#allocation2 + $0x29c] sm:$0xf] %vm616_vm0, %v5902_v59  ;;  %v6290_v49 = vld [vmem:[#allocation2 + $0x484] ss:$36 sps:$4 sm:$0xff]  }
  0xea   : > { %4110 = vmatmul.mubr.bf16.gmra.mxu0 %v5557_v22  ;;  %1930 = vst.msk [vmem:[#allocation2 + $0x27c] sm:$0xf] %vm616_vm0, %v5903_v42  ;;  %1716 = vst.msk [vmem:[#allocation2 + $0x2c0] sm:$0xf] %vm616_vm0, %v5903_v42  ;;  %v6292_v50 = vld [vmem:[#allocation2 + $0x48c] ss:$36 sps:$4 sm:$0xff]  }
  0xeb   : > { %4287 = vmatmul.mubr.bf16.gmra.mxu1 %v6281_v17  ;;  %4117 = vmatprep.mubr.bf16.mxu0 %v6284_v18  ;;  %2145 = vst.msk [vmem:[#allocation2 + $0x25c] sm:$0xf] %vm616_vm0, %v5938_v45  ;;  %2146 = vst.msk [vmem:[#allocation2 + $0x280] sm:$0xf] %vm616_vm0, %v5939_v46  ;;  %v1319_v51 = vld [vmem:[%s6844_s7 + $0xa3] sm:$0xff]  ;;  %v1320_v1 = vld [vmem:[%s6844_s7 + $0xab] sm:$0xff] }
  0xec   : > { %4294 = vmatprep.mubr.bf16.mxu1 %v6286_v33  ;;  %v5832_v52 = vpack.c.bf16 %v1319_v51, %v1319_v51  ;;  %v1751_v54 = vld [vmem:[%s6844_s7 + $0xb4] sm:$0xff]  ;;  %v2546_v56 = vld [vmem:[#allocation2 + $0x4a4] sm:$0xff]  ;;  %v5833_v57 = vpack.c.bf16 %v1320_v1, %v1320_v1  ;;  %v1752_v58 = vld [vmem:[%s6844_s7 + $0xbc] sm:$0xff] }
  0xed   : > { %v5904_v60 = vpack.c.bf16 %v1751_v54, %v1751_v54  ;;  %v5905_v61 = vpack.c.bf16 %v1752_v58, %v1752_v58  ;;  %v1967_v62 = vld [vmem:[%s6844_s7 + $0xb5] sm:$0xff]  ;;  %v1968_v63 = vld [vmem:[%s6844_s7 + $0xbd] sm:$0xff]  ;;  %v6295_v0 = vld [vmem:[#allocation2 + $0x488] ss:$36 sps:$4 sm:$0xff]   ;;  %v5575_v4 = vcombine.low %v2541_v55, %v2546_v56 }
  0xee   : > { %1499 = vst.msk [vmem:[#allocation2 + $0x298] sm:$0xf] %vm616_vm0, %v5832_v52  ;;  %1500 = vst.msk [vmem:[#allocation2 + $0x2bc] sm:$0xf] %vm616_vm0, %v5833_v57  ;;  %v5940_v2 = vpack.c.bf16 %v1967_v62, %v1967_v62  ;;  %v5941_v3 = vpack.c.bf16 %v1968_v63, %v1968_v63  ;;  %v6296_v5 = vld [vmem:[#allocation2 + $0x4cc] ss:$36 sps:$4 sm:$0xff]  }
  0xef   : > { %1931 = vst.msk [vmem:[#allocation2 + $0x2a0] sm:$0xf] %vm616_vm0, %v5904_v60  ;;  %1717 = vst.msk [vmem:[#allocation2 + $0x2e4] sm:$0xf] %vm616_vm0, %v5904_v60  ;;  %v6298_v6 = vld [vmem:[#allocation2 + $0x4d4] ss:$36 sps:$4 sm:$0xff]  }
  0xf0   : > { %1932 = vst.msk [vmem:[#allocation2 + $0x2c4] sm:$0xf] %vm616_vm0, %v5905_v61  ;;  %1718 = vst.msk [vmem:[#allocation2 + $0x308] sm:$0xf] %vm616_vm0, %v5905_v61  ;;  %v1321_v7 = vld [vmem:[%s6844_s7 + $0xb3] sm:$0xff]  ;;  %v1322_v8 = vld [vmem:[%s6844_s7 + $0xbb] sm:$0xff] }
  0xf1   : > { %2147 = vst.msk [vmem:[#allocation2 + $0x2a4] sm:$0xf] %vm616_vm0, %v5940_v2  ;;  %2148 = vst.msk [vmem:[#allocation2 + $0x2c8] sm:$0xf] %vm616_vm0, %v5941_v3  ;;  %v1753_v9 = vld [vmem:[%s6844_s7 + $0xc4] sm:$0xff]  ;;  %v5834_v10 = vpack.c.bf16 %v1321_v7, %v1321_v7  ;;  %v5835_v11 = vpack.c.bf16 %v1322_v8, %v1322_v8  ;;  %v1754_v12 = vld [vmem:[%s6844_s7 + $0xcc] sm:$0xff] }
  0xf2   : > { %4118 = vmatmul.mubr.bf16.gmra.mxu0 %v5566_v47  ;;  %v5906_v13 = vpack.c.bf16 %v1753_v9, %v1753_v9  ;;  %v1969_v14 = vld [vmem:[%s6844_s7 + $0xc5] sm:$0xff]  ;;  %v1970_v15 = vld [vmem:[%s6844_s7 + $0xcd] sm:$0xff]  ;;  %v5907_v17 = vpack.c.bf16 %v1754_v12, %v1754_v12  ;;  %v1756_v26 = vld [vmem:[%s6844_s7 + $0xdc] sm:$0xff] }
  0xf3   : > { %4295 = vmatmul.mubr.bf16.gmra.mxu1 %v6288_v48  ;;  %4125 = vmatprep.mubr.bf16.mxu0 %v6290_v49  ;;  %v2551_v16 = vld [vmem:[#allocation2 + $0x4c8] sm:$0xff]  ;;  %v5942_v18 = vpack.c.bf16 %v1969_v14, %v1969_v14  ;;  %v5943_v19 = vpack.c.bf16 %v1970_v15, %v1970_v15  ;;  %v1755_v22 = vld [vmem:[%s6844_s7 + $0xd4] sm:$0xff]  ;;  %1501 = vst.msk [vmem:[#allocation2 + $0x2e0] sm:$0xf] %vm616_vm0, %v5834_v10  ;;  %1502 = vst.msk [vmem:[#allocation2 + $0x304] sm:$0xf] %vm616_vm0, %v5835_v11 }
  0xf4   : > { %4302 = vmatprep.mubr.bf16.mxu1 %v6292_v50  ;;  %v1323_v20 = vld [vmem:[%s6844_s7 + $0xc3] sm:$0xff]  ;;  %v1324_v21 = vld [vmem:[%s6844_s7 + $0xcb] sm:$0xff]  ;;  %1933 = vst.msk [vmem:[#allocation2 + $0x2e8] sm:$0xf] %vm616_vm0, %v5906_v13  ;;  %1719 = vst.msk [vmem:[#allocation2 + $0x32c] sm:$0xf] %vm616_vm0, %v5906_v13  ;;  %v5908_v27 = vpack.c.bf16 %v1755_v22, %v1755_v22  ;;  %v5909_v29 = vpack.c.bf16 %v1756_v26, %v1756_v26 }
  0xf5   : > { %v2556_v23 = vld [vmem:[#allocation2 + $0x4ec] sm:$0xff]  ;;  %v5836_v24 = vpack.c.bf16 %v1323_v20, %v1323_v20  ;;  %v5837_v25 = vpack.c.bf16 %v1324_v21, %v1324_v21  ;;  %v1971_v28 = vld [vmem:[%s6844_s7 + $0xd5] sm:$0xff]  ;;  %1934 = vst.msk [vmem:[#allocation2 + $0x30c] sm:$0xf] %vm616_vm0, %v5907_v17  ;;  %2149 = vst.msk [vmem:[#allocation2 + $0x2ec] sm:$0xf] %vm616_vm0, %v5942_v18 }
  0xf6   : > { %2150 = vst.msk [vmem:[#allocation2 + $0x310] sm:$0xf] %vm616_vm0, %v5943_v19  ;;  %1720 = vst.msk [vmem:[#allocation2 + $0x350] sm:$0xf] %vm616_vm0, %v5907_v17  ;;  %v1972_v30 = vld [vmem:[%s6844_s7 + $0xdd] sm:$0xff]  ;;  %v5944_v31 = vpack.c.bf16 %v1971_v28, %v1971_v28  ;;  %v1325_v34 = vld [vmem:[%s6844_s7 + $0xd3] sm:$0xff]  ;;  %v5584_v37 = vcombine.low %v2551_v16, %v2556_v23 }
  0xf7   : > { %1503 = vst.msk [vmem:[#allocation2 + $0x328] sm:$0xf] %vm616_vm0, %v5836_v24  ;;  %1504 = vst.msk [vmem:[#allocation2 + $0x34c] sm:$0xf] %vm616_vm0, %v5837_v25  ;;  %v5945_v32 = vpack.c.bf16 %v1972_v30, %v1972_v30  ;;  %v6301_v33 = vld [vmem:[#allocation2 + $0x4d0] ss:$36 sps:$4 sm:$0xff]   ;;  %v5838_v39 = vpack.c.bf16 %v1325_v34, %v1325_v34 }
  0xf8   : > { %1935 = vst.msk [vmem:[#allocation2 + $0x330] sm:$0xf] %vm616_vm0, %v5908_v27  ;;  %1721 = vst.msk [vmem:[#allocation2 + $0x374] sm:$0xf] %vm616_vm0, %v5908_v27  ;;  %v1326_v35 = vld [vmem:[%s6844_s7 + $0xdb] sm:$0xff]  ;;  %v1757_v36 = vld [vmem:[%s6844_s7 + $0xe4] sm:$0xff] }
  0xf9   : > { %1936 = vst.msk [vmem:[#allocation2 + $0x354] sm:$0xf] %vm616_vm0, %v5909_v29  ;;  %2151 = vst.msk [vmem:[#allocation2 + $0x334] sm:$0xf] %vm616_vm0, %v5944_v31  ;;  %v6306_v38 = vld [vmem:[#allocation2 + $0x14] ss:$36 sps:$4 sm:$0xff]   ;;  %v5839_v40 = vpack.c.bf16 %v1326_v35, %v1326_v35  ;;  %v5910_v41 = vpack.c.bf16 %v1757_v36, %v1757_v36 }
  0xfa   : > { %4126 = vmatmul.mubr.bf16.gmra.mxu0 %v5575_v4  ;;  %1722 = vst.msk [vmem:[#allocation2 + $0x398] sm:$0xf] %vm616_vm0, %v5909_v29  ;;  %2152 = vst.msk [vmem:[#allocation2 + $0x358] sm:$0xf] %vm616_vm0, %v5945_v32  ;;  %v6309_v59 = vld [vmem:[#allocation2 + $0x1c] ss:$36 sps:$4 sm:$0xff]  }
  0xfb   : > { %4303 = vmatmul.mubr.bf16.gmra.mxu1 %v6295_v0  ;;  %4133 = vmatprep.mubr.bf16.mxu0 %v6296_v5  ;;  %v1758_v42 = vld [vmem:[%s6844_s7 + $0xec] sm:$0xff]  ;;  %1505 = vst.msk [vmem:[#allocation2 + $0x370] sm:$0xf] %vm616_vm0, %v5838_v39  ;;  %1506 = vst.msk [vmem:[#allocation2 + $0x394] sm:$0xf] %vm616_vm0, %v5839_v40  ;;  %v1327_v47 = vld [vmem:[%s6844_s7 + $0xe3] sm:$0xff] }
  0xfc   : > { %4310 = vmatprep.mubr.bf16.mxu1 %v6298_v6  ;;  %v1973_v43 = vld [vmem:[%s6844_s7 + $0xe5] sm:$0xff]  ;;  %v5911_v44 = vpack.c.bf16 %v1758_v42, %v1758_v42  ;;  %1937 = vst.msk [vmem:[#allocation2 + $0x378] sm:$0xf] %vm616_vm0, %v5910_v41  ;;  %v1974_v45 = vld [vmem:[%s6844_s7 + $0xed] sm:$0xff]  ;;  %1723 = vst.msk [vmem:[#allocation2 + $0x3bc] sm:$0xf] %vm616_vm0, %v5910_v41  ;;  %v5840_v50 = vpack.c.bf16 %v1327_v47, %v1327_v47 }
  0xfd   : > { %v5946_v46 = vpack.c.bf16 %v1973_v43, %v1973_v43  ;;  %v1328_v48 = vld [vmem:[%s6844_s7 + $0xeb] sm:$0xff]  ;;  %v5947_v49 = vpack.c.bf16 %v1974_v45, %v1974_v45  ;;  %v6307_v1 = vld [vmem:[#allocation2 + $0x18] ss:$36 sps:$4 sm:$0xff]   ;;  %v6315_v7 = vld [vmem:[#allocation2 + $0x60] ss:$36 sps:$4 sm:$0xff]  }
  0xfe   : > { %v5841_v51 = vpack.c.bf16 %v1328_v48, %v1328_v48  ;;  %1938 = vst.msk [vmem:[#allocation2 + $0x39c] sm:$0xf] %vm616_vm0, %v5911_v44  ;;  %1724 = vst.msk [vmem:[#allocation2 + $0x3e0] sm:$0xf] %vm616_vm0, %v5911_v44  ;;  %v6304_v52 = vld [vmem:[#allocation2 + $0x10] ss:$36 sps:$4 sm:$0xff]  }
  0xff   : > { %2153 = vst.msk [vmem:[#allocation2 + $0x37c] sm:$0xf] %vm616_vm0, %v5946_v46  ;;  %2154 = vst.msk [vmem:[#allocation2 + $0x3a0] sm:$0xf] %vm616_vm0, %v5947_v49  ;;  %v1759_v54 = vld [vmem:[%s6844_s7 + $0xf4] sm:$0xff]  ;;  %v1760_v55 = vld [vmem:[%s6844_s7 + $0xfc] sm:$0xff] }
 0x100   : > { %1507 = vst.msk [vmem:[#allocation2 + $0x3b8] sm:$0xf] %vm616_vm0, %v5840_v50  ;;  %1508 = vst.msk [vmem:[#allocation2 + $0x3dc] sm:$0xf] %vm616_vm0, %v5841_v51  ;;  %v6311_v56 = vld [vmem:[#allocation2 + $0x5c] ss:$36 sps:$4 sm:$0xff]   ;;  %v5912_v58 = vpack.c.bf16 %v1759_v54, %v1759_v54  ;;  %v5913_v60 = vpack.c.bf16 %v1760_v55, %v1760_v55 }
 0x101   : > { %v6321_v57 = vld [vmem:[%s8115_s1 + $0x230] sm:$0xff]   ;;  %v6313_v61 = vld [vmem:[#allocation2 + $0x64] ss:$36 sps:$4 sm:$0xff]   ;;  %v2393_v3 = vld [vmem:[#allocation2 + $0x58] sm:$0xff] }
 0x102   : > { %4134 = vmatmul.mubr.bf16.gmra.mxu0 %v5584_v37  ;;  %v1975_v62 = vld [vmem:[%s6844_s7 + $0xf5] sm:$0xff]  ;;  %v1976_v63 = vld [vmem:[%s6844_s7 + $0xfd] sm:$0xff]  ;;  %1939 = vst.msk [vmem:[#allocation2 + $0x3c0] sm:$0xf] %vm616_vm0, %v5912_v58  ;;  %1940 = vst.msk [vmem:[#allocation2 + $0x3e4] sm:$0xf] %vm616_vm0, %v5913_v60 }
 0x103   : > { %4311 = vmatmul.mubr.bf16.gmra.mxu1 %v6301_v33  ;;  %4351 = vmatprep.mubr.bf16.mxu0 %v6306_v38  ;;  %v5948_v0 = vpack.c.bf16 %v1975_v62, %v1975_v62  ;;  %v5949_v2 = vpack.c.bf16 %v1976_v63, %v1976_v63  ;;  %1725 = vst.msk [vmem:[#allocation2 + $0x404] sm:$0xf] %vm616_vm0, %v5912_v58  ;;  %1726 = vst.msk [vmem:[#allocation2 + $0x428] sm:$0xf] %vm616_vm0, %v5913_v60  ;;  %v2398_v4 = vld [vmem:[#allocation2 + $0x7c] sm:$0xff]  ;;  %v7526_v5 = vld [vmem:[%s8115_s1 + $0x228] sm:$0xff]  }
 0x104   : > { %4528 = vmatprep.mubr.bf16.mxu1 %v6309_v59  ;;  %v1329_v6 = vld [vmem:[%s6844_s7 + $0xf3] sm:$0xff]  ;;  %v6316_v8 = vld [vmem:[#allocation2 + $0xa4] ss:$36 sps:$4 sm:$0xff]   ;;  %v1330_v9 = vld [vmem:[%s6844_s7 + $0xfb] sm:$0xff]  ;;  %v5444_v13 = vcombine.low %v2393_v3, %v2398_v4 }
 0x105   : > { %2155 = vst.msk [vmem:[#allocation2 + $0x3c4] sm:$0xf] %vm616_vm0, %v5948_v0  ;;  %2156 = vst.msk [vmem:[#allocation2 + $0x3e8] sm:$0xf] %vm616_vm0, %v5949_v2  ;;  %v5842_v10 = vpack.c.bf16 %v1329_v6, %v1329_v6  ;;  %v1761_v11 = vld [vmem:[%s6844_s7 + $0x104] sm:$0xff]  ;;  %v1762_v12 = vld [vmem:[%s6844_s7 + $0x10c] sm:$0xff]  ;;  %v5843_v15 = vpack.c.bf16 %v1330_v9, %v1330_v9 }
 0x106   : > { %v6318_v14 = vld [vmem:[#allocation2 + $0xac] ss:$36 sps:$4 sm:$0xff]   ;;  %v5914_v16 = vpack.c.bf16 %v1761_v11, %v1761_v11  ;;  %v5915_v17 = vpack.c.bf16 %v1762_v12, %v1762_v12  ;;  %v1331_v20 = vld [vmem:[%s6844_s7 + $0x103] sm:$0xff]  ;;  %v1763_v24 = vld [vmem:[%s6844_s7 + $0x114] sm:$0xff] }
 0x107   : > { %v1977_v18 = vld [vmem:[%s6844_s7 + $0x105] sm:$0xff]  ;;  %v1978_v19 = vld [vmem:[%s6844_s7 + $0x10d] sm:$0xff]  ;;  %1509 = vst.msk [vmem:[#allocation2 + $0x400] sm:$0xf] %vm616_vm0, %v5842_v10  ;;  %v5844_v23 = vpack.c.bf16 %v1331_v20, %v1331_v20  ;;  %v1764_v25 = vld [vmem:[%s6844_s7 + $0x11c] sm:$0xff]  ;;  %v5916_v27 = vpack.c.bf16 %v1763_v24, %v1763_v24 }
 0x108   : > { %v5951_v21 = vpack.c.bf16 %v1978_v19, %v1978_v19  ;;  %v1332_v22 = vld [vmem:[%s6844_s7 + $0x10b] sm:$0xff]  ;;  %1510 = vst.msk [vmem:[#allocation2 + $0x424] sm:$0xf] %vm616_vm0, %v5843_v15  ;;  %1941 = vst.msk [vmem:[#allocation2 + $0x408] sm:$0xf] %vm616_vm0, %v5914_v16  ;;  %v5917_v28 = vpack.c.bf16 %v1764_v25, %v1764_v25  ;;  %v1979_v29 = vld [vmem:[%s6844_s7 + $0x115] sm:$0xff] }
 0x109   : > { %1942 = vst.msk [vmem:[#allocation2 + $0x42c] sm:$0xf] %vm616_vm0, %v5915_v17  ;;  %v5845_v26 = vpack.c.bf16 %v1332_v22, %v1332_v22  ;;  %1727 = vst.msk [vmem:[#allocation2 + $0x44c] sm:$0xf] %vm616_vm0, %v5914_v16  ;;  %v1980_v30 = vld [vmem:[%s6844_s7 + $0x11d] sm:$0xff]  ;;  %v5952_v33 = vpack.c.bf16 %v1979_v29, %v1979_v29  ;;  %v1333_v35 = vld [vmem:[%s6844_s7 + $0x113] sm:$0xff] }
 0x10a   : > { %4352 = vmatmul.mubr.bf16.vlgmr.msra.gmra.mxu0 %v6304_v52  ;;  %1728 = vst.msk [vmem:[#allocation2 + $0x470] sm:$0xf] %vm616_vm0, %v5915_v17  ;;  %v7548_v31 = vld [vmem:[#allocation2 + $0xa0] sm:$0xff]  ;;  %2158 = vst.msk [vmem:[#allocation2 + $0x430] sm:$0xf] %vm616_vm0, %v5951_v21  ;;  %v5953_v34 = vpack.c.bf16 %v1980_v30, %v1980_v30  ;;  %v5846_v37 = vpack.c.bf16 %v1333_v35, %v1333_v35  ;;  %v6359_v38 = vld [vmem:[%s8115_s1 + $0x218] sm:$0xff]  }
 0x10b   : > { %4529 = vmatmul.mubr.bf16.vlgmr.msra.gmra.mxu1 %v6307_v1  ;;  %6021 = vmatpush3.bf16.msra.mxu0 %v7318_v53  ;;  %v6343_v32 = vld [vmem:[%s8115_s1 + $0x220] sm:$0xff]   ;;  %1511 = vst.msk [vmem:[#allocation2 + $0x448] sm:$0xf] %vm616_vm0, %v5844_v23  ;;  %1512 = vst.msk [vmem:[#allocation2 + $0x46c] sm:$0xf] %vm616_vm0, %v5845_v26  ;;  %v1766_v59 = vld [vmem:[%s6844_s7 + $0x12c] sm:$0xff] }
 0x10c   : > { %4359 = vmatprep.mubr.bf16.mxu0 %v6311_v56  ;;  %4536 = vmatprep.mubr.bf16.mxu1 %v6313_v61  ;;  %v2408_v36 = vld [vmem:[#allocation2 + $0xc4] sm:$0xff]  ;;  %1943 = vst.msk [vmem:[#allocation2 + $0x450] sm:$0xf] %vm616_vm0, %v5916_v27  ;;  %1944 = vst.msk [vmem:[#allocation2 + $0x474] sm:$0xf] %vm616_vm0, %v5917_v28  ;;  %v1334_v39 = vld [vmem:[%s6844_s7 + $0x11b] sm:$0xff]  ;;  %v5919_v45 = vpack.c.bf16 %v1766_v59, %v1766_v59 }
 0x10d   : > { %6080 = vmatpush3.bf16.msra.mxu1 %v7318_v53  ;;  %6022 = vmatprep.subr.bf16.mxu0 %v6321_v57  ;;  %v5950_v53 = vpack.c.bf16 %v1977_v18, %v1977_v18  ;;  %1729 = vst.msk [vmem:[#allocation2 + $0x494] sm:$0xf] %vm616_vm0, %v5916_v27  ;;  %1730 = vst.msk [vmem:[#allocation2 + $0x4b8] sm:$0xf] %vm616_vm0, %v5917_v28  ;;  %v1765_v40 = vld [vmem:[%s6844_s7 + $0x124] sm:$0xff]  ;;  %v5847_v41 = vpack.c.bf16 %v1334_v39, %v1334_v39  ;;  %v1982_v44 = vld [vmem:[%s6844_s7 + $0x12d] sm:$0xff] }
 0x10e   : > { %6073 = vmatprep.subr.bf16.mxu1 %v6321_v57  ;;  %2159 = vst.msk [vmem:[#allocation2 + $0x454] sm:$0xf] %vm616_vm0, %v5952_v33  ;;  %2160 = vst.msk [vmem:[#allocation2 + $0x478] sm:$0xf] %vm616_vm0, %v5953_v34  ;;  %v5918_v42 = vpack.c.bf16 %v1765_v40, %v1765_v40  ;;  %v1981_v43 = vld [vmem:[%s6844_s7 + $0x125] sm:$0xff]  ;;  %v5955_v47 = vpack.c.bf16 %v1982_v44, %v1982_v44  ;;  %v1767_v50 = vld [vmem:[%s6844_s7 + $0x134] sm:$0xff]  ;;  %v5453_v51 = vcombine.low %v7548_v31, %v2408_v36 }
 0x10f   : > { %6023 = vmatpush3.bf16.msra.mxu0 %v6321_v57  ;;  %2157 = vst.msk [vmem:[#allocation2 + $0x40c] sm:$0xf] %vm616_vm0, %v5950_v53  ;;  %1513 = vst.msk [vmem:[#allocation2 + $0x490] sm:$0xf] %vm616_vm0, %v5846_v37  ;;  %v5954_v46 = vpack.c.bf16 %v1981_v43, %v1981_v43  ;;  %v1335_v48 = vld [vmem:[%s6844_s7 + $0x123] sm:$0xff]  ;;  %v1336_v49 = vld [vmem:[%s6844_s7 + $0x12b] sm:$0xff]  ;;  %v5920_v55 = vpack.c.bf16 %v1767_v50, %v1767_v50 }
 0x110   : > { %6024 = vmatprep.subr.bf16.mxu0 %v7526_v5  ;;  %1514 = vst.msk [vmem:[#allocation2 + $0x4b4] sm:$0xf] %vm616_vm0, %v5847_v41  ;;  %1945 = vst.msk [vmem:[#allocation2 + $0x498] sm:$0xf] %vm616_vm0, %v5918_v42  ;;  %v5848_v52 = vpack.c.bf16 %v1335_v48, %v1335_v48  ;;  %v5849_v1 = vpack.c.bf16 %v1336_v49, %v1336_v49  ;;  %v1768_v54 = vld [vmem:[%s6844_s7 + $0x13c] sm:$0xff]  ;;  %v6372_v63 = vld [vmem:[%s8115_s1 + $0x210] sm:$0xff]  }
 0x111   : > { %6081 = vmatpush3.bf16.msra.mxu1 %v6321_v57  ;;  %1731 = vst.msk [vmem:[#allocation2 + $0x4dc] sm:$0xf] %vm616_vm0, %v5918_v42  ;;  %v1983_v56 = vld [vmem:[%s6844_s7 + $0x135] sm:$0xff]  ;;  %v6320_v57 = vld [vmem:[#allocation2 + $0xa8] ss:$36 sps:$4 sm:$0xff]   ;;  %v5921_v60 = vpack.c.bf16 %v1768_v54, %v1768_v54  ;;  %v1984_v3 = vld [vmem:[%s6844_s7 + $0x13d] sm:$0xff] }
 0x112   : > { %4360 = vmatmul.mubr.bf16.gmra.mxu0 %v5444_v13  ;;  %6074 = vmatprep.subr.bf16.mxu1 %v7526_v5  ;;  %v6322_v58 = vld [vmem:[#allocation2 + $0xec] ss:$36 sps:$4 sm:$0xff]   ;;  %1946 = vst.msk [vmem:[#allocation2 + $0x4bc] sm:$0xf] %vm616_vm0, %v5919_v45  ;;  %2161 = vst.msk [vmem:[#allocation2 + $0x49c] sm:$0xf] %vm616_vm0, %v5954_v46  ;;  %v5956_v61 = vpack.c.bf16 %v1983_v56, %v1983_v56  ;;  %v5957_v6 = vpack.c.bf16 %v1984_v3, %v1984_v3 }
 0x113   : > { %4537 = vmatmul.mubr.bf16.gmra.mxu1 %v6315_v7  ;;  %4367 = vmatprep.mubr.bf16.mxu0 %v6316_v8  ;;  %2162 = vst.msk [vmem:[#allocation2 + $0x4c0] sm:$0xf] %vm616_vm0, %v5955_v47  ;;  %1732 = vst.msk [vmem:[#allocation2 + $0x500] sm:$0xf] %vm616_vm0, %v5919_v45  ;;  %v6324_v62 = vld [vmem:[#allocation2 + $0xf4] ss:$36 sps:$4 sm:$0xff]  }
 0x114   : > { %4544 = vmatprep.mubr.bf16.mxu1 %v6318_v14  ;;  %6025 = vmatpush3.bf16.msra.mxu0 %v7526_v5  ;;  %1515 = vst.msk [vmem:[#allocation2 + $0x4d8] sm:$0xf] %vm616_vm0, %v5848_v52  ;;  %1516 = vst.msk [vmem:[#allocation2 + $0x4fc] sm:$0xf] %vm616_vm0, %v5849_v1  ;;  %v2413_v0 = vld [vmem:[#allocation2 + $0xe8] sm:$0xff]  ;;  %v7607_v12 = vld [vmem:[%s8115_s1 + $0x200] sm:$0xff]  }
 0x115   : > { %6082 = vmatpush3.bf16.msra.mxu1 %v7526_v5  ;;  %6026 = vmatprep.subr.bf16.mxu0 %v6343_v32  ;;  %1947 = vst.msk [vmem:[#allocation2 + $0x4e0] sm:$0xf] %vm616_vm0, %v5920_v55  ;;  %1948 = vst.msk [vmem:[#allocation2 + $0x504] sm:$0xf] %vm616_vm0, %v5921_v60  ;;  %v2418_v2 = vld [vmem:[#allocation2 + $0x10c] sm:$0xff]  ;;  %v7611_v14 = vld [vmem:[#allocation2 + $0x154] sm:$0xff] }
 0x116   : > { %6075 = vmatprep.subr.bf16.mxu1 %v6343_v32  ;;  %2163 = vst.msk [vmem:[#allocation2 + $0x4e4] sm:$0xf] %vm616_vm0, %v5956_v61  ;;  %v2165_v4 = vld [vmem:[%s6844_s7 + $0x26] sm:$0xff]  ;;  %v5462_v8 = vcombine.low %v2413_v0, %v2418_v2  ;;  %v6326_v9 = vld [vmem:[#allocation2 + $0xf0] ss:$36 sps:$4 sm:$0xff]   ;;  %v2168_v21 = vld [vmem:[%s6844_s7 + $0x3e] sm:$0xff] }
 0x117   : > { %v6385_v5 = vld [vmem:[%s8115_s1 + $0x208] sm:$0xff]   ;;  %v5958_v7 = vpack.c.bf16 %v2165_v4, %v2165_v4  ;;  %v6327_v10 = vld [vmem:[#allocation2 + $0x134] ss:$36 sps:$4 sm:$0xff]   ;;  %2164 = vst.msk [vmem:[#allocation2 + $0x508] sm:$0xf] %vm616_vm0, %v5957_v6  ;;  %v5961_v24 = vpack.c.bf16 %v2168_v21, %v2168_v21  ;;  %v2188_v25 = vld [vmem:[%s6844_s7 + $0xde] sm:$0xff] }
 0x118   : > { %6027 = vmatpush3.bf16.msra.mxu0 %v6343_v32  ;;  %v6329_v11 = vld [vmem:[#allocation2 + $0x13c] ss:$36 sps:$4 sm:$0xff]   ;;  %v7609_v13 = vld [vmem:[#allocation2 + $0x130] sm:$0xff]  ;;  %v2185_v16 = vld [vmem:[%s6844_s7 + $0xc6] sm:$0xff]  ;;  %v5981_v29 = vpack.c.bf16 %v2188_v25, %v2188_v25 }
 0x119   : > { %6083 = vmatpush3.bf16.msra.mxu1 %v6343_v32  ;;  %6028 = vmatprep.subr.bf16.mxu0 %v6359_v38  ;;  %2345 = vst.msk [vmem:[#allocation2 + $0x20] sm:$0xf] %vm616_vm0, %v5958_v7  ;;  %v2166_v15 = vld [vmem:[%s6844_s7 + $0x2e] sm:$0xff]  ;;  %v5978_v19 = vpack.c.bf16 %v2185_v16, %v2185_v16  ;;  %v2167_v53 = vld [vmem:[%s6844_s7 + $0x36] sm:$0xff]  ;;  %v2169_v27 = vld [vmem:[%s6844_s7 + $0x46] sm:$0xff]  ;;  %v5471_v59 = vcombine.low %v7609_v13, %v7611_v14 }
 0x11a   : > { %4368 = vmatmul.mubr.bf16.gmra.mxu0 %v5453_v51  ;;  %6076 = vmatprep.subr.bf16.mxu1 %v6359_v38  ;;  %v2186_v17 = vld [vmem:[%s6844_s7 + $0xce] sm:$0xff]  ;;  %v5959_v18 = vpack.c.bf16 %v2166_v15, %v2166_v15  ;;  %v2187_v22 = vld [vmem:[%s6844_s7 + $0xd6] sm:$0xff]  ;;  %v5960_v23 = vpack.c.bf16 %v2167_v53, %v2167_v53  ;;  %v5962_v30 = vpack.c.bf16 %v2169_v27, %v2169_v27  ;;  %v2189_v32 = vld [vmem:[%s6844_s7 + $0xe6] sm:$0xff] }
 0x11b   : > { %4545 = vmatmul.mubr.bf16.gmra.mxu1 %v6320_v57  ;;  %4375 = vmatprep.mubr.bf16.mxu0 %v6322_v58  ;;  %v5979_v20 = vpack.c.bf16 %v2186_v17, %v2186_v17  ;;  %v5980_v26 = vpack.c.bf16 %v2187_v22, %v2187_v22  ;;  %v2170_v28 = vld [vmem:[%s6844_s7 + $0x4e] sm:$0xff]  ;;  %2365 = vst.msk [vmem:[#allocation2 + $0x2f0] sm:$0xf] %vm616_vm0, %v5978_v19  ;;  %v2171_v34 = vld [vmem:[%s6844_s7 + $0x56] sm:$0xff]  ;;  %2348 = vst.msk [vmem:[#allocation2 + $0x8c] sm:$0xf] %vm616_vm0, %v5961_v24 }
 0x11c   : > { %4552 = vmatprep.mubr.bf16.mxu1 %v6324_v62  ;;  %6029 = vmatpush3.bf16.msra.mxu0 %v6359_v38  ;;  %2346 = vst.msk [vmem:[#allocation2 + $0x44] sm:$0xf] %vm616_vm0, %v5959_v18  ;;  %v5963_v31 = vpack.c.bf16 %v2170_v28, %v2170_v28  ;;  %v2190_v33 = vld [vmem:[%s6844_s7 + $0xee] sm:$0xff]  ;;  %v6331_v35 = vld [vmem:[#allocation2 + $0x138] ss:$36 sps:$4 sm:$0xff]   ;;  %v5982_v36 = vpack.c.bf16 %v2189_v32, %v2189_v32  ;;  %v2173_v47 = vld [vmem:[%s6844_s7 + $0x66] sm:$0xff] }
 0x11d   : > { %6084 = vmatpush3.bf16.msra.mxu1 %v6359_v38  ;;  %6030 = vmatprep.subr.bf16.mxu0 %v6372_v63  ;;  %2366 = vst.msk [vmem:[#allocation2 + $0x314] sm:$0xf] %vm616_vm0, %v5979_v20  ;;  %2347 = vst.msk [vmem:[#allocation2 + $0x68] sm:$0xf] %vm616_vm0, %v5960_v23  ;;  %v5983_v37 = vpack.c.bf16 %v2190_v33, %v2190_v33  ;;  %v2172_v38 = vld [vmem:[%s6844_s7 + $0x5e] sm:$0xff]  ;;  %v5964_v39 = vpack.c.bf16 %v2171_v34, %v2171_v34  ;;  %v2191_v40 = vld [vmem:[%s6844_s7 + $0xf6] sm:$0xff] }
 0x11e   : > { %6077 = vmatprep.subr.bf16.mxu1 %v6372_v63  ;;  %2367 = vst.msk [vmem:[#allocation2 + $0x338] sm:$0xf] %vm616_vm0, %v5980_v26  ;;  %v2192_v41 = vld [vmem:[%s6844_s7 + $0xfe] sm:$0xff]  ;;  %2368 = vst.msk [vmem:[#allocation2 + $0x35c] sm:$0xf] %vm616_vm0, %v5981_v29  ;;  %v5965_v44 = vpack.c.bf16 %v2172_v38, %v2172_v38  ;;  %v5984_v45 = vpack.c.bf16 %v2191_v40, %v2191_v40  ;;  %v2174_v48 = vld [vmem:[%s6844_s7 + $0x6e] sm:$0xff]  ;;  %v5966_v49 = vpack.c.bf16 %v2173_v47, %v2173_v47 }
 0x11f   : > { %v6333_v42 = vld [vmem:[#allocation2 + $0x17c] ss:$36 sps:$4 sm:$0xff]   ;;  %v6335_v43 = vld [vmem:[#allocation2 + $0x184] ss:$36 sps:$4 sm:$0xff]   ;;  %2349 = vst.msk [vmem:[#allocation2 + $0xb0] sm:$0xf] %vm616_vm0, %v5962_v30  ;;  %v5985_v46 = vpack.c.bf16 %v2192_v41, %v2192_v41  ;;  %v5967_v50 = vpack.c.bf16 %v2174_v48, %v2174_v48 }
 0x120   : > { %6031 = vmatpush3.bf16.msra.mxu0 %v6372_v63  ;;  %2350 = vst.msk [vmem:[#allocation2 + $0xd4] sm:$0xf] %vm616_vm0, %v5963_v31  ;;  %2369 = vst.msk [vmem:[#allocation2 + $0x380] sm:$0xf] %vm616_vm0, %v5982_v36  ;;  %v2193_v51 = vld [vmem:[%s6844_s7 + $0x106] sm:$0xff]  ;;  %v2194_v52 = vld [vmem:[%s6844_s7 + $0x10e] sm:$0xff] }
 0x121   : > { %6085 = vmatpush3.bf16.msra.mxu1 %v6372_v63  ;;  %6032 = vmatprep.subr.bf16.mxu0 %v6385_v5  ;;  %2370 = vst.msk [vmem:[#allocation2 + $0x3a4] sm:$0xf] %vm616_vm0, %v5983_v37  ;;  %2351 = vst.msk [vmem:[#allocation2 + $0xf8] sm:$0xf] %vm616_vm0, %v5964_v39  ;;  %v2175_v1 = vld [vmem:[%s6844_s7 + $0x76] sm:$0xff]  ;;  %v5986_v55 = vpack.c.bf16 %v2193_v51, %v2193_v51  ;;  %v5987_v56 = vpack.c.bf16 %v2194_v52, %v2194_v52  ;;  %v2176_v57 = vld [vmem:[%s6844_s7 + $0x7e] sm:$0xff] }
 0x122   : > { %4376 = vmatmul.mubr.bf16.gmra.mxu0 %v5462_v8  ;;  %6078 = vmatprep.subr.bf16.mxu1 %v6385_v5  ;;  %2352 = vst.msk [vmem:[#allocation2 + $0x11c] sm:$0xf] %vm616_vm0, %v5965_v44  ;;  %2371 = vst.msk [vmem:[#allocation2 + $0x3c8] sm:$0xf] %vm616_vm0, %v5984_v45  ;;  %v2433_v54 = vld [vmem:[#allocation2 + $0x178] sm:$0xff]  ;;  %v5968_v58 = vpack.c.bf16 %v2175_v1, %v2175_v1  ;;  %v5969_v62 = vpack.c.bf16 %v2176_v57, %v2176_v57  ;;  %v2177_v2 = vld [vmem:[%s6844_s7 + $0x86] sm:$0xff] }
 0x123   : > { %4553 = vmatmul.mubr.bf16.gmra.mxu1 %v6326_v9  ;;  %4383 = vmatprep.mubr.bf16.mxu0 %v6327_v10  ;;  %2372 = vst.msk [vmem:[#allocation2 + $0x3ec] sm:$0xf] %vm616_vm0, %v5985_v46  ;;  %v2195_v60 = vld [vmem:[%s6844_s7 + $0x116] sm:$0xff]  ;;  %v2196_v61 = vld [vmem:[%s6844_s7 + $0x11e] sm:$0xff]  ;;  %2353 = vst.msk [vmem:[#allocation2 + $0x140] sm:$0xf] %vm616_vm0, %v5966_v49  ;;  %v5970_v6 = vpack.c.bf16 %v2177_v2, %v2177_v2 }
 0x124   : > { %4560 = vmatprep.mubr.bf16.mxu1 %v6329_v11  ;;  %6033 = vmatpush3.bf16.msra.mxu0 %v6385_v5  ;;  %2354 = vst.msk [vmem:[#allocation2 + $0x164] sm:$0xf] %vm616_vm0, %v5967_v50  ;;  %v5988_v63 = vpack.c.bf16 %v2195_v60, %v2195_v60  ;;  %v5989_v0 = vpack.c.bf16 %v2196_v61, %v2196_v61  ;;  %v2178_v3 = vld [vmem:[%s6844_s7 + $0x8e] sm:$0xff]  ;;  %v2197_v4 = vld [vmem:[%s6844_s7 + $0x126] sm:$0xff]  ;;  %2373 = vst.msk [vmem:[#allocation2 + $0x410] sm:$0xf] %vm616_vm0, %v5986_v55 }
 0x125   : > { %6086 = vmatpush3.bf16.msra.mxu1 %v6385_v5  ;;  %6034 = vmatprep.subr.bf16.mxu0 %v7607_v12  ;;  %v2438_v5 = vld [vmem:[#allocation2 + $0x19c] sm:$0xff]  ;;  %2374 = vst.msk [vmem:[#allocation2 + $0x434] sm:$0xf] %vm616_vm0, %v5987_v56  ;;  %2355 = vst.msk [vmem:[#allocation2 + $0x188] sm:$0xf] %vm616_vm0, %v5968_v58  ;;  %v5971_v7 = vpack.c.bf16 %v2178_v3, %v2178_v3  ;;  %v5990_v8 = vpack.c.bf16 %v2197_v4, %v2197_v4  ;;  %v2448_v14 = vld [vmem:[#allocation2 + $0x1e4] sm:$0xff] }
 0x126   : > { %6079 = vmatprep.subr.bf16.mxu1 %v7607_v12  ;;  %2356 = vst.msk [vmem:[#allocation2 + $0x1ac] sm:$0xf] %vm616_vm0, %v5969_v62  ;;  %2375 = vst.msk [vmem:[#allocation2 + $0x458] sm:$0xf] %vm616_vm0, %v5988_v63  ;;  %v5480_v9 = vcombine.low %v2433_v54, %v2438_v5  ;;  %v6337_v10 = vld [vmem:[#allocation2 + $0x180] ss:$36 sps:$4 sm:$0xff]  }
 0x127   : > { %2376 = vst.msk [vmem:[#allocation2 + $0x47c] sm:$0xf] %vm616_vm0, %v5989_v0  ;;  %2357 = vst.msk [vmem:[#allocation2 + $0x1d0] sm:$0xf] %vm616_vm0, %v5970_v6  ;;  %v6338_v11 = vld [vmem:[#allocation2 + $0x1c4] ss:$36 sps:$4 sm:$0xff]  }
 0x128   : > { %6035 = vmatpush3.bf16.msra.mxu0 %v7607_v12  ;;  %2358 = vst.msk [vmem:[#allocation2 + $0x1f4] sm:$0xf] %vm616_vm0, %v5971_v7  ;;  %2377 = vst.msk [vmem:[#allocation2 + $0x4a0] sm:$0xf] %vm616_vm0, %v5990_v8  ;;  %v2443_v13 = vld [vmem:[#allocation2 + $0x1c0] sm:$0xff]  ;;  %v2198_v19 = vld [vmem:[%s6844_s7 + $0x12e] sm:$0xff] }
 0x129   : > { %6087 = vmatpush3.bf16.msra.mxu1 %v7607_v12  ;;  %v6340_v12 = vld [vmem:[#allocation2 + $0x1cc] ss:$36 sps:$4 sm:$0xff]   ;;  %v5489_v16 = vcombine.low %v2443_v13, %v2448_v14  ;;  %v6346_v18 = vld [vmem:[#allocation2 + $0x214] ss:$36 sps:$4 sm:$0xff]   ;;  %v5991_v20 = vpack.c.bf16 %v2198_v19, %v2198_v19  ;;  %v2180_v21 = vld [vmem:[%s6844_s7 + $0x9e] sm:$0xff] }
 0x12a   : > { %4384 = vmatmul.mubr.bf16.gmra.mxu0 %v5471_v59  ;;  %v6342_v15 = vld [vmem:[#allocation2 + $0x1c8] ss:$36 sps:$4 sm:$0xff]   ;;  %v2179_v53 = vld [vmem:[%s6844_s7 + $0x96] sm:$0xff]  ;;  %v5973_v23 = vpack.c.bf16 %v2180_v21, %v2180_v21  ;;  %v2200_v25 = vld [vmem:[%s6844_s7 + $0x13e] sm:$0xff] }
 0x12b   : > { %4561 = vmatmul.mubr.bf16.gmra.mxu1 %v6331_v35  ;;  %4391 = vmatprep.mubr.bf16.mxu0 %v6333_v42  ;;  %v6344_v17 = vld [vmem:[#allocation2 + $0x20c] ss:$36 sps:$4 sm:$0xff]   ;;  %v5972_v22 = vpack.c.bf16 %v2179_v53, %v2179_v53  ;;  %v2199_v24 = vld [vmem:[%s6844_s7 + $0x136] sm:$0xff]  ;;  %2378 = vst.msk [vmem:[#allocation2 + $0x4c4] sm:$0xf] %vm616_vm0, %v5991_v20  ;;  %v5993_v29 = vpack.c.bf16 %v2200_v25, %v2200_v25  ;;  %v2184_v33 = vld [vmem:[%s6844_s7 + $0xbe] sm:$0xff] }
 0x12c   : > { %4568 = vmatprep.mubr.bf16.mxu1 %v6335_v43  ;;  %v2181_v26 = vld [vmem:[%s6844_s7 + $0xa6] sm:$0xff]  ;;  %v5992_v28 = vpack.c.bf16 %v2199_v24, %v2199_v24  ;;  %v2182_v30 = vld [vmem:[%s6844_s7 + $0xae] sm:$0xff]  ;;  %v2183_v32 = vld [vmem:[%s6844_s7 + $0xb6] sm:$0xff]  ;;  %2360 = vst.msk [vmem:[#allocation2 + $0x23c] sm:$0xf] %vm616_vm0, %v5973_v23  ;;  %v5977_v39 = vpack.c.bf16 %v2184_v33, %v2184_v33  ;;  %s237_s7 = sand.u32 1, %s6490_s16  }
 0x12d   : > { %v5974_v31 = vpack.c.bf16 %v2181_v26, %v2181_v26  ;;  %v2453_v35 = vld [vmem:[#allocation2 + $0x208] sm:$0xff]  ;;  %2359 = vst.msk [vmem:[#allocation2 + $0x218] sm:$0xf] %vm616_vm0, %v5972_v22  ;;  %v5975_v37 = vpack.c.bf16 %v2182_v30, %v2182_v30  ;;  %v5976_v38 = vpack.c.bf16 %v2183_v32, %v2183_v32  ;;  %2380 = vst.msk [vmem:[#allocation2 + $0x50c] sm:$0xf] %vm616_vm0, %v5993_v29  ;;  %v2463_v52 = vld [vmem:[#allocation2 + $0x250] sm:$0xff] }
 0x12e   : > { %v2458_v36 = vld [vmem:[#allocation2 + $0x22c] sm:$0xff]  ;;  %2379 = vst.msk [vmem:[#allocation2 + $0x4e8] sm:$0xf] %vm616_vm0, %v5992_v28  ;;  %2364 = vst.msk [vmem:[#allocation2 + $0x2cc] sm:$0xf] %vm616_vm0, %v5977_v39  ;;  %v2468_v54 = vld [vmem:[#allocation2 + $0x274] sm:$0xff] }
 0x12f   : > { %2361 = vst.msk [vmem:[#allocation2 + $0x260] sm:$0xf] %vm616_vm0, %v5974_v31  ;;  %2362 = vst.msk [vmem:[#allocation2 + $0x284] sm:$0xf] %vm616_vm0, %v5975_v37  ;;  %v5498_v43 = vcombine.low %v2453_v35, %v2458_v36  ;;  %v6348_v45 = vld [vmem:[#allocation2 + $0x210] ss:$36 sps:$4 sm:$0xff]   ;;  %v5507_v60 = vcombine.low %v2463_v52, %v2468_v54 }
 0x130   : > { %2363 = vst.msk [vmem:[#allocation2 + $0x2a8] sm:$0xf] %vm616_vm0, %v5976_v38  ;;  %v6349_v46 = vld [vmem:[#allocation2 + $0x254] ss:$36 sps:$4 sm:$0xff]   ;;  %v6351_v49 = vld [vmem:[#allocation2 + $0x25c] ss:$36 sps:$4 sm:$0xff]  }
 0x131   : > { %v6353_v62 = vld [vmem:[#allocation2 + $0x258] ss:$36 sps:$4 sm:$0xff]   ;;  %v6356_v3 = vld [vmem:[#allocation2 + $0x2a4] ss:$36 sps:$4 sm:$0xff]   ;;  %v6365_v19 = vld [vmem:[#allocation2 + $0x2ec] ss:$36 sps:$4 sm:$0xff]  }
 0x132   : > { %4392 = vmatmul.mubr.bf16.gmra.mxu0 %v5480_v9  ;;  %v6354_v63 = vld [vmem:[#allocation2 + $0x29c] ss:$36 sps:$4 sm:$0xff]   ;;  %v6363_v28 = vld [vmem:[#allocation2 + $0x2e8] ss:$36 sps:$4 sm:$0xff]   ;;  %v6371_v32 = vld [vmem:[#allocation2 + $0x334] ss:$36 sps:$4 sm:$0xff]  }
 0x133   : > { %4569 = vmatmul.mubr.bf16.gmra.mxu1 %v6337_v10  ;;  %4399 = vmatprep.mubr.bf16.mxu0 %v6338_v11  ;;  %v2473_v7 = vld [vmem:[#allocation2 + $0x298] sm:$0xff]  ;;  %v6360_v26 = vld [vmem:[#allocation2 + $0x2e0] ss:$36 sps:$4 sm:$0xff]   ;;  %v6368_v29 = vld [vmem:[#allocation2 + $0x32c] ss:$36 sps:$4 sm:$0xff]   ;;  %s6088_s21 = smul.u32 288, %s237_s7 }
 0x134   : > { %4576 = vmatprep.mubr.bf16.mxu1 %v6340_v12  ;;  %v2478_v8 = vld [vmem:[#allocation2 + $0x2bc] sm:$0xff]  ;;  %s8069_s18 = scalar_lea.sflag [#allocation4], %s237_s7 }
 0x135   : > { %v5516_v13 = vcombine.low %v2473_v7, %v2478_v8  ;;  %s7905_s30 = scalar_lea.vmem [#allocation3], %s6088_s21 }
 0x136   : > { %s4987_s6 = sshll.u32 %s7905_s30, 4  ;;  %s8062_s6 = int_to_ptr.vmem [resolvable:$true] %s4987_s6 }
 0x137   : > { %s6430_s11 = scalar_lea.vmem %s8062_s6, 4608  ;;  %p6437_p1 = scmp.lt.s32.totalorder %s8062_s6, %s6435_s13 }
 0x138   : > { %p6431_p12 = scmp.ne.s32.totalorder %s8062_s6, %s6430_s11  ;;  %p6438_p2 = scmp.lt.s32.totalorder %s6436_s14, %s6430_s11 }
 0x139   : > { %v3999_v27 = vpop.f32.mrf.mxu0 }
 0x13a   : > { %4400 = vmatmul.mubr.bf16.gmra.mxu0 %v5489_v16  ;;  %v6362_v16 = vld [vmem:[#allocation2 + $0x2e4] ss:$36 sps:$4 sm:$0xff]   ;;  %p6432_p13 = pnand %p6431_p12, %p6577_p4  ;;  %p6439_p3 = por %p6438_p2, %p6437_p1 }
 0x13b   : > { %v4176_v34 = vpop.f32.mrf.mxu1  ;;  %4577 = vmatmul.mubr.bf16.gmra.mxu1 %v6342_v15  ;;  %4407 = vmatprep.mubr.bf16.mxu0 %v6344_v17  ;;  %v4001_v41 = vpop.f32.mrf.mxu0  ;;  %v6358_v15 = vld [vmem:[#allocation2 + $0x2a0] ss:$36 sps:$4 sm:$0xff]  }
 0x13c   : > { %v7683_v40 = vadd.f32 %v4176_v34, %v3999_v27  ;;  %4584 = vmatprep.mubr.bf16.mxu1 %v6346_v18  ;;  %v6366_v41 = vld [vmem:[#allocation2 + $0x328] ss:$36 sps:$4 sm:$0xff]   ;;  %p6433_p0 = pneg %p6432_p13 }
 0x13d   : > { %v4178_v59 = vpop.f32.mrf.mxu1  ;;  %v4002_v42 = vpop.f32.mrf.mxu0 }
 0x13e   : > { %p6440_p5 = pnand %p6439_p3, %p6433_p0 }
 0x13f   : > { %v4179_v44 = vpop.f32.mrf.mxu1  ;;  %v4004_v48 = vpop.f32.mrf.mxu0 }
 0x140   : > { %v7691_v47 = vadd.f32 %v4179_v44, %v4002_v42  ;;  %v6369_v42 = vld [vmem:[#allocation2 + $0x330] ss:$36 sps:$4 sm:$0xff]  }
 0x141   : > { %v4181_v50 = vpop.f32.mrf.mxu1 }
 0x142   : > { %v4007_v51 = vpop.f32.mrf.mxu0  ;;  %4408 = vmatmul.mubr.bf16.gmra.mxu0 %v5498_v43  ;;  %v6375_v43 = vld [vmem:[#allocation2 + $0x374] ss:$36 sps:$4 sm:$0xff]  }
 0x143   : > { %v4184_v1 = vpop.f32.mrf.mxu1  ;;  %4585 = vmatmul.mubr.bf16.gmra.mxu1 %v6348_v45  ;;  %4415 = vmatprep.mubr.bf16.mxu0 %v6349_v46  ;;  %v6378_v46 = vld [vmem:[#allocation2 + $0x37c] ss:$36 sps:$4 sm:$0xff]  }
 0x144   : > { %v7693_v55 = vadd.f32 %v4184_v1, %v4007_v51  ;;  %v4009_v56 = vpop.f32.mrf.mxu0  ;;  %4592 = vmatprep.mubr.bf16.mxu1 %v6351_v49 }
 0x145   : > { %v4186_v57 = vpop.f32.mrf.mxu1  ;;  %v6373_v56 = vld [vmem:[#allocation2 + $0x370] ss:$36 sps:$4 sm:$0xff]  }
 0x146   : > { %v4010_v58 = vpop.f32.mrf.mxu0 }
 0x147   : > { %v4187_v61 = vpop.f32.mrf.mxu1 }
 0x148   : > { %v7695_v0 = vadd.f32 %v4187_v61, %v4010_v58  ;;  %v4012_v2 = vpop.f32.mrf.mxu0  ;;  %v6376_v58 = vld [vmem:[#allocation2 + $0x378] ss:$36 sps:$4 sm:$0xff]  }
 0x149   : > { %v4189_v4 = vpop.f32.mrf.mxu1 }
 0x14a   : > { %v4015_v5 = vpop.f32.mrf.mxu0  ;;  %4416 = vmatmul.mubr.bf16.gmra.mxu0 %v5507_v60  ;;  %v6381_v60 = vld [vmem:[#allocation2 + $0x3bc] ss:$36 sps:$4 sm:$0xff]  }
 0x14b   : > { %v4192_v6 = vpop.f32.mrf.mxu1  ;;  %4593 = vmatmul.mubr.bf16.gmra.mxu1 %v6353_v62  ;;  %4423 = vmatprep.mubr.bf16.mxu0 %v6354_v63  ;;  %v6384_v63 = vld [vmem:[#allocation2 + $0x3c4] ss:$36 sps:$4 sm:$0xff]  }
 0x14c   : > { %v7697_v9 = vadd.f32 %v4192_v6, %v4015_v5  ;;  %v4017_v10 = vpop.f32.mrf.mxu0  ;;  %4600 = vmatprep.mubr.bf16.mxu1 %v6356_v3 }
 0x14d   : > { %v4194_v11 = vpop.f32.mrf.mxu1  ;;  %v6379_v10 = vld [vmem:[#allocation2 + $0x3b8] ss:$36 sps:$4 sm:$0xff]  }
 0x14e   : > { %v4018_v12 = vpop.f32.mrf.mxu0 }
 0x14f   : > { %v4195_v14 = vpop.f32.mrf.mxu1 }
 0x150   : > { %v7699_v17 = vadd.f32 %v4195_v14, %v4018_v12  ;;  %v4020_v18 = vpop.f32.mrf.mxu0  ;;  %v6382_v12 = vld [vmem:[#allocation2 + $0x3c0] ss:$36 sps:$4 sm:$0xff]  }
 0x151   : > { %v4197_v20 = vpop.f32.mrf.mxu1 }
 0x152   : > { %v4023_v53 = vpop.f32.mrf.mxu0  ;;  %4424 = vmatmul.mubr.bf16.gmra.mxu0 %v5516_v13  ;;  %v6388_v13 = vld [vmem:[#allocation2 + $0x404] ss:$36 sps:$4 sm:$0xff]  }
 0x153   : > { %v4200_v21 = vpop.f32.mrf.mxu1  ;;  %4601 = vmatmul.mubr.bf16.gmra.mxu1 %v6358_v15  ;;  %4431 = vmatprep.mubr.bf16.mxu0 %v6362_v16  ;;  %v6391_v16 = vld [vmem:[#allocation2 + $0x40c] ss:$36 sps:$4 sm:$0xff]  }
 0x154   : > { %v7701_v22 = vadd.f32 %v4200_v21, %v4023_v53  ;;  %v4025_v23 = vpop.f32.mrf.mxu0  ;;  %4608 = vmatprep.mubr.bf16.mxu1 %v6365_v19 }
 0x155   : > { %v4202_v24 = vpop.f32.mrf.mxu1 }
 0x156   : > { %v4026_v25 = vpop.f32.mrf.mxu0 }
 0x157   : > { %v4203_v27 = vpop.f32.mrf.mxu1 }
 0x158   : > { %v7703_v30 = vadd.f32 %v4203_v27, %v4026_v25  ;;  %v4028_v31 = vpop.f32.mrf.mxu0  ;;  %v6386_v25 = vld [vmem:[#allocation2 + $0x400] ss:$36 sps:$4 sm:$0xff]   ;;  %v6389_v27 = vld [vmem:[#allocation2 + $0x408] ss:$36 sps:$4 sm:$0xff]  }
 0x159   : > { %v4205_v33 = vpop.f32.mrf.mxu1 }
 0x15a   : > { %v4031_v34 = vpop.f32.mrf.mxu0  ;;  %4432 = vmatmul.mubr.bf16.gmra.mxu0 %v6360_v26 }
 0x15b   : > { %v4208_v35 = vpop.f32.mrf.mxu1  ;;  %4609 = vmatmul.mubr.bf16.gmra.mxu1 %v6363_v28  ;;  %4439 = vmatprep.mubr.bf16.mxu0 %v6368_v29  ;;  %v6394_v28 = vld [vmem:[#allocation2 + $0x44c] ss:$36 sps:$4 sm:$0xff]  }
 0x15c   : > { %v7705_v36 = vadd.f32 %v4208_v35, %v4031_v34  ;;  %v4033_v37 = vpop.f32.mrf.mxu0  ;;  %4616 = vmatprep.mubr.bf16.mxu1 %v6371_v32  ;;  %v6397_v32 = vld [vmem:[#allocation2 + $0x454] ss:$36 sps:$4 sm:$0xff]  }
 0x15d   : > { %v4210_v38 = vpop.f32.mrf.mxu1 }
 0x15e   : > { %v4034_v39 = vpop.f32.mrf.mxu0 }
 0x15f   : > { %v4211_v59 = vpop.f32.mrf.mxu1 }
 0x160   : > { %v7707_v44 = vadd.f32 %v4211_v59, %v4034_v39  ;;  %v4036_v45 = vpop.f32.mrf.mxu0  ;;  %v6392_v59 = vld [vmem:[#allocation2 + $0x448] ss:$36 sps:$4 sm:$0xff]  }
 0x161   : > { %v4213_v48 = vpop.f32.mrf.mxu1  ;;  %v6401_v45 = vld [vmem:[#allocation2 + $0x494] ss:$36 sps:$4 sm:$0xff]  }
 0x162   : > { %v4039_v49 = vpop.f32.mrf.mxu0  ;;  %4440 = vmatmul.mubr.bf16.gmra.mxu0 %v6366_v41 }
 0x163   : > { %v4216_v50 = vpop.f32.mrf.mxu1  ;;  %4617 = vmatmul.mubr.bf16.gmra.mxu1 %v6369_v42  ;;  %4447 = vmatprep.mubr.bf16.mxu0 %v6375_v43  ;;  %v6395_v43 = vld [vmem:[#allocation2 + $0x450] ss:$36 sps:$4 sm:$0xff]  }
 0x164   : > { %v7709_v51 = vadd.f32 %v4216_v50, %v4039_v49  ;;  %v4041_v52 = vpop.f32.mrf.mxu0  ;;  %4624 = vmatprep.mubr.bf16.mxu1 %v6378_v46  ;;  %v6404_v49 = vld [vmem:[#allocation2 + $0x49c] ss:$36 sps:$4 sm:$0xff]  }
 0x165   : > { %v4218_v1 = vpop.f32.mrf.mxu1 }
 0x166   : > { %v4042_v54 = vpop.f32.mrf.mxu0 }
 0x167   : > { %v4219_v57 = vpop.f32.mrf.mxu1 }
 0x168   : > { %v7711_v61 = vadd.f32 %v4219_v57, %v4042_v54  ;;  %v4044_v62 = vpop.f32.mrf.mxu0 }
 0x169   : > { %v4221_v2 = vpop.f32.mrf.mxu1 }
 0x16a   : > { %v4047_v3 = vpop.f32.mrf.mxu0  ;;  %4448 = vmatmul.mubr.bf16.gmra.mxu0 %v6373_v56  ;;  %v6407_v2 = vld [vmem:[#allocation2 + $0x4dc] ss:$36 sps:$4 sm:$0xff]  }
 0x16b   : > { %v4224_v4 = vpop.f32.mrf.mxu1  ;;  %4625 = vmatmul.mubr.bf16.gmra.mxu1 %v6376_v58  ;;  %4455 = vmatprep.mubr.bf16.mxu0 %v6381_v60  ;;  %v6399_v60 = vld [vmem:[#allocation2 + $0x490] ss:$36 sps:$4 sm:$0xff]  }
 0x16c   : > { %v7713_v5 = vadd.f32 %v4224_v4, %v4047_v3  ;;  %v4049_v6 = vpop.f32.mrf.mxu0  ;;  %4632 = vmatprep.mubr.bf16.mxu1 %v6384_v63  ;;  %v6402_v63 = vld [vmem:[#allocation2 + $0x498] ss:$36 sps:$4 sm:$0xff]  }
 0x16d   : > { %v4226_v7 = vpop.f32.mrf.mxu1  ;;  %v6410_v6 = vld [vmem:[#allocation2 + $0x4e4] ss:$36 sps:$4 sm:$0xff]  }
 0x16e   : > { %v4050_v8 = vpop.f32.mrf.mxu0 }
 0x16f   : > { %v4227_v11 = vpop.f32.mrf.mxu1 }
 0x170   : > { %v7715_v14 = vadd.f32 %v4227_v11, %v4050_v8  ;;  %v4052_v15 = vpop.f32.mrf.mxu0 }
 0x171   : > { %v4229_v18 = vpop.f32.mrf.mxu1 }
 0x172   : > { %v4055_v19 = vpop.f32.mrf.mxu0  ;;  %4456 = vmatmul.mubr.bf16.gmra.mxu0 %v6379_v10 }
 0x173   : > { %v4232_v20 = vpop.f32.mrf.mxu1  ;;  %4633 = vmatmul.mubr.bf16.gmra.mxu1 %v6382_v12  ;;  %4463 = vmatprep.mubr.bf16.mxu0 %v6388_v13 }
 0x174   : > { %v7717_v53 = vadd.f32 %v4232_v20, %v4055_v19  ;;  %v4057_v21 = vpop.f32.mrf.mxu0  ;;  %4640 = vmatprep.mubr.bf16.mxu1 %v6391_v16  ;;  %v6405_v16 = vld [vmem:[#allocation2 + $0x4d8] ss:$36 sps:$4 sm:$0xff]   ;;  %v6408_v19 = vld [vmem:[#allocation2 + $0x4e0] ss:$36 sps:$4 sm:$0xff]  }
 0x175   : > { %v4234_v23 = vpop.f32.mrf.mxu1  ;;  %v6411_v20 = vld [vmem:[#allocation2 + $0x20] ss:$36 sps:$4 sm:$0xff]  }
 0x176   : > { %v4058_v24 = vpop.f32.mrf.mxu0 }
 0x177   : > { %v4235_v26 = vpop.f32.mrf.mxu1 }
 0x178   : > { %v7719_v29 = vadd.f32 %v4235_v26, %v4058_v24  ;;  %v4060_v31 = vpop.f32.mrf.mxu0  ;;  %v6412_v24 = vld [vmem:[#allocation2 + $0x2f0] ss:$36 sps:$4 sm:$0xff]  }
 0x179   : > { %v4237_v33 = vpop.f32.mrf.mxu1 }
 0x17a   : > { %v4063_v34 = vpop.f32.mrf.mxu0  ;;  %4464 = vmatmul.mubr.bf16.gmra.mxu0 %v6386_v25 }
 0x17b   : > { %v4240_v35 = vpop.f32.mrf.mxu1  ;;  %4641 = vmatmul.mubr.bf16.gmra.mxu1 %v6389_v27  ;;  %4471 = vmatprep.mubr.bf16.mxu0 %v6394_v28 }
 0x17c   : > { %v7721_v37 = vadd.f32 %v4240_v35, %v4063_v34  ;;  %v4065_v38 = vpop.f32.mrf.mxu0  ;;  %4648 = vmatprep.mubr.bf16.mxu1 %v6397_v32  ;;  %v6413_v34 = vld [vmem:[#allocation2 + $0x68] ss:$36 sps:$4 sm:$0xff]  }
 0x17d   : > { %v4242_v39 = vpop.f32.mrf.mxu1  ;;  %v6414_v38 = vld [vmem:[#allocation2 + $0x338] ss:$36 sps:$4 sm:$0xff]  }
 0x17e   : > { %v4066_v41 = vpop.f32.mrf.mxu0  ;;  %v6415_v39 = vld [vmem:[#allocation2 + $0xb0] ss:$36 sps:$4 sm:$0xff]  }
 0x17f   : > { %v4243_v42 = vpop.f32.mrf.mxu1 }
 0x180   : > { %v7723_v46 = vadd.f32 %v4243_v42, %v4066_v41  ;;  %v4068_v48 = vpop.f32.mrf.mxu0  ;;  %v6416_v42 = vld [vmem:[#allocation2 + $0x380] ss:$36 sps:$4 sm:$0xff]  }
 0x181   : > { %v4245_v50 = vpop.f32.mrf.mxu1 }
 0x182   : > { %v4071_v52 = vpop.f32.mrf.mxu0  ;;  %4472 = vmatmul.mubr.bf16.gmra.mxu0 %v6392_v59 }
 0x183   : > { %v4248_v1 = vpop.f32.mrf.mxu1  ;;  %4649 = vmatmul.mubr.bf16.gmra.mxu1 %v6395_v43  ;;  %4479 = vmatprep.mubr.bf16.mxu0 %v6401_v45 }
 0x184   : > { %v7725_v54 = vadd.f32 %v4248_v1, %v4071_v52  ;;  %v4073_v56 = vpop.f32.mrf.mxu0  ;;  %4656 = vmatprep.mubr.bf16.mxu1 %v6404_v49 }
 0x185   : > { %v4250_v57 = vpop.f32.mrf.mxu1  ;;  %v6417_v56 = vld [vmem:[#allocation2 + $0xf8] ss:$36 sps:$4 sm:$0xff]  }
 0x186   : > { %v4074_v58 = vpop.f32.mrf.mxu0 }
 0x187   : > { %v4251_v62 = vpop.f32.mrf.mxu1 }
 0x188   : > { %v7727_v3 = vadd.f32 %v4251_v62, %v4074_v58  ;;  %v4076_v4 = vpop.f32.mrf.mxu0  ;;  %v6418_v58 = vld [vmem:[#allocation2 + $0x3c8] ss:$36 sps:$4 sm:$0xff]  }
 0x189   : > { %v4253_v7 = vpop.f32.mrf.mxu1 }
 0x18a   : > { %v4079_v8 = vpop.f32.mrf.mxu0  ;;  %4480 = vmatmul.mubr.bf16.gmra.mxu0 %v6399_v60  ;;  %v6419_v60 = vld [vmem:[#allocation2 + $0x140] ss:$36 sps:$4 sm:$0xff]  }
 0x18b   : > { %v4256_v10 = vpop.f32.mrf.mxu1  ;;  %4657 = vmatmul.mubr.bf16.gmra.mxu1 %v6402_v63  ;;  %4487 = vmatprep.mubr.bf16.mxu0 %v6407_v2  ;;  %v6420_v2 = vld [vmem:[#allocation2 + $0x410] ss:$36 sps:$4 sm:$0xff]  }
 0x18c   : > { %v7729_v11 = vadd.f32 %v4256_v10, %v4079_v8  ;;  %v4081_v12 = vpop.f32.mrf.mxu0  ;;  %4664 = vmatprep.mubr.bf16.mxu1 %v6410_v6 }
 0x18d   : > { %v4258_v13 = vpop.f32.mrf.mxu1 }
 0x18e   : > { %v4082_v15 = vpop.f32.mrf.mxu0 }
 0x18f   : > { %v4259_v18 = vpop.f32.mrf.mxu1 }
 0x190   : > { %v7731_v21 = vadd.f32 %v4259_v18, %v4082_v15  ;;  %v4084_v23 = vpop.f32.mrf.mxu0  ;;  %v6421_v15 = vld [vmem:[#allocation2 + $0x188] ss:$36 sps:$4 sm:$0xff]   ;;  %v6422_v18 = vld [vmem:[#allocation2 + $0x458] ss:$36 sps:$4 sm:$0xff]  }
 0x191   : > { %v4261_v25 = vpop.f32.mrf.mxu1 }
 0x192   : > { %v4087_v26 = vpop.f32.mrf.mxu0  ;;  %4488 = vmatmul.mubr.bf16.gmra.mxu0 %v6405_v16 }
 0x193   : > { %v4264_v27 = vpop.f32.mrf.mxu1  ;;  %4665 = vmatmul.mubr.bf16.gmra.mxu1 %v6408_v19  ;;  %6036 = vmatprep.mubr.bf16.mxu0 %v6411_v20  ;;  %v6423_v19 = vld [vmem:[#allocation2 + $0x1d0] ss:$36 sps:$4 sm:$0xff]  }
 0x194   : > { %v7733_v28 = vadd.f32 %v4264_v27, %v4087_v26  ;;  %v4089_v31 = vpop.f32.mrf.mxu0  ;;  %6056 = vmatprep.mubr.bf16.mxu1 %v6412_v24  ;;  %v6424_v24 = vld [vmem:[#allocation2 + $0x4a0] ss:$36 sps:$4 sm:$0xff]  }
 0x195   : > { %v4266_v32 = vpop.f32.mrf.mxu1 }
 0x196   : > { %v4090_v33 = vpop.f32.mrf.mxu0 }
 0x197   : > { %v4267_v35 = vpop.f32.mrf.mxu1 }
 0x198   : > { %v7735_v41 = vadd.f32 %v4267_v35, %v4090_v33  ;;  %v4092_v59 = vpop.f32.mrf.mxu0  ;;  %v6425_v35 = vld [vmem:[#allocation2 + $0x218] ss:$36 sps:$4 sm:$0xff]  }
 0x199   : > { %v4269_v43 = vpop.f32.mrf.mxu1  ;;  %v6427_v59 = vld [vmem:[#allocation2 + $0x260] ss:$36 sps:$4 sm:$0xff]  }
 0x19a   : > { %v4095_v45 = vpop.f32.mrf.mxu0  ;;  %6037 = vmatmul.mubr.bf16.vlgmr.msra.gmra.mxu0 %v6413_v34 }
 0x19b   : > { %v4272_v48 = vpop.f32.mrf.mxu1  ;;  %6057 = vmatmul.mubr.bf16.vlgmr.msra.gmra.mxu1 %v6414_v38  ;;  %6040 = vmatprep.mubr.bf16.mxu0 %v6415_v39  ;;  %v6426_v39 = vld [vmem:[#allocation2 + $0x4e8] ss:$36 sps:$4 sm:$0xff]  }
 0x19c   : > { %v7737_v49 = vadd.f32 %v4272_v48, %v4095_v45  ;;  %v4097_v50 = vpop.f32.mrf.mxu0  ;;  %6060 = vmatprep.mubr.bf16.mxu1 %v6416_v42 }
 0x19d   : > { %v4274_v52 = vpop.f32.mrf.mxu1 }
 0x19e   : > { %v4098_v1 = vpop.f32.mrf.mxu0 }
 0x19f   : > { %v4275_v57 = vpop.f32.mrf.mxu1 }
 0x1a0   : > { %v7739_v62 = vadd.f32 %v4275_v57, %v4098_v1  ;;  %v4100_v63 = vpop.f32.mrf.mxu0 }
 0x1a1   : > { %v4277_v4 = vpop.f32.mrf.mxu1 }
 0x1a2   : > { %v4103_v6 = vpop.f32.mrf.mxu0  ;;  %6041 = vmatmul.mubr.bf16.gmra.mxu0 %v6417_v56 }
 0x1a3   : > { %v4280_v7 = vpop.f32.mrf.mxu1  ;;  %6061 = vmatmul.mubr.bf16.gmra.mxu1 %v6418_v58  ;;  %6044 = vmatprep.mubr.bf16.mxu0 %v6419_v60  ;;  %v6428_v58 = vld [vmem:[#allocation2 + $0x2a8] ss:$36 sps:$4 sm:$0xff]  }
 0x1a4   : > { %v7741_v8 = vadd.f32 %v4280_v7, %v4103_v6  ;;  %v4105_v10 = vpop.f32.mrf.mxu0  ;;  %6064 = vmatprep.mubr.bf16.mxu1 %v6420_v2 }
 0x1a5   : > { %v4282_v12 = vpop.f32.mrf.mxu1 }
 0x1a6   : > { %v4106_v13 = vpop.f32.mrf.mxu0 }
 0x1a7   : > { %v4283_v16 = vpop.f32.mrf.mxu1 }
 0x1a8   : > { %v7743_v20 = vadd.f32 %v4283_v16, %v4106_v13  ;;  %v4108_v23 = vpop.f32.mrf.mxu0 }
 0x1a9   : > { %v4285_v25 = vpop.f32.mrf.mxu1 }
 0x1aa   : > { %v4111_v26 = vpop.f32.mrf.mxu0  ;;  %6045 = vmatmul.mubr.bf16.gmra.mxu0 %v6421_v15 }
 0x1ab   : > { %v4288_v27 = vpop.f32.mrf.mxu1  ;;  %6065 = vmatmul.mubr.bf16.gmra.mxu1 %v6422_v18  ;;  %6048 = vmatprep.mubr.bf16.mxu0 %v6423_v19 }
 0x1ac   : > { %v7745_v31 = vadd.f32 %v4288_v27, %v4111_v26  ;;  %v4113_v32 = vpop.f32.mrf.mxu0  ;;  %6068 = vmatprep.mubr.bf16.mxu1 %v6424_v24 }
 0x1ad   : > { %v4290_v33 = vpop.f32.mrf.mxu1 }
 0x1ae   : > { %v4114_v34 = vpop.f32.mrf.mxu0 }
 0x1af   : > { %v4291_v38 = vpop.f32.mrf.mxu1 }
 0x1b0   : > { %v7747_v42 = vadd.f32 %v4291_v38, %v4114_v34  ;;  %v4116_v43 = vpop.f32.mrf.mxu0 }
 0x1b1   : > { %v4293_v45 = vpop.f32.mrf.mxu1 }
 0x1b2   : > { %v4119_v48 = vpop.f32.mrf.mxu0  ;;  %6049 = vmatmul.mubr.bf16.gmra.mxu0 %v6425_v35 }
 0x1b3   : > { %v4296_v50 = vpop.f32.mrf.mxu1  ;;  %6069 = vmatmul.mubr.bf16.gmra.mxu1 %v6426_v39  ;;  %6052 = vmatprep.mubr.bf16.mxu0 %v6427_v59 }
 0x1b4   : > { %v7749_v52 = vadd.f32 %v4296_v50, %v4119_v48  ;;  %v4121_v1 = vpop.f32.mrf.mxu0 }
 0x1b5   : > { %v4298_v56 = vpop.f32.mrf.mxu1 }
 0x1b6   : > { %v4122_v57 = vpop.f32.mrf.mxu0 }
 0x1b7   : > { %v4299_v60 = vpop.f32.mrf.mxu1 }
 0x1b8   : > { %v7751_v63 = vadd.f32 %v4299_v60, %v4122_v57  ;;  %v4124_v2 = vpop.f32.mrf.mxu0 }
 0x1b9   : > { %v4301_v4 = vpop.f32.mrf.mxu1 }
 0x1ba   : > { %v4127_v6 = vpop.f32.mrf.mxu0  ;;  %6053 = vmatmul.mubr.bf16.gmra.mxu0 %v6428_v58 }
 0x1bb   : > { %v4304_v7 = vpop.f32.mrf.mxu1 }
 0x1bc   : > { %v7753_v10 = vadd.f32 %v4304_v7, %v4127_v6  ;;  %v4129_v12 = vpop.f32.mrf.mxu0 }
 0x1bd   : > { %v4306_v13 = vpop.f32.mrf.mxu1 }
 0x1be   : > { %v4130_v15 = vpop.f32.mrf.mxu0 }
 0x1bf   : > { %v4307_v16 = vpop.f32.mrf.mxu1 }
 0x1c0   : > { %v7755_v18 = vadd.f32 %v4307_v16, %v4130_v15  ;;  %v4132_v19 = vpop.f32.mrf.mxu0 }
 0x1c1   : > { %v4309_v23 = vpop.f32.mrf.mxu1 }
 0x1c2   : > { %8121 = vst [vmem:[#allocation6_spill] sm:$0xff] %v7755_v18  ;;  %v4135_v24 = vpop.f32.mrf.mxu0 }
 0x1c3   : > { %v4312_v25 = vpop.f32.mrf.mxu1 }
 0x1c4   : > { %v7757_v26 = vadd.f32 %v4312_v25, %v4135_v24  ;;  %v4137_v27 = vpop.f32.mrf.mxu0 }
 0x1c5   : > { %v4314_v32 = vpop.f32.mrf.mxu1 }
 0x1c6   : > { %v4138_v33 = vpop.f32.mrf.mxu0 }
 0x1c7   : > { %v4315_v34 = vpop.f32.mrf.mxu1 }
 0x1c8   : > { %v7759_v35 = vadd.f32 %v4315_v34, %v4138_v33  ;;  %v4140_v38 = vpop.f32.mrf.mxu0 }
 0x1c9   : > { %v4317_v39 = vpop.f32.mrf.mxu1 }
 0x1ca   : > { %v4353_v59 = vpop.f32.mrf.mxu0 }
 0x1cb   : > { %v4354_v43 = vadd.f32 %v4353_v59, %v7683_v40  ;;  %v4530_v45 = vpop.f32.mrf.mxu1 }
 0x1cc   : > { %v4355_v48 = vpop.f32.mrf.mxu0 }
 0x1cd   : > { %v7762_v50 = vadd.f32 %v4530_v45, %v4354_v43  ;;  %v4532_v1 = vpop.f32.mrf.mxu1 }
 0x1ce   : > { %v4356_v56 = vpop.f32.mrf.mxu0 }
 0x1cf   : > { %v4357_v57 = vadd.f32 %v4356_v56, %v7691_v47  ;;  %v4533_v58 = vpop.f32.mrf.mxu1 }
 0x1d0   : > { %v4358_v60 = vpop.f32.mrf.mxu0 }
 0x1d1   : > { %v7765_v2 = vadd.f32 %v4533_v58, %v4357_v57  ;;  %v4535_v4 = vpop.f32.mrf.mxu1 }
 0x1d2   : > { %v4361_v6 = vpop.f32.mrf.mxu0 }
 0x1d3   : > { %v4362_v7 = vadd.f32 %v4361_v6, %v7693_v55  ;;  %v4538_v12 = vpop.f32.mrf.mxu1 }
 0x1d4   : > { %v4363_v13 = vpop.f32.mrf.mxu0 }
 0x1d5   : > { %v7768_v15 = vadd.f32 %v4538_v12, %v4362_v7  ;;  %v4540_v40 = vpop.f32.mrf.mxu1 }
 0x1d6   : > { %v4364_v16 = vpop.f32.mrf.mxu0 }
 0x1d7   : > { %v4365_v19 = vadd.f32 %v4364_v16, %v7695_v0  ;;  %v4541_v23 = vpop.f32.mrf.mxu1 }
 0x1d8   : > { %v4366_v24 = vpop.f32.mrf.mxu0 }
 0x1d9   : > { %v7771_v25 = vadd.f32 %v4541_v23, %v4365_v19  ;;  %v4543_v47 = vpop.f32.mrf.mxu1 }
 0x1da   : > { %v4369_v27 = vpop.f32.mrf.mxu0 }
 0x1db   : > { %v4370_v32 = vadd.f32 %v4369_v27, %v7697_v9  ;;  %v4546_v33 = vpop.f32.mrf.mxu1 }
 0x1dc   : > { %v4371_v34 = vpop.f32.mrf.mxu0 }
 0x1dd   : > { %v7774_v38 = vadd.f32 %v4546_v33, %v4370_v32  ;;  %v4548_v55 = vpop.f32.mrf.mxu1 }
 0x1de   : > { %v4372_v39 = vpop.f32.mrf.mxu0 }
 0x1df   : > { %v4373_v59 = vadd.f32 %v4372_v39, %v7699_v17  ;;  %v4549_v43 = vpop.f32.mrf.mxu1 }
 0x1e0   : > { %v4374_v45 = vpop.f32.mrf.mxu0 }
 0x1e1   : > { %v7777_v48 = vadd.f32 %v4549_v43, %v4373_v59  ;;  %v4551_v0 = vpop.f32.mrf.mxu1 }
 0x1e2   : > { %v4377_v1 = vpop.f32.mrf.mxu0 }
 0x1e3   : > { %v4378_v56 = vadd.f32 %v4377_v1, %v7701_v22  ;;  %v4554_v57 = vpop.f32.mrf.mxu1 }
 0x1e4   : > { %v4379_v58 = vpop.f32.mrf.mxu0 }
 0x1e5   : > { %v7780_v60 = vadd.f32 %v4554_v57, %v4378_v56  ;;  %v4556_v9 = vpop.f32.mrf.mxu1 }
 0x1e6   : > { %v4380_v4 = vpop.f32.mrf.mxu0 }
 0x1e7   : > { %v4381_v6 = vadd.f32 %v4380_v4, %v7703_v30  ;;  %v4557_v7 = vpop.f32.mrf.mxu1 }
 0x1e8   : > { %v4382_v12 = vpop.f32.mrf.mxu0 }
 0x1e9   : > { %v7783_v13 = vadd.f32 %v4557_v7, %v4381_v6  ;;  %v4559_v17 = vpop.f32.mrf.mxu1 }
 0x1ea   : > { %v4385_v40 = vpop.f32.mrf.mxu0 }
 0x1eb   : > { %v4386_v16 = vadd.f32 %v4385_v40, %v7705_v36  ;;  %v4562_v19 = vpop.f32.mrf.mxu1 }
 0x1ec   : > { %v4387_v23 = vpop.f32.mrf.mxu0 }
 0x1ed   : > { %v7786_v24 = vadd.f32 %v4562_v19, %v4386_v16  ;;  %v4564_v22 = vpop.f32.mrf.mxu1 }
 0x1ee   : > { %v4388_v47 = vpop.f32.mrf.mxu0 }
 0x1ef   : > { %v4389_v27 = vadd.f32 %v4388_v47, %v7707_v44  ;;  %v4565_v32 = vpop.f32.mrf.mxu1 }
 0x1f0   : > { %v4390_v33 = vpop.f32.mrf.mxu0 }
 0x1f1   : > { %v7789_v34 = vadd.f32 %v4565_v32, %v4389_v27  ;;  %v4567_v30 = vpop.f32.mrf.mxu1 }
 0x1f2   : > { %v4393_v55 = vpop.f32.mrf.mxu0 }
 0x1f3   : > { %v4394_v39 = vadd.f32 %v4393_v55, %v7709_v51  ;;  %v4570_v59 = vpop.f32.mrf.mxu1 }
 0x1f4   : > { %v4395_v43 = vpop.f32.mrf.mxu0 }
 0x1f5   : > { %v7792_v45 = vadd.f32 %v4570_v59, %v4394_v39  ;;  %v4572_v36 = vpop.f32.mrf.mxu1 }
 0x1f6   : > { %v4396_v0 = vpop.f32.mrf.mxu0 }
 0x1f7   : > { %v4397_v1 = vadd.f32 %v4396_v0, %v7711_v61  ;;  %v4573_v56 = vpop.f32.mrf.mxu1 }
 0x1f8   : > { %v4398_v57 = vpop.f32.mrf.mxu0 }
 0x1f9   : > { %v7795_v58 = vadd.f32 %v4573_v56, %v4397_v1  ;;  %v4575_v44 = vpop.f32.mrf.mxu1 }
 0x1fa   : > { %v4401_v9 = vpop.f32.mrf.mxu0 }
 0x1fb   : > { %v4402_v4 = vadd.f32 %v4401_v9, %v7713_v5  ;;  %v4578_v6 = vpop.f32.mrf.mxu1 }
 0x1fc   : > { %v4403_v7 = vpop.f32.mrf.mxu0 }
 0x1fd   : > { %v7798_v12 = vadd.f32 %v4578_v6, %v4402_v4  ;;  %v4580_v51 = vpop.f32.mrf.mxu1 }
 0x1fe   : > { %v4404_v17 = vpop.f32.mrf.mxu0 }
 0x1ff   : > { %8122 = vst [vmem:[#allocation7_spill] sm:$0xff] %v7798_v12  ;;  %v4405_v40 = vadd.f32 %v4404_v17, %v7715_v14  ;;  %v4581_v16 = vpop.f32.mrf.mxu1 }
 0x200   : > { %v4406_v19 = vpop.f32.mrf.mxu0 }
 0x201   : > { %v7801_v23 = vadd.f32 %v4581_v16, %v4405_v40  ;;  %v4583_v61 = vpop.f32.mrf.mxu1 }
 0x202   : > { %v4409_v22 = vpop.f32.mrf.mxu0 }
 0x203   : > { %8123 = vst [vmem:[#allocation8_spill] sm:$0xff] %v7801_v23  ;;  %v4410_v47 = vadd.f32 %v4409_v22, %v7717_v53  ;;  %v4586_v27 = vpop.f32.mrf.mxu1 }
 0x204   : > { %v4411_v32 = vpop.f32.mrf.mxu0 }
 0x205   : > { %v7804_v33 = vadd.f32 %v4586_v27, %v4410_v47  ;;  %v4588_v5 = vpop.f32.mrf.mxu1 }
 0x206   : > { %v4412_v30 = vpop.f32.mrf.mxu0 }
 0x207   : > { %v4413_v55 = vadd.f32 %v4412_v30, %v7719_v29  ;;  %v4589_v39 = vpop.f32.mrf.mxu1 }
 0x208   : > { %v4414_v59 = vpop.f32.mrf.mxu0 }
 0x209   : > { %v7807_v43 = vadd.f32 %v4589_v39, %v4413_v55  ;;  %v4591_v14 = vpop.f32.mrf.mxu1 }
 0x20a   : > { %v4417_v36 = vpop.f32.mrf.mxu0 }
 0x20b   : > { %8124 = vst [vmem:[#allocation9_spill] sm:$0xff] %v7807_v43  ;;  %v4418_v0 = vadd.f32 %v4417_v36, %v7721_v37  ;;  %v4594_v1 = vpop.f32.mrf.mxu1 }
 0x20c   : > { %v4419_v56 = vpop.f32.mrf.mxu0 }
 0x20d   : > { %v7810_v57 = vadd.f32 %v4594_v1, %v4418_v0  ;;  %v4596_v53 = vpop.f32.mrf.mxu1 }
 0x20e   : > { %v4420_v44 = vpop.f32.mrf.mxu0 }
 0x20f   : > { %8125 = vst [vmem:[#allocation10_spill] sm:$0xff] %v7810_v57  ;;  %v4421_v9 = vadd.f32 %v4420_v44, %v7723_v46  ;;  %v4597_v4 = vpop.f32.mrf.mxu1 }
 0x210   : > { %v4422_v6 = vpop.f32.mrf.mxu0 }
 0x211   : > { %v7813_v7 = vadd.f32 %v4597_v4, %v4421_v9  ;;  %v4599_v29 = vpop.f32.mrf.mxu1 }
 0x212   : > { %v4425_v51 = vpop.f32.mrf.mxu0 }
 0x213   : > { %8126 = vst [vmem:[#allocation11_spill] sm:$0xff] %v7813_v7  ;;  %v4426_v17 = vadd.f32 %v4425_v51, %v7725_v54  ;;  %v4602_v40 = vpop.f32.mrf.mxu1 }
 0x214   : > { %v4427_v16 = vpop.f32.mrf.mxu0 }
 0x215   : > { %v7816_v19 = vadd.f32 %v4602_v40, %v4426_v17  ;;  %v4604_v37 = vpop.f32.mrf.mxu1 }
 0x216   : > { %v4428_v61 = vpop.f32.mrf.mxu0 }
 0x217   : > { %8127 = vst [vmem:[#allocation12_spill] sm:$0xff] %v7816_v19  ;;  %v4429_v22 = vadd.f32 %v4428_v61, %v7727_v3  ;;  %v4605_v47 = vpop.f32.mrf.mxu1 }
 0x218   : > { %v4430_v27 = vpop.f32.mrf.mxu0 }
 0x219   : > { %v7819_v32 = vadd.f32 %v4605_v47, %v4429_v22  ;;  %v4607_v46 = vpop.f32.mrf.mxu1 }
 0x21a   : > { %v4433_v5 = vpop.f32.mrf.mxu0 }
 0x21b   : > { %8128 = vst [vmem:[#allocation13_spill] sm:$0xff] %v7819_v32  ;;  %v4434_v30 = vadd.f32 %v4433_v5, %v7729_v11  ;;  %v4610_v55 = vpop.f32.mrf.mxu1 }
 0x21c   : > { %v4435_v39 = vpop.f32.mrf.mxu0 }
 0x21d   : > { %v7822_v59 = vadd.f32 %v4610_v55, %v4434_v30  ;;  %v4612_v54 = vpop.f32.mrf.mxu1 }
 0x21e   : > { %v4436_v14 = vpop.f32.mrf.mxu0 }
 0x21f   : > { %v4437_v36 = vadd.f32 %v4436_v14, %v7731_v21  ;;  %v4613_v0 = vpop.f32.mrf.mxu1 }
 0x220   : > { %v4438_v1 = vpop.f32.mrf.mxu0 }
 0x221   : > { %v7825_v56 = vadd.f32 %v4613_v0, %v4437_v36  ;;  %v4615_v3 = vpop.f32.mrf.mxu1 }
 0x222   : > { %v4441_v53 = vpop.f32.mrf.mxu0 }
 0x223   : > { %v4618_v44 = vpop.f32.mrf.mxu1  ;;  %v4442_v23 = vadd.f32 %v4441_v53, %v7733_v28 }
 0x224   : > { %v4443_v9 = vpop.f32.mrf.mxu0 }
 0x225   : > { %v4620_v4 = vpop.f32.mrf.mxu1 }
 0x226   : > { %v4444_v6 = vpop.f32.mrf.mxu0 }
 0x227   : > { %v7827_v29 = vpop.f32.mrf.mxu1 }
 0x228   : > { %v4446_v11 = vpop.f32.mrf.mxu0 }
 0x229   : > { %v4623_v51 = vpop.f32.mrf.mxu1 }
 0x22a   : > { %v7829_v17 = vpop.f32.mrf.mxu0 }
 0x22b   : > { %v7831_v40 = vpop.f32.mrf.mxu1  ;;  %v4450_v18 = vadd.f32 %v7829_v17, %v7737_v49 }
 0x22c   : > { %v4451_v16 = vpop.f32.mrf.mxu0 }
 0x22d   : > { %v4628_v21 = vpop.f32.mrf.mxu1 }
 0x22e   : > { %v7833_v37 = vpop.f32.mrf.mxu0 }
 0x22f   : > { %v7835_v61 = vpop.f32.mrf.mxu1 }
 0x230   : > { %v4454_v22 = vpop.f32.mrf.mxu0 }
 0x231   : > { %v4631_v47 = vpop.f32.mrf.mxu1 }
 0x232   : > { %v4457_v27 = vpop.f32.mrf.mxu0 }
 0x233   : > { %v7837_v46 = vpop.f32.mrf.mxu1 }
 0x234   : > { %v4459_v5 = vpop.f32.mrf.mxu0 }
 0x235   : > { %v4636_v30 = vpop.f32.mrf.mxu1 }
 0x236   : > { %v7839_v55 = vpop.f32.mrf.mxu0 }
 0x237   : > { %v7841_v39 = vpop.f32.mrf.mxu1  ;;  %v4461_v17 = vadd.f32 %v7839_v55, %v7743_v20  ;;  %v4453_v55 = vadd.f32 %v7833_v37, %v7739_v62 }
 0x238   : > { %v4462_v54 = vpop.f32.mrf.mxu0 }
 0x239   : > { %v4639_v14 = vpop.f32.mrf.mxu1  ;;  %v4638_v37 = vadd.f32 %v7841_v39, %v4461_v17 }
 0x23a   : > { %v7843_v36 = vpop.f32.mrf.mxu0 }
 0x23b   : > { %v7845_v0 = vpop.f32.mrf.mxu1 }
 0x23c   : > { %v4467_v1 = vpop.f32.mrf.mxu0 }
 0x23d   : > { %v4644_v3 = vpop.f32.mrf.mxu1 }
 0x23e   : > { %v7847_v9 = vpop.f32.mrf.mxu0 }
 0x23f   : > { %v7849_v4 = vpop.f32.mrf.mxu1 }
 0x240   : > { %v4470_v11 = vpop.f32.mrf.mxu0 }
 0x241   : > { %v4647_v51 = vpop.f32.mrf.mxu1 }
 0x242   : > { %v7851_v16 = vpop.f32.mrf.mxu0 }
 0x243   : > { %v7853_v21 = vpop.f32.mrf.mxu1 }
 0x244   : > { %v4475_v22 = vpop.f32.mrf.mxu0 }
 0x245   : > { %v4652_v47 = vpop.f32.mrf.mxu1 }
 0x246   : > { %v7855_v5 = vpop.f32.mrf.mxu0 }
 0x247   : > { %v7857_v30 = vpop.f32.mrf.mxu1 }
 0x248   : > { %v4478_v54 = vpop.f32.mrf.mxu0 }
 0x249   : > { %v4655_v14 = vpop.f32.mrf.mxu1 }
 0x24a   : > { %v7859_v1 = vpop.f32.mrf.mxu0 }
 0x24b   : > { %v7861_v3 = vpop.f32.mrf.mxu1 }
 0x24c   : > { %v4483_v7 = vpop.f32.mrf.mxu0 }
 0x24d   : > { %v4660_v11 = vpop.f32.mrf.mxu1 }
 0x24e   : > { %v7863_v51 = vpop.f32.mrf.mxu0 }
 0x24f   : > { %8129 = vst [vmem:[#allocation14_spill] sm:$0xff] %v7863_v51  ;;  %v7865_v32 = vpop.f32.mrf.mxu1  ;;  %v4619_v51 = vadd.f32 %v4618_v44, %v4442_v23 }
 0x250   : > { %8130 = vst [vmem:[#allocation15_spill] sm:$0xff] %v7865_v32  ;;  %v4486_v22 = vpop.f32.mrf.mxu0  ;;  %v4445_v32 = vadd.f32 %v4444_v6, %v7735_v41  ;;  %v4458_v41 = vadd.f32 %v4457_v27, %v7741_v8 }
 0x251   : > { %v4663_v47 = vpop.f32.mrf.mxu1 }
 0x252   : > { %v7867_v57 = vpop.f32.mrf.mxu0  ;;  %v7883_v47 = vld [vmem:[%s8116_s2] ss:$0 sm:$0xff] }
 0x253   : > { %v7869_v19 = vpop.f32.mrf.mxu1 }
 0x254   : > { %v4491_v54 = vpop.f32.mrf.mxu0 }
 0x255   : > { %v4668_v14 = vpop.f32.mrf.mxu1  ;;  %v7889_v54 = vld [vmem:[%s8117_s3] ss:$0 sm:$0xff] }
 0x256   : > { %v7872_v43 = vpop.f32.mrf.mxu0 }
 0x257   : > { %v7874_v12 = vpop.f32.mrf.mxu1 }
 0x258   : > { %8131 = vst [vmem:[#allocation16_spill] sm:$0xff] %v7874_v12  ;;  %v4494_v7 = vpop.f32.mrf.mxu0 }
 0x259   : > { %v4671_v11 = vpop.f32.mrf.mxu1 }
 0x25a   : > { %v6038_v22 = vpop.f32.mrf.mxu0  ;;  %v4622_v11 = vadd.f32 %v7827_v29, %v4445_v32 }
 0x25b   : > { %v4716_v28 = vadd.f32 %v6038_v22, %v7768_v15  ;;  %v6058_v53 = vpop.f32.mrf.mxu1 }
 0x25c   : > { %v4796_v14 = vadd.f32 %v6058_v53, %v4619_v51  ;;  %v4707_v23 = vpop.f32.mrf.mxu0 }
 0x25d   : > { %v4859_v44 = vmul.f32 %v7883_v47, %v4716_v28  ;;  %v4708_v6 = vadd.f32 %v4707_v23, %v7762_v50  ;;  %v4787_v7 = vpop.f32.mrf.mxu1 }
 0x25e   : > { %v4879_v12 = vmul.f32 %v7883_v47, %v4796_v14  ;;  %v4788_v15 = vadd.f32 %v4787_v7, %v7822_v59  ;;  %v6039_v22 = vpop.f32.mrf.mxu0  ;;  %v4635_v14 = vadd.f32 %v7837_v46, %v4458_v41 }
 0x25f   : > { %v4902_v51 = vadd.f32 %v7889_v54, %v4859_v44  ;;  %v4857_v53 = vmul.f32 %v7883_v47, %v4708_v6  ;;  %v4719_v8 = vadd.f32 %v6039_v22, %v7771_v25  ;;  %v6059_v27 = vpop.f32.mrf.mxu1  ;;  %v4627_v6 = vadd.f32 %v7831_v40, %v4450_v18 }
 0x260   : > { %v4922_v50 = vadd.f32 %v7889_v54, %v4879_v12  ;;  %v4877_v28 = vmul.f32 %v7883_v47, %v4788_v15  ;;  %v4799_v32 = vadd.f32 %v6059_v27, %v4622_v11  ;;  %v4710_v29 = vpop.f32.mrf.mxu0  ;;  %v4474_v40 = vadd.f32 %v7851_v16, %v7749_v52 }
 0x261   : > { %4938 = vst [vmem:[%s7905_s30 + $0x10] sm:$0xff] %v4902_v51  ;;  %v4900_v49 = vadd.f32 %v7889_v54, %v4857_v53  ;;  %v4860_v59 = vmul.f32 %v7883_v47, %v4719_v8  ;;  %v4711_v25 = vadd.f32 %v4710_v29, %v7765_v2  ;;  %v4790_v12 = vpop.f32.mrf.mxu1  ;;  %v4466_v52 = vadd.f32 %v7843_v36, %v7745_v31 }
 0x262   : > { %4958 = vst [vmem:[%s7905_s30 + $0xb0] sm:$0xff] %v4922_v50  ;;  %v4920_v46 = vadd.f32 %v7889_v54, %v4877_v28  ;;  %v4880_v23 = vmul.f32 %v7883_v47, %v4799_v32  ;;  %v4791_v41 = vadd.f32 %v4790_v12, %v7825_v56  ;;  %v6042_v44 = vpop.f32.mrf.mxu0  ;;  %v4630_v29 = vadd.f32 %v7835_v61, %v4453_v55 }
 0x263   : > { %4936 = vst [vmem:[%s7905_s30] sm:$0xff] %v4900_v49  ;;  %v4903_v7 = vadd.f32 %v7889_v54, %v4860_v59  ;;  %v4858_v2 = vmul.f32 %v7883_v47, %v4711_v25  ;;  %v4732_v11 = vadd.f32 %v6042_v44, %v7780_v60  ;;  %v6062_v20 = vpop.f32.mrf.mxu1  ;;  %v4651_v31 = vadd.f32 %v7853_v21, %v4474_v40 }
 0x264   : > { %4956 = vst [vmem:[%s7905_s30 + $0xa0] sm:$0xff] %v4920_v46  ;;  %v4923_v15 = vadd.f32 %v7889_v54, %v4880_v23  ;;  %v4878_v56 = vmul.f32 %v7883_v47, %v4791_v41  ;;  %v4812_v22 = vadd.f32 %v6062_v20, %v4635_v14  ;;  %v4723_v18 = vpop.f32.mrf.mxu0  ;;  %v4477_v61 = vadd.f32 %v7855_v5, %v7751_v63 }
 0x265   : > { %4939 = vst [vmem:[%s7905_s30 + $0x18] sm:$0xff] %v4903_v7  ;;  %v4901_v51 = vadd.f32 %v7889_v54, %v4858_v2  ;;  %v4863_v60 = vmul.f32 %v7883_v47, %v4732_v11  ;;  %v4724_v53 = vadd.f32 %v4723_v18, %v7774_v38  ;;  %v4803_v62 = vpop.f32.mrf.mxu1  ;;  %v4643_v44 = vadd.f32 %v7845_v0, %v4466_v52 }
 0x266   : > { %4959 = vst [vmem:[%s7905_s30 + $0xb8] sm:$0xff] %v4923_v15  ;;  %v4921_v8 = vadd.f32 %v7889_v54, %v4878_v56  ;;  %v4883_v27 = vmul.f32 %v7883_v47, %v4812_v22  ;;  %v4804_v50 = vadd.f32 %v4803_v62, %v4627_v6  ;;  %v6043_v28 = vpop.f32.mrf.mxu0  ;;  %v4469_v63 = vadd.f32 %v7847_v9, %v7747_v42 }
 0x267   : > { %4937 = vst [vmem:[%s7905_s30 + $0x8] sm:$0xff] %v4901_v51  ;;  %v4906_v16 = vadd.f32 %v7889_v54, %v4863_v60  ;;  %v4861_v32 = vmul.f32 %v7883_v47, %v4724_v53  ;;  %v4735_v38 = vadd.f32 %v6043_v28, %v7783_v13  ;;  %v6063_v39 = vpop.f32.mrf.mxu1  ;;  %v4490_v55 = vadd.f32 %v7867_v57, %v7757_v26 }
 0x268   : > { %4957 = vst [vmem:[%s7905_s30 + $0xa8] sm:$0xff] %v4921_v8  ;;  %v4926_v14 = vadd.f32 %v7889_v54, %v4883_v27  ;;  %v4881_v49 = vmul.f32 %v7883_v47, %v4804_v50  ;;  %v4815_v59 = vadd.f32 %v6063_v39, %v4638_v37  ;;  %v4726_v25 = vpop.f32.mrf.mxu0  ;;  %v4654_v9 = vadd.f32 %v7857_v30, %v4477_v61  ;;  %v8135_v61 = vld [vmem:[#allocation16_spill] sm:$0xff] }
 0x269   : > { %4942 = vst [vmem:[%s7905_s30 + $0x30] sm:$0xff] %v4906_v16  ;;  %v4904_v36 = vadd.f32 %v7889_v54, %v4861_v32  ;;  %v4864_v12 = vmul.f32 %v7883_v47, %v4735_v38  ;;  %v4727_v13 = vadd.f32 %v4726_v25, %v7777_v48  ;;  %v4806_v17 = vpop.f32.mrf.mxu1  ;;  %v4482_v26 = vadd.f32 %v7859_v1, %v7753_v10 }
 0x26a   : > { %4962 = vst [vmem:[%s7905_s30 + $0xd0] sm:$0xff] %v4926_v14  ;;  %v4924_v46 = vadd.f32 %v7889_v54, %v4881_v49  ;;  %v4884_v23 = vmul.f32 %v7883_v47, %v4815_v59  ;;  %v4807_v41 = vadd.f32 %v4806_v17, %v4630_v29  ;;  %v6046_v21 = vpop.f32.mrf.mxu0  ;;  %v4646_v53 = vadd.f32 %v7849_v4, %v4469_v63 }
 0x26b   : > { %4940 = vst [vmem:[%s7905_s30 + $0x20] sm:$0xff] %v4904_v36  ;;  %v4907_v6 = vadd.f32 %v7889_v54, %v4864_v12  ;;  %v4862_v7 = vmul.f32 %v7883_v47, %v4727_v13  ;;  %v4748_v48 = vadd.f32 %v6046_v21, %v7792_v45  ;;  %v6066_v2 = vpop.f32.mrf.mxu1  ;;  %v4667_v10 = vadd.f32 %v7869_v19, %v4490_v55  ;;  %v8134_v13 = vld [vmem:[#allocation7_spill] sm:$0xff] }
 0x26c   : > { %4960 = vst [vmem:[%s7905_s30 + $0xc0] sm:$0xff] %v4924_v46  ;;  %v4927_v5 = vadd.f32 %v7889_v54, %v4884_v23  ;;  %v4882_v11 = vmul.f32 %v7883_v47, %v4807_v41  ;;  %v4828_v20 = vadd.f32 %v6066_v2, %v4651_v31  ;;  %v4739_v0 = vpop.f32.mrf.mxu0  ;;  %v4493_v4 = vadd.f32 %v7872_v43, %v7759_v35  ;;  %v8132_v35 = vld [vmem:[#allocation6_spill] sm:$0xff] }
 0x26d   : > { %4943 = vst [vmem:[%s7905_s30 + $0x38] sm:$0xff] %v4907_v6  ;;  %v4905_v15 = vadd.f32 %v7889_v54, %v4862_v7  ;;  %v4867_v45 = vmul.f32 %v7883_v47, %v4748_v48  ;;  %v4740_v56 = vadd.f32 %v4739_v0, %v7786_v24  ;;  %v4819_v42 = vpop.f32.mrf.mxu1  ;;  %v4659_v38 = vadd.f32 %v7861_v3, %v4482_v26  ;;  %v8133_v43 = vld [vmem:[#allocation14_spill] sm:$0xff]  ;;  %v8136_v48 = vld [vmem:[#allocation9_spill] sm:$0xff] }
 0x26e   : > { %4963 = vst [vmem:[%s7905_s30 + $0xd8] sm:$0xff] %v4927_v5  ;;  %v4925_v22 = vadd.f32 %v7889_v54, %v4882_v11  ;;  %v4887_v18 = vmul.f32 %v7883_v47, %v4828_v20  ;;  %v4820_v40 = vadd.f32 %v4819_v42, %v4643_v44  ;;  %v6047_v51 = vpop.f32.mrf.mxu0  ;;  %v4485_v49 = vadd.f32 %v8133_v43, %v8132_v35  ;;  %v8137_v5 = vld [vmem:[#allocation15_spill] sm:$0xff]  ;;  %v8138_v42 = vld [vmem:[#allocation8_spill] sm:$0xff] }
 0x26f   : > { %4941 = vst [vmem:[%s7905_s30 + $0x28] sm:$0xff] %v4905_v15  ;;  %v4910_v57 = vadd.f32 %v7889_v54, %v4867_v45  ;;  %v4865_v60 = vmul.f32 %v7883_v47, %v4740_v56  ;;  %v4751_v24 = vadd.f32 %v6047_v51, %v7795_v58  ;;  %v6067_v30 = vpop.f32.mrf.mxu1  ;;  %v4670_v46 = vadd.f32 %v8135_v61, %v4493_v4 }
 0x270   : > { %4961 = vst [vmem:[%s7905_s30 + $0xc8] sm:$0xff] %v4925_v22  ;;  %v4930_v62 = vadd.f32 %v7889_v54, %v4887_v18  ;;  %v4885_v37 = vmul.f32 %v7883_v47, %v4820_v40  ;;  %v4831_v8 = vadd.f32 %v6067_v30, %v4654_v9  ;;  %v4742_v27 = vpop.f32.mrf.mxu0  ;;  %v4662_v11 = vadd.f32 %v8137_v5, %v4485_v49 }
 0x271   : > { %4946 = vst [vmem:[%s7905_s30 + $0x50] sm:$0xff] %v4910_v57  ;;  %v4908_v1 = vadd.f32 %v7889_v54, %v4865_v60  ;;  %v4868_v50 = vmul.f32 %v7883_v47, %v4751_v24  ;;  %v4743_v58 = vadd.f32 %v4742_v27, %v7789_v34  ;;  %v4822_v28 = vpop.f32.mrf.mxu1  ;;  %v8139_v24 = vld [vmem:[#allocation12_spill] sm:$0xff] }
 0x272   : > { %4966 = vst [vmem:[%s7905_s30 + $0xf0] sm:$0xff] %v4930_v62  ;;  %v4928_v52 = vadd.f32 %v7889_v54, %v4885_v37  ;;  %v4888_v16 = vmul.f32 %v7883_v47, %v4831_v8  ;;  %v4823_v32 = vadd.f32 %v4822_v28, %v4646_v53  ;;  %v6050_v19 = vpop.f32.mrf.mxu0 }
 0x273   : > { %4944 = vst [vmem:[%s7905_s30 + $0x40] sm:$0xff] %v4908_v1  ;;  %v4911_v39 = vadd.f32 %v7889_v54, %v4868_v50  ;;  %v4866_v34 = vmul.f32 %v7883_v47, %v4743_v58  ;;  %v4764_v29 = vadd.f32 %v6050_v19, %v7804_v33  ;;  %v6070_v14 = vpop.f32.mrf.mxu1 }
 0x274   : > { %4964 = vst [vmem:[%s7905_s30 + $0xe0] sm:$0xff] %v4928_v52  ;;  %v4931_v59 = vadd.f32 %v7889_v54, %v4888_v16  ;;  %v4886_v25 = vmul.f32 %v7883_v47, %v4823_v32  ;;  %v4844_v31 = vadd.f32 %v6070_v14, %v4667_v10  ;;  %v4755_v3 = vpop.f32.mrf.mxu0  ;;  %v8140_v10 = vld [vmem:[#allocation10_spill] sm:$0xff]  ;;  %v8141_v52 = vld [vmem:[#allocation13_spill] sm:$0xff] }
 0x275   : > { %4947 = vst [vmem:[%s7905_s30 + $0x58] sm:$0xff] %v4911_v39  ;;  %v4909_v36 = vadd.f32 %v7889_v54, %v4866_v34  ;;  %v4871_v12 = vmul.f32 %v7883_v47, %v4764_v29  ;;  %v4756_v33 = vadd.f32 %v4755_v3, %v8134_v13  ;;  %v4835_v17 = vpop.f32.mrf.mxu1  ;;  %v8142_v39 = vld [vmem:[#allocation11_spill] sm:$0xff] }
 0x276   : > { %4967 = vst [vmem:[%s7905_s30 + $0xf8] sm:$0xff] %v4931_v59  ;;  %v4929_v23 = vadd.f32 %v7889_v54, %v4886_v25  ;;  %v4891_v41 = vmul.f32 %v7883_v47, %v4844_v31  ;;  %v4836_v21 = vadd.f32 %v4835_v17, %v4659_v38  ;;  %v6051_v44 = vpop.f32.mrf.mxu0 }
 0x277   : > { %4945 = vst [vmem:[%s7905_s30 + $0x48] sm:$0xff] %v4909_v36  ;;  %v4914_v6 = vadd.f32 %v7889_v54, %v4871_v12  ;;  %v4869_v7 = vmul.f32 %v7883_v47, %v4756_v33  ;;  %v4767_v2 = vadd.f32 %v6051_v44, %v8136_v48  ;;  %v6071_v63 = vpop.f32.mrf.mxu1 }
 0x278   : > { %4965 = vst [vmem:[%s7905_s30 + $0xe8] sm:$0xff] %v4929_v23  ;;  %v4934_v20 = vadd.f32 %v7889_v54, %v4891_v41  ;;  %v4889_v0 = vmul.f32 %v7883_v47, %v4836_v21  ;;  %v4847_v55 = vadd.f32 %v6071_v63, %v4670_v46  ;;  %v4758_v15 = vpop.f32.mrf.mxu0 }
 0x279   : > { %4950 = vst [vmem:[%s7905_s30 + $0x70] sm:$0xff] %v4914_v6  ;;  %v4912_v45 = vadd.f32 %v7889_v54, %v4869_v7  ;;  %v4872_v56 = vmul.f32 %v7883_v47, %v4767_v2  ;;  %v4759_v9 = vadd.f32 %v4758_v15, %v8138_v42  ;;  %v4838_v22 = vpop.f32.mrf.mxu1 }
 0x27a   : > { %4970 = vst [vmem:[%s7905_s30 + $0x110] sm:$0xff] %v4934_v20  ;;  %v4932_v18 = vadd.f32 %v7889_v54, %v4889_v0  ;;  %v4892_v40 = vmul.f32 %v7883_v47, %v4847_v55  ;;  %v4839_v51 = vadd.f32 %v4838_v22, %v4662_v11  ;;  %v6054_v26 = vpop.f32.mrf.mxu0 }
 0x27b   : > { %4948 = vst [vmem:[%s7905_s30 + $0x60] sm:$0xff] %v4912_v45  ;;  %v4915_v57 = vadd.f32 %v7889_v54, %v4872_v56  ;;  %v4870_v60 = vmul.f32 %v7883_v47, %v4759_v9  ;;  %v4780_v30 = vadd.f32 %v6054_v26, %v8139_v24 }
 0x27c   : > { %4968 = vst [vmem:[%s7905_s30 + $0x100] sm:$0xff] %v4932_v18  ;;  %v4935_v53 = vadd.f32 %v7889_v54, %v4892_v40  ;;  %v4890_v62 = vmul.f32 %v7883_v47, %v4839_v51  ;;  %v4771_v37 = vpop.f32.mrf.mxu0 }
 0x27d   : > { %4951 = vst [vmem:[%s7905_s30 + $0x78] sm:$0xff] %v4915_v57  ;;  %v4913_v8 = vadd.f32 %v7889_v54, %v4870_v60  ;;  %v4875_v27 = vmul.f32 %v7883_v47, %v4780_v30  ;;  %v4772_v1 = vadd.f32 %v4771_v37, %v8140_v10 }
 0x27e   : > { %4971 = vst [vmem:[%s7905_s30 + $0x118] sm:$0xff] %v4935_v53  ;;  %v4933_v50 = vadd.f32 %v7889_v54, %v4890_v62  ;;  %v6055_v58 = vpop.f32.mrf.mxu0 }
 0x27f   : > { %4949 = vst [vmem:[%s7905_s30 + $0x68] sm:$0xff] %v4913_v8  ;;  %v4918_v28 = vadd.f32 %v7889_v54, %v4875_v27  ;;  %v4873_v4 = vmul.f32 %v7883_v47, %v4772_v1  ;;  %v4783_v16 = vadd.f32 %v6055_v58, %v8141_v52 }
 0x280   : > { %4969 = vst [vmem:[%s7905_s30 + $0x108] sm:$0xff] %v4933_v50  ;;  %v4774_v32 = vpop.f32.mrf.mxu0 }
 0x281   : > { %4954 = vst [vmem:[%s7905_s30 + $0x90] sm:$0xff] %v4918_v28  ;;  %v4916_v19 = vadd.f32 %v7889_v54, %v4873_v4  ;;  %v4876_v38 = vmul.f32 %v7883_v47, %v4783_v16  ;;  %v4775_v34 = vadd.f32 %v4774_v32, %v8142_v39 }
 0x283   : > { %4952 = vst [vmem:[%s7905_s30 + $0x80] sm:$0xff] %v4916_v19  ;;  %v4919_v29 = vadd.f32 %v7889_v54, %v4876_v38  ;;  %v4874_v14 = vmul.f32 %v7883_v47, %v4775_v34 }
 0x285   : > { %4955 = vst [vmem:[%s7905_s30 + $0x98] sm:$0xff] %v4919_v29  ;;  %v4917_v35 = vadd.f32 %v7889_v54, %v4874_v14 }
 0x287   : > { %4953 = vst [vmem:[%s7905_s30 + $0x88] sm:$0xff] %v4917_v35 }
 0x288   : > { %6443 = shalt.err (!%p6440_p5)
}
 0x289   : > { %s6444_s7 = scalar_lea.hbm %s8060_s10, 4608  ;;  %s6448_s24 = scalar_lea.hbm %s8118_s4, 9216 }
 0x28a   : > { %p6445_p6 = scmp.ne.s32.totalorder %s8060_s10, %s6444_s7  ;;  %p6449_p10 = scmp.lt.s32.totalorder %s8060_s10, %s8118_s4 }
 0x28b   : > { %p6450_p11 = scmp.lt.s32.totalorder %s6448_s24, %s6444_s7 }
 0x28c   : > { %p6446_p7 = pnand %p6445_p6, %p6577_p4 }
 0x28d   : > { %p6451_p12 = por %p6450_p11, %p6449_p10 }
 0x28e   : > { %p6447_p9 = pneg %p6446_p7 }
 0x290   : > { %p6452_p13 = pnand %p6451_p12, %p6447_p9 }
 0x292   : > { %6455 = shalt.err (!%p6452_p13)
}
 0x293   : > { %s6510_s30 = smov 128   ;;  %s6511_s5 = smov 8  }
 0x294   : > { %6091 = dma.vmem_to_hbm [thread:$0]  (%p6577_p4), %s8062_s6, 4608, %s8060_s10, %s8069_s18, %s6510_s30, %s6510_s30, %s6511_s5  }
 0x295 PF: > { %p6097_p0 = scmp.ge.s32.totalorder %s6506_s20, 2  ;;  %s5002_s8 = sand.u32 1, %s6486_s15  }
 0x296   : > { %s5003_s9 = scalar_lea.sflag [#allocation4], %s5002_s8 }
 0x297   : > { %p6094_p1 = pnand %p6097_p0, %p6584_p8 }
 0x299   : > { %p6095_p2 = pneg %p6094_p1 }
 0x29b   : > { %6481 = dma.done.wait (%p6095_p2), %s5003_s9, 4608  }
 0x29c   : > { %6483 = vsyncadd (%p6095_p2), %s5003_s9, 4294962688  ;;  %s17_s20 = sadd.s32 1, %s6506_s20   ;;  %s8143_s15 = smov %s6490_s16 }
 0x29d   : > { %p14_p3 = scmp.ge.s32.totalorder %s17_s20, 4   ;;  %s8144_s16 = smov %s6494_s17 }
 0x29e   : > { %s8145_s17 = smov %s6590_s28  ;;  %s8146_s18 = smov %s6502_s19 }
 0x29f   : > { %s8147_s19 = smov %s8149_s23  ;;  %16 = sbr.rel (!%p14_p3) target bundleno = 4 (0x4), region = 80 }
 0x2a4   :  { %5008 = vsyncpa [#allocation4], 1 }
 0x2a5   :  { %5010 = vsyncpa [#allocation4 + $0x1], 1 }

</bundles_post_ra>
